<compile_context>
chip_gen: v7x
topology: tpu7x:2x2x1
jax: 0.10.0
libtpu: 0.0.40
codegen_flags: <defaults>
</compile_context>

<pallas_src>
import math

import jax
import jax.numpy as jnp
from jax.experimental import pallas as pl
from jax.experimental.pallas import tpu as pltpu

BASIS = (-3, -2, -1, 0, 1, 2)          # frequency exponents (static)
N_FREQ = len(BASIS)                    # F = 6
FREQ_ROWS = 3 * N_FREQ                 # 18 rows per sin / cos slab
OUT_DIM = 3 + 2 * FREQ_ROWS            # 39


def _round_up(x: int, m: int) -> int:
    return (x + m - 1) // m * m


def _pe_kernel(w_ref, x_ref, o_ref):
    """w_ref: (18, 1) f32 VMEM (alpha-window weights, row-aligned with slab)
       x_ref: (3, tile_n) f32 VMEM (transposed coordinates)
       o_ref: (39, tile_n) f32 VMEM, rows = [x,y,z | sin slab (18) | cos slab (18)]."""
    x = x_ref[...]                                            # (3, tile_n)

    # Pre-scaled copies of the coordinates, one per frequency band.
    # Static Python loop -> 6 cheap VPU multiplies, one sublane concat.
    scaled = jnp.concatenate(
        [x * float((2.0 ** b) * math.pi) for b in BASIS], axis=0
    )                                                         # (18, tile_n)

    # Hoist the lane-broadcast of the per-row weights (used twice).
    w = jnp.broadcast_to(w_ref[...], scaled.shape)            # (18, tile_n)

    # Exactly one dense sin and one dense cos on full vregs.
    o_ref[pl.ds(0, 3), :] = x
    o_ref[pl.ds(3, FREQ_ROWS), :] = w * jnp.sin(scaled)
    o_ref[pl.ds(3 + FREQ_ROWS, FREQ_ROWS), :] = w * jnp.cos(scaled)


def positional_encoding(coordinates: jax.Array, alpha, *, tile_n: int = 4096):
    """coordinates: (N, 3) float32; alpha: python float or f32 scalar.
    Returns (N, 39) float32 with the same column ordering as the PyTorch module."""
    N, C = coordinates.shape
    assert C == 3, "expected (N, 3) coordinates"

    # Tile selection: multiple of 128 lanes, no larger than needed for small N.
    tile_n = max(128, _round_up(tile_n, 128))
    tile_n = min(tile_n, _round_up(N, 128))
    n_pad = _round_up(N, tile_n)

    # Coarse-to-fine window weights, computed once outside the kernel
    # (traced from alpha so changing alpha does not trigger a recompile).
    alpha_f = jnp.asarray(alpha, dtype=jnp.float32)
    freq_idx = jnp.arange(N_FREQ, dtype=jnp.float32)
    progress = jnp.clip(alpha_f * N_FREQ - freq_idx, 0.0, 1.0)
    weights = 0.5 * (1.0 - jnp.cos(progress * math.pi))           # (F,)
    w18 = jnp.repeat(weights, 3).reshape(FREQ_ROWS, 1)            # (18, 1)

    # Transposed, padded, lane-dense input: (3, n_pad).
    x_t = coordinates.astype(jnp.float32).T
    if n_pad != N:
        x_t = jnp.pad(x_t, ((0, 0), (0, n_pad - N)))

    out_t = pl.pallas_call(
        _pe_kernel,
        out_shape=jax.ShapeDtypeStruct((OUT_DIM, n_pad), jnp.float32),
        grid_spec=pl.GridSpec(
            grid=(n_pad // tile_n,),
            in_specs=[
                pl.BlockSpec((FREQ_ROWS, 1), lambda i: (0, 0)),   # weights (full)
                pl.BlockSpec((3, tile_n), lambda i: (0, i)),      # coords slab
            ],
            out_specs=pl.BlockSpec((OUT_DIM, tile_n), lambda i: (0, i)),
        ),
        compiler_params=pltpu.CompilerParams(
            dimension_semantics=("parallel",),                    # megacore on v7x
        ),
    )(w18, x_t)

    # Layout plumbing only: drop padding, transpose back, and interleave the
    # sin/cos slabs per frequency to match the PyTorch column ordering
    # [x, y, z, sin_f(xyz), cos_f(xyz), ...].
    out_t = out_t[:, :N]
    xyz = out_t[0:3, :].T                                         # (N, 3)
    sin_v = out_t[3:3 + FREQ_ROWS, :].T.reshape(N, N_FREQ, 3)     # (N, F, 3)
    cos_v = out_t[3 + FREQ_ROWS:OUT_DIM, :].T.reshape(N, N_FREQ, 3)
    freqs = jnp.concatenate((sin_v, cos_v), axis=-1).reshape(N, 2 * FREQ_ROWS)
    return jnp.concatenate((xyz, freqs), axis=-1)


def _reference(coordinates: jax.Array, alpha: float) -> jax.Array:
    """Pure-JAX transcription of the PyTorch forward, for verification."""
    freq_indices = jnp.arange(N_FREQ, dtype=jnp.float32)
    progress = jnp.clip(alpha * N_FREQ - freq_indices, 0.0, 1.0)
    weights = 0.5 * (1.0 - jnp.cos(progress * math.pi))              # (F,)
    basis_exps = jnp.asarray(BASIS, dtype=jnp.float32)
    scaled = (2.0 ** basis_exps)[None, :, None] * math.pi * coordinates[:, None, :]
    w = weights[None, :, None]
    sin_v = w * jnp.sin(scaled)
    cos_v = w * jnp.cos(scaled)
    freqs = jnp.concatenate((sin_v, cos_v), axis=-1).reshape(coordinates.shape[0], -1)
    return jnp.concatenate((coordinates, freqs), axis=-1)


if __name__ == "__main__":
    key = jax.random.PRNGKey(0)
    N = 1000                             # deliberately NOT a multiple of the tile
    coords = jax.random.uniform(key, (N, 3), dtype=jnp.float32, minval=-1.0, maxval=1.0)
    alpha = 0.45

    out = jax.block_until_ready(positional_encoding(coords, alpha))
    ref = _reference(coords, alpha)

    assert out.shape == (N, OUT_DIM), out.shape
    max_err = float(jnp.max(jnp.abs(out - ref)))
    assert jnp.allclose(out, ref, atol=1e-5, rtol=1e-5), max_err

    print("KERNEL_OK")
</pallas_src>

<mosaic_0001>
module attributes {stable_mosaic.version = 11 : i64} {
  func.func @_pe_kernel(%arg0: i32, %arg1: memref<18x1xf32, #tpu.memory_space<vmem>>, %arg2: memref<3x1024xf32, #tpu.memory_space<vmem>>, %arg3: memref<39x1024xf32, #tpu.memory_space<vmem>>) attributes {dimension_semantics = [#tpu.dimension_semantics<parallel>], iteration_bounds = array<i64: 1>, scalar_prefetch = 0 : i64, scratch_operands = 0 : i64, tpu.core_type = #tpu.core_type<tc>, window_params = [{pipeline_mode = #tpu.pipeline_mode<synchronous>, transform_indices = @transform_0, window_bounds = array<i64: 18, 1>}, {transform_indices = @transform_1, window_bounds = array<i64: 3, 1024>}, {transform_indices = @transform_2, window_bounds = array<i64: 39, 1024>}]} {
    %c0 = arith.constant 0 : index
    %c0_0 = arith.constant 0 : index
    %0 = vector.load %arg2[%c0, %c0_0] : memref<3x1024xf32, #tpu.memory_space<vmem>>, vector<3x1024xf32>
    %cst = arith.constant 0.392699093 : f32
    %1 = vector.broadcast %cst : f32 to vector<3x1024xf32>
    %2 = arith.mulf %0, %1 : vector<3x1024xf32>
    %cst_1 = arith.constant 0.785398185 : f32
    %3 = vector.broadcast %cst_1 : f32 to vector<3x1024xf32>
    %4 = arith.mulf %0, %3 : vector<3x1024xf32>
    %cst_2 = arith.constant 1.57079637 : f32
    %5 = vector.broadcast %cst_2 : f32 to vector<3x1024xf32>
    %6 = arith.mulf %0, %5 : vector<3x1024xf32>
    %cst_3 = arith.constant 3.14159274 : f32
    %7 = vector.broadcast %cst_3 : f32 to vector<3x1024xf32>
    %8 = arith.mulf %0, %7 : vector<3x1024xf32>
    %cst_4 = arith.constant 6.28318548 : f32
    %9 = vector.broadcast %cst_4 : f32 to vector<3x1024xf32>
    %10 = arith.mulf %0, %9 : vector<3x1024xf32>
    %cst_5 = arith.constant 12.566371 : f32
    %11 = vector.broadcast %cst_5 : f32 to vector<3x1024xf32>
    %12 = arith.mulf %0, %11 : vector<3x1024xf32>
    %13 = tpu.concatenate %2, %4, %6, %8, %10, %12 in 0 : vector<3x1024xf32>, vector<3x1024xf32>, vector<3x1024xf32>, vector<3x1024xf32>, vector<3x1024xf32>, vector<3x1024xf32> -> vector<18x1024xf32>
    %c0_6 = arith.constant 0 : index
    %c0_7 = arith.constant 0 : index
    %14 = vector.load %arg1[%c0_6, %c0_7] : memref<18x1xf32, #tpu.memory_space<vmem>>, vector<18x1xf32>
    %15 = vector.shape_cast %14 : vector<18x1xf32> to vector<18x1xf32>
    %16 = vector.broadcast %15 : vector<18x1xf32> to vector<18x1024xf32>
    %c0_8 = arith.constant 0 : index
    %c0_9 = arith.constant 0 : index
    %17 = vector.load %arg3[%c0_8, %c0_9] : memref<39x1024xf32, #tpu.memory_space<vmem>>, vector<3x1024xf32>
    tpu.vector_store %arg3[%c0_8, %c0_9], %0 {strides = array<i32>} : memref<39x1024xf32, #tpu.memory_space<vmem>>, vector<3x1024xf32>,
    %18 = math.sin %13 : vector<18x1024xf32>
    %19 = arith.mulf %16, %18 : vector<18x1024xf32>
    %c3 = arith.constant 3 : index
    %c0_10 = arith.constant 0 : index
    %20 = vector.load %arg3[%c3, %c0_10] : memref<39x1024xf32, #tpu.memory_space<vmem>>, vector<18x1024xf32>
    tpu.vector_store %arg3[%c3, %c0_10], %19 {strides = array<i32>} : memref<39x1024xf32, #tpu.memory_space<vmem>>, vector<18x1024xf32>,
    %21 = math.cos %13 : vector<18x1024xf32>
    %22 = arith.mulf %16, %21 : vector<18x1024xf32>
    %c21 = arith.constant 21 : index
    %c0_11 = arith.constant 0 : index
    %23 = vector.load %arg3[%c21, %c0_11] : memref<39x1024xf32, #tpu.memory_space<vmem>>, vector<18x1024xf32>
    tpu.vector_store %arg3[%c21, %c0_11], %22 {strides = array<i32>} : memref<39x1024xf32, #tpu.memory_space<vmem>>, vector<18x1024xf32>,
    return
  }
  func.func @transform_0(%arg0: i32) -> (i32, i32) {
    %c0_i32 = arith.constant 0 : i32
    %c0_i32_0 = arith.constant 0 : i32
    %c0_i32_1 = arith.constant 0 : i32
    return %c0_i32, %c0_i32_0 : i32, i32
  }
  func.func @transform_1(%arg0: i32) -> (i32, i32) {
    %c0_i32 = arith.constant 0 : i32
    %c0_i32_0 = arith.constant 0 : i32
    return %c0_i32, %arg0 : i32, i32
  }
  func.func @transform_2(%arg0: i32) -> (i32, i32) {
    %c0_i32 = arith.constant 0 : i32
    %c0_i32_0 = arith.constant 0 : i32
    return %c0_i32, %arg0 : i32, i32
  }
}

</mosaic_0001>

<bundles_post_ra>
// kernel: tpu_custom_call.1
= control target key start
LH: loop header
LB: loop body
LE: loop exit
PB: predicated region body
PF: predicated region fallthrough
CT: control target
= control target key end

     0   :  { %7 = vsyncpa [#allocation3], 0  ;;  %s9532_s0 = inlined_call_operand.vmem [shape: f32[18,1], index: 0, kind: input, shape index: {}]   ;;  %s9533_s1 = inlined_call_operand.hbm [shape: f32[3,1024], index: 1, kind: input, shape index: {}]   ;;  %s9534_s2 = inlined_call_operand.hbm [shape: f32[39,1024], index: 2, kind: output, shape index: {}]  }
   0x1   :  { %8 = vsyncpa [#allocation4], 0  ;;  %s5962_s9 = smov [#allocation2]   ;;  %s5914_s13 = scalar_lea.hbm %s9533_s1, 512 }
   0x2   :  { %s17_s10 = sshll.u32 %s5962_s9, 4  ;;  %p5915_p0 = scmp.ne.s32.totalorder %s9533_s1, %s5914_s13  ;;  %s18_s10 = int_to_ptr.vmem [resolvable:$true] %s17_s10 }
   0x3   :  { %p5918_p1 = scmp.lt.u32.totalorder %s5914_s13, %s9533_s1 }
   0x5   :  { %p5920_p2 = pnand %p5918_p1, %p5915_p0 }
   0x7   :  { %5923 = shalt.err (!%p5920_p2)
}
   0x8   :  { %s5924_s18 = scalar_lea.vmem %s18_s10, 512  ;;  %p5929_p4 = scmp.lt.s32.totalorder %s18_s10, %s18_s10 }
   0x9   :  { %p5925_p3 = scmp.ne.s32.totalorder %s18_s10, %s5924_s18  ;;  %p5930_p5 = scmp.lt.s32.totalorder %s5924_s18, %s5924_s18 }
   0xb   :  { %p5931_p6 = por %p5930_p5, %p5929_p4 }
   0xd   :  { %p5932_p7 = pnand %p5931_p6, %p5925_p3 }
   0xf   :  { %5935 = shalt.err (!%p5932_p7)
}
  0x10   :  { %20 = dma.hbm_to_vmem [thread:$0]  %s9533_s1, 512, %s18_s10, [#allocation3]  }
  0x11   :  { %5958 = dma.done.wait [#allocation3], 512  }
  0x12   :  { %5959 = vsyncadd [#allocation3], 4294966784  ;;  %v5963_v0 = vmov 0   ;;  %v217_v1 = vld [vmem:[%s9532_s0] sm:$0xff]  ;;  %v219_v2 = vld [vmem:[%s9532_s0 + $0x10] sm:$0x3] }
  0x13   :  { %5812 = vset.pattern.permute.xlu0 %v5963_v0  ;;  %5813 = vset.pattern.permute.xlu1 %v5963_v0  ;;  %v6006_v3 = vld [vmem:[#allocation2] sm:$0x77]  ;;  %v6008_v4 = vld [vmem:[#allocation2 + $0x8] sm:$0x77]  ;;  %v6010_v5 = vld [vmem:[#allocation2 + $0x10] sm:$0x77] }
  0x14   :  { %222 = vperm.xlu0 %5812, %v217_v1   ;;  %232 = vperm.xlu1 %5813, %v219_v2   ;;  %v218_v6 = vld [vmem:[%s9532_s0 + $0x8] sm:$0xff]  ;;  %v6015_v7 = vld [vmem:[#allocation2 + $0x18] sm:$0x77]  ;;  %247 = vst [vmem:[#allocation5] sm:$0x7] %v6006_v3  ;;  %vm9643_vm0 = vcmask 1042432   ;;  %v239_v28 = vcombine.high %v6006_v3, %v6006_v3  ;;  %v240_v29 = vcombine.high %v6008_v4, %v6008_v4 }
  0x15   :  { %249 = vst [vmem:[#allocation5 + $0x10] sm:$0x7] %v6008_v4  ;;  %251 = vst [vmem:[#allocation5 + $0x20] sm:$0x7] %v6010_v5  ;;  %v32_v8 = vmul.f32 0.7853982, %v6006_v3  ;;  %v241_v30 = vcombine.high %v6010_v5, %v6010_v5  ;;  %v242_v31 = vcombine.high %v6015_v7, %v6015_v7 }
  0x16   :  { %253 = vst [vmem:[#allocation5 + $0x30] sm:$0x7] %v6015_v7  ;;  %v6023_v9 = vmul.f32 1.5707964, %v6006_v3  ;;  %v28_v10 = vmul.f32 0.3926991, %v6006_v3 }
  0x17   :  { %v68_v11 = vcombine.high %v32_v8, %v32_v8  ;;  %v72_v12 = vrot.slane %v32_v8, 5  ;;  %v6029_v16 = vmul.f32 0.7853982, %v6008_v4  ;;  %vm181_vm1 = vcmask 1045504   ;;  %248 = vst [vmem:[#allocation5 + $0x8] sm:$0x7] %v239_v28 }
  0x18   :  { %227 = vperm.xlu0 %5812, %v218_v6   ;;  %v92_v13 = vcombine.high %v6023_v9, %v6023_v9  ;;  %v56_v14 = vcombine.high %v28_v10, %v28_v10  ;;  %v9538_v17 = vrot.slane %v6023_v9, 2  ;;  %v6038_v22 = vmul.f32 0.3926991, %v6008_v4  ;;  %250 = vst [vmem:[#allocation5 + $0x18] sm:$0x7] %v240_v29  ;;  %s5970_s0 = smov [#allocation5]  }
  0x19   :  { %v73_v15 = vrot.slane %v68_v11, 5  ;;  %v74_v18 = vrot.slane %v6029_v16, 5  ;;  %v173_v20 = vsel %vm9643_vm0, %v28_v10, %v72_v12  ;;  %v6041_v23 = vmul.f32 1.5707964, %v6008_v4  ;;  %252 = vst [vmem:[#allocation5 + $0x28] sm:$0x7] %v241_v30 }
  0x1a   :  { %v6033_v19 = vrot.slane %v92_v13, 2  ;;  %v6046_v24 = vsel %vm181_vm1, %v173_v20, %v9538_v17  ;;  %254 = vst [vmem:[#allocation5 + $0x38] sm:$0x7] %v242_v31  ;;  %v6075_v42 = vmul.f32 0.3926991, %v6010_v5  ;;  %v57_v50 = vcombine.high %v6038_v22, %v6038_v22  ;;  %s5501_s26 = sshll.u32 %s5970_s0, 4  ;;  %s9505_s26 = int_to_ptr.vmem [resolvable:$true] %s5501_s26 }
  0x1b   :  { %v174_v21 = vsel %vm9643_vm0, %v56_v14, %v73_v15  ;;  %9777 = vst [vmem:[#allocation8_spill] sm:$0xff] %v6046_v24  ;;  %v9537_v25 = vrot.slane %v6041_v23, 2  ;;  %v175_v26 = vsel %vm9643_vm0, %v6038_v22, %v74_v18  ;;  %v9536_v32 = vand.u32 2147483647, %v6046_v24  ;;  %s5936_s27 = scalar_lea.vmem %s9505_s26, 5120  ;;  %p5941_p9 = scmp.lt.s32.totalorder %s9505_s26, %s9505_s26 }
  0x1c   :  { %v6053_v27 = vsel %vm181_vm1, %v174_v21, %v6033_v19  ;;  %v258_v33 = vand.u32 2139095040, %v6046_v24  ;;  %v6078_v44 = vmul.f32 0.3926991, %v6015_v7  ;;  %v6081_v45 = vmul.f32 0.7853982, %v6010_v5  ;;  %p5937_p8 = scmp.ne.s32.totalorder %s9505_s26, %s5936_s27  ;;  %p5942_p10 = scmp.lt.s32.totalorder %s5936_s27, %s5936_s27 }
  0x1d   :  { %9778 = vst [vmem:[#allocation9_spill] sm:$0xff] %v6053_v27  ;;  %v362_v34 = vand.u32 2139095040, %v6053_v27  ;;  %v6069_v35 = vsel %vm181_vm1, %v175_v26, %v9537_v25  ;;  %v262_v37 = vand.u32 8388607, %v9536_v32  ;;  %v6084_v48 = vmul.f32 0.7853982, %v6015_v7 }
  0x1e   :  { %9779 = vst [vmem:[#allocation10_spill] sm:$0xff] %v6069_v35  ;;  %v259_v36 = vshrl.u32 %v258_v33, 23  ;;  %v466_v41 = vand.u32 2139095040, %v6069_v35  ;;  %v6087_v49 = vmul.f32 1.5707964, %v6010_v5  ;;  %p5943_p11 = por %p5942_p10, %p5941_p9 }
  0x1f   :  { %v363_v38 = vshrl.u32 %v362_v34, 23  ;;  %v263_v46 = vor.u32 8388608, %v262_v37  ;;  %v6092_v53 = vmul.f32 1.5707964, %v6015_v7  ;;  %v6095_v54 = vmul.f32 3.1415927, %v6006_v3 }
  0x20   :  { %v5513_v39 = vadd.s32 4294967169, %v259_v36  ;;  %v467_v52 = vshrl.u32 %v466_v41, 23  ;;  %v6098_v57 = vmul.f32 3.1415927, %v6008_v4  ;;  %v9535_v60 = vand.u32 2147483647, %v6053_v27  ;;  %p5944_p12 = pnand %p5943_p11, %p5937_p8 }
  0x21   :  { %v5517_v40 = vadd.s32 4294967169, %v363_v38  ;;  %v6102_v59 = vshll.u32 %v263_v46, 8  ;;  %v9541_v62 = vmov 683565275   ;;  %v9539_v0 = vmov 2475754826  }
  0x22   :  { %v265_v43 = vadd.s32 1, %v5513_v39  ;;  %v9566_v2 = vmov 2131351028   ;;  %v9546_v8 = vmov 2102212464   ;;  %v5521_v14 = vadd.s32 4294967169, %v467_v52 }
  0x23   :  { %v369_v47 = vadd.s32 1, %v5517_v40  ;;  %v9548_v11 = vmov 920167782   ;;  %v9550_v29 = vmov 1326507024  }
  0x24   :  { %vm266_vm2 = vcmp.gt.s32.totalorder %v265_v43, 0  ;;  %v6224_v22 = vmul.f32 12.566371, %v6006_v3 }
  0x25   :  { %v267_v51 = vsel %vm266_vm2, %v265_v43, 0  ;;  %vm370_vm3 = vcmp.gt.s32.totalorder %v369_v47, 0 }
  0x26   :  { %v269_v55 = vand.u32 31, %v267_v51  ;;  %v371_v56 = vsel %vm370_vm3, %v369_v47, 0  ;;  %v6100_v58 = vshrl.u32 %v267_v51, 5 }
  0x27   :  { %v373_v13 = vand.u32 31, %v371_v56  ;;  %v6113_v21 = vshrl.u32 %v371_v56, 5 }
  0x28   :  { %v270_v61 = vsub.s32 32, %v269_v55  ;;  %v272_v63 = vshll.u32 %v9541_v62, %v269_v55  ;;  %v275_v1 = vshll.u32 %v9539_v0, %v269_v55  ;;  %v278_v6 = vshll.u32 %v9566_v2, %v269_v55 }
  0x29   :  { %v281_v10 = vshll.u32 %v9546_v8, %v269_v55  ;;  %v284_v12 = vshll.u32 %v9548_v11, %v269_v55  ;;  %vm287_vm4 = vcmp.lt.s32.totalorder %v6100_v58, 1  ;;  %vm290_vm5 = vcmp.lt.s32.totalorder %v6100_v58, 4 }
  0x2a   :  { %v273_v15 = vshrl.u32 %v9539_v0, %v270_v61  ;;  %v276_v18 = vshrl.u32 %v9566_v2, %v270_v61  ;;  %v279_v20 = vshrl.u32 %v9546_v8, %v270_v61  ;;  %v271_v26 = vshrl.u32 %v9541_v62, %v270_v61 }
  0x2b   :  { %v282_v28 = vshrl.u32 %v9548_v11, %v270_v61  ;;  %v285_v30 = vshrl.u32 %v9550_v29, %v270_v61  ;;  %vm289_vm6 = vcmp.lt.s32.totalorder %v6100_v58, 3  ;;  %v6121_v38 = vsub.s32 32, %v373_v13 }
  0x2c   :  { %v274_v31 = vor.u32 %v273_v15, %v272_v63  ;;  %v277_v33 = vor.u32 %v276_v18, %v275_v1  ;;  %v280_v34 = vor.u32 %v279_v20, %v278_v6  ;;  %vm288_vm7 = vcmp.lt.s32.totalorder %v6100_v58, 2 }
  0x2d   :  { %v283_v36 = vor.u32 %v282_v28, %v281_v10  ;;  %v286_v37 = vor.u32 %v285_v30, %v284_v12  ;;  %v376_v47 = vshll.u32 %v9541_v62, %v373_v13  ;;  %v379_v51 = vshll.u32 %v9539_v0, %v373_v13 }
  0x2e   :  { %v292_v39 = vsel %vm290_vm5, %v280_v34, 2102212464  ;;  %v295_v40 = vsel %vm287_vm4, %v274_v31, %v277_v33  ;;  %v299_v41 = vsel %vm287_vm4, %v277_v33, %v280_v34  ;;  %v291_v52 = vsel %vm287_vm4, %v271_v26, %v274_v31 }
  0x2f   :  { %v296_v43 = vsel %vm290_vm5, %v283_v36, 920167782  ;;  %v300_v46 = vsel %vm290_vm5, %v286_v37, 1326507024  ;;  %v293_v55 = vsel %vm289_vm6, %v277_v33, %v292_v39  ;;  %v377_v6 = vshrl.u32 %v9539_v0, %v6121_v38 }
  0x30   :  { %v297_v56 = vsel %vm289_vm6, %v280_v34, %v296_v43  ;;  %v301_v61 = vsel %vm289_vm6, %v283_v36, %v300_v46  ;;  %v380_v10 = vshrl.u32 %v9566_v2, %v6121_v38  ;;  %v366_v28 = vand.u32 8388607, %v9535_v60 }
  0x31   :  { %v298_v63 = vsel %vm288_vm7, %v295_v40, %v297_v56  ;;  %v302_v1 = vsel %vm288_vm7, %v299_v41, %v301_v61  ;;  %v382_v30 = vshll.u32 %v9566_v2, %v373_v13  ;;  %v383_v31 = vshrl.u32 %v9546_v8, %v6121_v38 }
  0x32   :  { %v6141_v12 = vmul.u32.u64.low %v6102_v59, %v302_v1  ;;  %v6142_v15 = vmul.u32.u64.high %v6102_v59, %v302_v1, %v6141_v12  ;;  %v6145_v18 = vmul.u32.u64.low %v6102_v59, %v298_v63  ;;  %v6146_v20 = vmul.u32.u64.high %v6102_v59, %v298_v63, %v6145_v18 }
  0x33   :  { %v385_v33 = vshll.u32 %v9546_v8, %v373_v13  ;;  %v386_v34 = vshrl.u32 %v9548_v11, %v6121_v38  ;;  %v388_v36 = vshll.u32 %v9548_v11, %v373_v13  ;;  %v389_v37 = vshrl.u32 %v9550_v29, %v6121_v38 }
  0x34   :  { %v69_v39 = vcombine.high %v6029_v16, %v6029_v16  ;;  %v294_v40 = vsel %vm288_vm7, %v291_v52, %v293_v55  ;;  %v378_v41 = vor.u32 %v377_v6, %v376_v47  ;;  %v473_v43 = vadd.s32 1, %v5521_v14 }
  0x35   :  { %v381_v46 = vor.u32 %v380_v10, %v379_v51  ;;  %v384_v56 = vor.u32 %v383_v31, %v382_v30  ;;  %v387_v61 = vor.u32 %v386_v34, %v385_v33  ;;  %vm391_vm8 = vcmp.lt.s32.totalorder %v6113_v21, 1 }
  0x36   :  { %v313_v63 = vadd.s32 1, %v6146_v20  ;;  %v390_v1 = vor.u32 %v389_v37, %v388_v36  ;;  %vm393_vm9 = vcmp.lt.s32.totalorder %v6113_v21, 3  ;;  %vm394_vm10 = vcmp.lt.s32.totalorder %v6113_v21, 4 }
  0x37   :  { %v93_v16 = vcombine.high %v6041_v23, %v6041_v23  ;;  %vm312_vm11 = vc.u32 %v6142_v15, %v6145_v18  ;;  %v367_v58 = vor.u32 8388608, %v366_v28  ;;  %v400_v13 = vsel %vm394_vm10, %v387_v61, 920167782 }
  0x38   :  { %v6177_v14 = vmul.f32 3.1415927, %v6010_v5  ;;  %v75_v47 = vrot.slane %v69_v39, 5  ;;  %v310_v51 = vmul.u32 %v6102_v59, %v294_v40  ;;  %v404_v52 = vsel %vm394_vm10, %v390_v1, 1326507024 }
  0x39   :  { %vm392_vm12 = vcmp.lt.s32.totalorder %v6113_v21, 2  ;;  %v399_v55 = vsel %vm391_vm8, %v378_v41, %v381_v46  ;;  %v401_v6 = vsel %vm393_vm9, %v384_v56, %v400_v13  ;;  %vm474_vm13 = vcmp.gt.s32.totalorder %v473_v43, 0 }
  0x3a   :  { %v6188_v10 = vmul.f32 3.1415927, %v6015_v7  ;;  %v314_v12 = vsel %vm312_vm11, %v313_v63, %v6146_v20  ;;  %v403_v59 = vsel %vm391_vm8, %v381_v46, %v384_v56  ;;  %v405_v28 = vsel %vm393_vm9, %v387_v61, %v404_v52 }
  0x3b   :  { %v6196_v30 = vmul.f32 6.2831855, %v6006_v3  ;;  %v6198_v31 = vrot.slane %v93_v16, 2  ;;  %v6200_v33 = vshll.u32 %v367_v58, 8  ;;  %v475_v34 = vsel %vm474_vm13, %v473_v43, 0 }
  0x3c   :  { %v176_v20 = vsel %vm9643_vm0, %v57_v50, %v75_v47  ;;  %v402_v37 = vsel %vm392_vm12, %v399_v55, %v401_v6  ;;  %v477_v39 = vand.u32 31, %v475_v34  ;;  %v6211_v40 = vmul.f32 6.2831855, %v6008_v4 }
  0x3d   :  { %v6214_v61 = vmul.f32 6.2831855, %v6010_v5  ;;  %v6216_v63 = vadd.s32 %v314_v12, %v310_v51  ;;  %v406_v43 = vsel %vm392_vm12, %v403_v59, %v405_v28  ;;  %v6221_v1 = vmul.f32 6.2831855, %v6015_v7 }
  0x3e   :  { %v6227_v50 = vmul.f32 12.566371, %v6008_v4  ;;  %v375_v16 = vshrl.u32 %v9541_v62, %v6121_v38  ;;  %v6233_v58 = vsel %vm181_vm1, %v176_v20, %v6198_v31  ;;  %v478_v51 = vsub.s32 32, %v477_v39 }
  0x3f   :  { %9780 = vst [vmem:[#allocation11_spill] sm:$0xff] %v6214_v61  ;;  %9781 = vst [vmem:[#allocation12_spill] sm:$0xff] %v6221_v1  ;;  %v6236_v13 = vmul.u32.u64.low %v6200_v33, %v402_v37  ;;  %v6237_v47 = vmul.u32.u64.high %v6200_v33, %v402_v37, %v6236_v13  ;;  %v6241_v52 = vmul.f32 12.566371, %v6010_v5  ;;  %v6244_v3 = vmul.f32 12.566371, %v6015_v7 }
  0x40   :  { %9782 = vst [vmem:[#allocation13_spill] sm:$0xff] %v6233_v58  ;;  %v6247_v4 = vmul.u32.u64.low %v6200_v33, %v406_v43  ;;  %v6248_v55 = vmul.u32.u64.high %v6200_v33, %v406_v43, %v6247_v4  ;;  %v70_v38 = vcombine.high %v6081_v45, %v6081_v45  ;;  %v316_v6 = vadd.s32 536870912, %v6216_v63 }
  0x41   :  { %9783 = vst [vmem:[#allocation14_spill] sm:$0xff] %v6236_v13  ;;  %v396_v12 = vsel %vm394_vm10, %v384_v56, 2102212464  ;;  %v9545_v59 = vand.u32 2147483647, %v6069_v35  ;;  %v71_v5 = vcombine.high %v6084_v48, %v6084_v48  ;;  %v395_v28 = vsel %vm391_vm8, %v375_v16, %v378_v41 }
  0x42   :  { %9784 = vst [vmem:[#allocation15_spill] sm:$0xff] %v6248_v55  ;;  %v570_v20 = vand.u32 2139095040, %v6233_v58  ;;  %v480_v37 = vshll.u32 %v9541_v62, %v477_v39  ;;  %v481_v43 = vshrl.u32 %v9539_v0, %v478_v51  ;;  %v483_v4 = vshll.u32 %v9539_v0, %v477_v39 }
  0x43   :  { %v484_v56 = vshrl.u32 %v9566_v2, %v478_v51  ;;  %v397_v60 = vsel %vm393_vm9, %v381_v46, %v396_v12  ;;  %v476_v32 = vshrl.u32 %v475_v34, 5  ;;  %v489_v25 = vshll.u32 %v9546_v8, %v477_v39 }
  0x44   :  { %v490_v17 = vshrl.u32 %v9548_v11, %v478_v51  ;;  %v6270_v36 = vshrl.u32 %v316_v6, 30  ;;  %v470_v41 = vand.u32 8388607, %v9545_v59  ;;  %v486_v16 = vshll.u32 %v9566_v2, %v477_v39 }
  0x45   :  { %v487_v26 = vshrl.u32 %v9546_v8, %v478_v51  ;;  %v6276_v7 = vrot.slane %v70_v38, 5  ;;  %v492_v0 = vshll.u32 %v9548_v11, %v477_v39  ;;  %v493_v46 = vshrl.u32 %v9550_v29, %v478_v51 }
  0x46   :  { %9785 = vst [vmem:[#allocation16_spill] sm:$0xff] %v6270_v36  ;;  %v571_v34 = vshrl.u32 %v570_v20, 23  ;;  %v398_v12 = vsel %vm392_vm12, %v395_v28, %v397_v60  ;;  %v417_v6 = vadd.s32 1, %v6237_v47  ;;  %v482_v62 = vor.u32 %v481_v43, %v480_v37 }
  0x47   :  { %v485_v27 = vor.u32 %v484_v56, %v483_v4  ;;  %vm416_vm14 = vc.u32 %v6248_v55, %v6236_v13  ;;  %v491_v8 = vor.u32 %v490_v17, %v489_v25  ;;  %vm495_vm15 = vcmp.lt.s32.totalorder %v476_v32, 1 }
  0x48   :  { %v318_v38 = vshll.u32 %v6270_v36, 30  ;;  %v471_v39 = vor.u32 8388608, %v470_v41  ;;  %v488_v11 = vor.u32 %v487_v26, %v486_v16  ;;  %vm498_vm2 = vcmp.lt.s32.totalorder %v476_v32, 4 }
  0x49   :  { %v414_v20 = vmul.u32 %v6200_v33, %v398_v12  ;;  %v494_v21 = vor.u32 %v493_v46, %v492_v0  ;;  %vm497_vm3 = vcmp.lt.s32.totalorder %v476_v32, 3  ;;  %v5525_v60 = vadd.s32 4294967169, %v571_v34 }
  0x4a   :  { %v418_v28 = vsel %vm416_vm14, %v417_v6, %v6237_v47  ;;  %v9786_v37 = vmov 683565275   ;;  %vm496_vm4 = vcmp.lt.s32.totalorder %v476_v32, 2  ;;  %v503_v4 = vsel %vm495_vm15, %v482_v62, %v485_v27 }
  0x4b   :  { %v479_v43 = vshrl.u32 %v9786_v37, %v478_v51  ;;  %v6291_v56 = vrot.slane %v71_v5, 5  ;;  %v94_v17 = vcombine.high %v6087_v49, %v6087_v49  ;;  %v500_v25 = vsel %vm498_vm2, %v488_v11, 2102212464 }
  0x4c   :  { %v504_v26 = vsel %vm498_vm2, %v491_v8, 920167782  ;;  %v95_v0 = vcombine.high %v6092_v53, %v6092_v53  ;;  %v6300_v33 = vsub.s32 %v6216_v63, %v318_v38  ;;  %v511_v51 = vshll.u32 %v471_v39, 8 }
  0x4d   :  { %v505_v47 = vsel %vm497_vm3, %v488_v11, %v504_v26  ;;  %v6303_v41 = vadd.s32 %v418_v28, %v414_v20  ;;  %v507_v16 = vsel %vm495_vm15, %v485_v27, %v488_v11  ;;  %v508_v46 = vsel %vm498_vm2, %v494_v21, 1326507024 }
  0x4e   :  { %v506_v5 = vsel %vm496_vm4, %v503_v4, %v505_v47  ;;  %v499_v12 = vsel %vm495_vm15, %v479_v43, %v482_v62  ;;  %v501_v6 = vsel %vm497_vm3, %v485_v27, %v500_v25  ;;  %v577_v59 = vadd.s32 1, %v5525_v60 }
  0x4f   :  { %v6311_v63 = vrot.slane %v94_v17, 2  ;;  %v116_v39 = vcombine.high %v6095_v54, %v6095_v54  ;;  %v509_v20 = vsel %vm497_vm3, %v491_v8, %v508_v46  ;;  %v321_v11 = vsub.s32 0, %v6300_v33 }
  0x50   :  { %v510_v21 = vsel %vm496_vm4, %v507_v16, %v509_v20  ;;  %v6319_v28 = vmul.u32.u64.low %v511_v51, %v506_v5  ;;  %v6320_v4 = vmul.u32.u64.high %v511_v51, %v506_v5, %v6319_v28  ;;  %v420_v27 = vadd.s32 536870912, %v6303_v41 }
  0x51   :  { %v502_v62 = vsel %vm496_vm4, %v499_v12, %v501_v6  ;;  %v6325_v60 = vmul.u32.u64.low %v511_v51, %v510_v21  ;;  %v6326_v43 = vmul.u32.u64.high %v511_v51, %v510_v21, %v6325_v60  ;;  %v6328_v17 = vrot.slane %v95_v0, 2 }
  0x52   :  { %9787 = vst [vmem:[#allocation17_spill] sm:$0xff] %v6319_v28  ;;  %v117_v8 = vcombine.high %v6098_v57, %v6098_v57  ;;  %v118_v25 = vcombine.high %v6177_v14, %v6177_v14  ;;  %vm578_vm5 = vcmp.gt.s32.totalorder %v577_v59, 0  ;;  %v119_v26 = vcombine.high %v6188_v10, %v6188_v10 }
  0x53   :  { %9788 = vst [vmem:[#allocation18_spill] sm:$0xff] %v6326_v43  ;;  %v6337_v5 = vrot.slane %v116_v39, 7  ;;  %v579_v32 = vsel %vm578_vm5, %v577_v59, 0  ;;  %v518_v46 = vmul.u32 %v511_v51, %v502_v62  ;;  %v521_v12 = vadd.s32 1, %v6320_v4 }
  0x54   :  { %v5514_v20 = vmin.u32 %v321_v11, %v6300_v33  ;;  %v6344_v21 = vshrl.u32 %v420_v27, 30  ;;  %vm520_vm6 = vc.u32 %v6326_v43, %v6319_v28  ;;  %v6348_v60 = vrot.slane %v117_v8, 7 }
  0x55   :  { %v522_v59 = vsel %vm520_vm6, %v521_v12, %v6320_v4  ;;  %v9558_v39 = vand.u32 2147483647, %v6233_v58  ;;  %v581_v16 = vand.u32 31, %v579_v32  ;;  %v6352_v0 = vrot.slane %v118_v25, 7 }
  0x56   :  { %9789 = vst [vmem:[#allocation19_spill] sm:$0xff] %v6344_v21  ;;  %v6354_v51 = vrot.slane %v119_v26, 7  ;;  %v6364_v4 = vadd.s32 %v522_v59, %v518_v46  ;;  %v152_v25 = vcombine.high %v6224_v22, %v6224_v22  ;;  %v153_v26 = vcombine.high %v6227_v50, %v6227_v50 }
  0x57   :  { %v582_v12 = vsub.s32 32, %v581_v16  ;;  %v323_v6 = vclz %v5514_v20  ;;  %v422_v62 = vshll.u32 %v6344_v21, 30  ;;  %v154_v11 = vcombine.high %v6241_v52, %v6241_v52 }
  0x58   :  { %v155_v27 = vcombine.high %v6244_v3, %v6244_v3  ;;  %v574_v46 = vand.u32 8388607, %v9558_v39  ;;  %v6377_v59 = vshrl.u32 %v579_v32, 5  ;;  %v584_v8 = vshll.u32 %v9786_v37, %v581_v16 }
  0x59   :  { %v9790_v47 = vmov 2475754826   ;;  %v588_v20 = vshrl.u32 %v9566_v2, %v582_v12  ;;  %v524_v29 = vadd.s32 536870912, %v6364_v4  ;;  %v590_v35 = vshll.u32 %v9566_v2, %v581_v16 }
  0x5a   :  { %v585_v38 = vshrl.u32 %v9790_v47, %v582_v12  ;;  %v587_v34 = vshll.u32 %v9790_v47, %v581_v16  ;;  %v9791_v21 = vmov 2102212464   ;;  %v6388_v39 = vrot.slane %v6224_v22, 1 }
  0x5b   :  { %v591_v28 = vshrl.u32 %v9791_v21, %v582_v12  ;;  %v593_v43 = vshll.u32 %v9791_v21, %v581_v16  ;;  %v6390_v32 = vrot.slane %v152_v25, 1  ;;  %v5515_v58 = vadd.s32 4294967294, %v323_v6 }
  0x5c   :  { %9792 = vst [vmem:[#allocation20_spill] sm:$0xff] %v6388_v39  ;;  %v6393_v36 = vsub.s32 %v6303_v41, %v422_v62  ;;  %v9794_v13 = vrot.slane %v6081_v45, 5  ;;  %v575_v47 = vor.u32 8388608, %v574_v46  ;;  %v9795_v2 = vmov 920167782  }
  0x5d   :  { %9793 = vst [vmem:[#allocation21_spill] sm:$0xff] %v6390_v32  ;;  %v594_v24 = vshrl.u32 %v9795_v2, %v582_v12  ;;  %v596_v1 = vshll.u32 %v9795_v2, %v581_v16  ;;  %v586_v21 = vor.u32 %v585_v38, %v584_v8  ;;  %v589_v61 = vor.u32 %v588_v20, %v587_v34 }
  0x5e   :  { %v177_v55 = vsel %vm9643_vm0, %v6075_v42, %v9794_v13  ;;  %v9796_v22 = vmov 1326507024   ;;  %vm599_vm7 = vcmp.lt.s32.totalorder %v6377_v59, 1  ;;  %v6403_v6 = vshrl.u32 %v524_v29, 30 }
  0x5f   :  { %v597_v39 = vshrl.u32 %v9796_v22, %v582_v12  ;;  %v592_v41 = vor.u32 %v591_v28, %v590_v35  ;;  %v595_v62 = vor.u32 %v594_v24, %v593_v43  ;;  %vm602_vm8 = vcmp.lt.s32.totalorder %v6377_v59, 4 }
  0x60   :  { %v6407_v45 = vrot.slane %v6227_v50, 1  ;;  %vm5516_vm9 = vcmp.lt.s32.totalorder %v5515_v58, 0  ;;  %v425_v13 = vsub.s32 0, %v6393_v36  ;;  %vm601_vm10 = vcmp.lt.s32.totalorder %v6377_v59, 3 }
  0x61   :  { %v6412_v34 = vrot.slane %v6241_v52, 1  ;;  %v6415_v38 = vrot.slane %v6244_v3, 1  ;;  %vm190_vm11 = vcmask 1040384   ;;  %v598_v29 = vor.u32 %v597_v39, %v596_v1 }
  0x62   :  { %9797 = vst [vmem:[#allocation22_spill] sm:$0xff] %v6407_v45  ;;  %v608_v24 = vsel %vm602_vm8, %v595_v62, 920167782  ;;  %v6419_v35 = vrot.slane %v153_v26, 1  ;;  %v9801_v50 = vrot.slane %v6087_v49, 2  ;;  %vm600_vm12 = vcmp.lt.s32.totalorder %v6377_v59, 2 }
  0x63   :  { %9798 = vst [vmem:[#allocation23_spill] sm:$0xff] %v6412_v34  ;;  %9799 = vst [vmem:[#allocation24_spill] sm:$0xff] %v6415_v38  ;;  %v607_v52 = vsel %vm599_vm7, %v586_v21, %v589_v61  ;;  %v6429_v43 = vsel %vm5516_vm9, 0, %v5515_v58  ;;  %v526_v3 = vshll.u32 %v6403_v6, 30  ;;  %v609_v1 = vsel %vm601_vm10, %v592_v41, %v608_v24  ;;  %v9845_v38 = vld [vmem:[#allocation9_spill] sm:$0xff] }
  0x64   :  { %9800 = vst [vmem:[#allocation25_spill] sm:$0xff] %v6419_v35  ;;  %v6424_v28 = vsel %vm181_vm1, %v177_v55, %v9801_v50  ;;  %v6434_v16 = vshll.u32 %v575_v47, 8  ;;  %v6436_v39 = vrot.slane %v154_v11, 1  ;;  %v6438_v8 = vrot.slane %v155_v27, 1 }
  0x65   :  { %9802 = vst [vmem:[#allocation26_spill] sm:$0xff] %v6424_v28  ;;  %v5518_v55 = vmin.u32 %v425_v13, %v6393_v36  ;;  %v611_v25 = vsel %vm599_vm7, %v589_v61, %v592_v41  ;;  %v583_v26 = vshrl.u32 %v9786_v37, %v582_v12  ;;  %v610_v58 = vsel %vm600_vm12, %v607_v52, %v609_v1 }
  0x66   :  { %9803 = vst [vmem:[#allocation27_spill] sm:$0xff] %v6436_v39  ;;  %9804 = vst [vmem:[#allocation28_spill] sm:$0xff] %v6438_v8  ;;  %v612_v46 = vsel %vm602_vm8, %v598_v29, 1326507024  ;;  %v674_v47 = vand.u32 2139095040, %v6424_v28  ;;  %v9805_v11 = vcombine.high %v6075_v42, %v6075_v42  ;;  %vm199_vm13 = vcmask 1043456  }
  0x67   :  { %v331_v20 = vsub.s32 4294967266, %v6429_v43  ;;  %v604_v12 = vsel %vm602_vm8, %v592_v41, 2102212464  ;;  %v613_v13 = vsel %vm601_vm10, %v595_v62, %v612_v46  ;;  %v6460_v24 = vsub.s32 %v6364_v4, %v526_v3 }
  0x68   :  { %v178_v27 = vsel %vm9643_vm0, %v9805_v11, %v6276_v7  ;;  %v614_v29 = vsel %vm600_vm12, %v611_v25, %v613_v13  ;;  %v6465_v50 = vmul.u32.u64.low %v6434_v16, %v610_v58  ;;  %v6466_v42 = vmul.u32.u64.high %v6434_v16, %v610_v58, %v6465_v50 }
  0x69   :  { %v9806_v7 = vrot.slane %v6084_v48, 5  ;;  %v9807_v41 = vcombine.high %v6078_v44, %v6078_v44  ;;  %v6479_v62 = vmul.u32.u64.low %v6434_v16, %v614_v29  ;;  %v6480_v3 = vmul.u32.u64.high %v6434_v16, %v614_v29, %v6479_v62 }
  0x6a   :  { %v427_v1 = vclz %v5518_v55  ;;  %v603_v25 = vsel %vm599_vm7, %v583_v26, %v586_v21  ;;  %v605_v48 = vsel %vm601_vm10, %v589_v61, %v604_v12  ;;  %v675_v58 = vshrl.u32 %v674_v47, 23 }
  0x6b   :  { %v179_v52 = vsel %vm9643_vm0, %v6078_v44, %v9806_v7  ;;  %v180_v4 = vsel %vm9643_vm0, %v9807_v41, %v6291_v56  ;;  %v6488_v46 = vsel %vm181_vm1, %v178_v27, %v6311_v63  ;;  %vm208_vm14 = vcmask 1046528  }
  0x6c   :  { %9808 = vst [vmem:[#allocation29_spill] sm:$0xff] %v6488_v46  ;;  %v311_v44 = vadd.s32 %v6145_v18, %v6142_v15  ;;  %v327_v56 = vsub.s32 32, %v6429_v43  ;;  %v332_v11 = vadd.s32 127, %v331_v20  ;;  %v9809_v55 = vrot.slane %v6092_v53, 2 }
  0x6d   :  { %v6500_v61 = vsel %vm181_vm1, %v180_v4, %v6328_v17  ;;  %v529_v21 = vsub.s32 0, %v6460_v24  ;;  %v5529_v26 = vadd.s32 4294967169, %v675_v58  ;;  %v9812_v47 = vrot.slane %v6095_v54, 7 }
  0x6e   :  { %v6496_v13 = vsel %vm181_vm1, %v179_v52, %v9809_v55  ;;  %9811 = vst [vmem:[#allocation31_spill] sm:$0xff] %v6500_v61  ;;  %v9813_v27 = vrot.slane %v6023_v9, 2  ;;  %v192_v18 = vsel %vm190_vm11, %v6033_v19, %v6337_v5  ;;  %v606_v20 = vsel %vm600_vm12, %v603_v25, %v605_v48  ;;  %v9822_v48 = vld [vmem:[#allocation11_spill] sm:$0xff] }
  0x6f   :  { %9810 = vst [vmem:[#allocation30_spill] sm:$0xff] %v6496_v13  ;;  %v625_v12 = vadd.s32 1, %v6466_v42  ;;  %v9814_v29 = vrot.slane %v6098_v57, 7  ;;  %v9815_v7 = vrot.slane %v6041_v23, 2  ;;  %v5519_v54 = vadd.s32 4294967294, %v427_v1 }
  0x70   :  { %v191_v15 = vsel %vm190_vm11, %v9813_v27, %v9812_v47  ;;  %vm624_vm1 = vc.u32 %v6480_v3, %v6465_v50  ;;  %v681_v9 = vadd.s32 1, %v5529_v26  ;;  %v194_v19 = vsel %vm190_vm11, %v6198_v31, %v6348_v60 }
  0x71   :  { %v193_v52 = vsel %vm190_vm11, %v9815_v7, %v9814_v29  ;;  %v328_v5 = vshll.u32 %v6300_v33, %v6429_v43  ;;  %v329_v59 = vshrl.u32 %v311_v44, %v327_v56  ;;  %v333_v41 = vshll.u32 %v332_v11, 23 }
  0x72   :  { %v9816_v57 = vrot.slane %v6177_v14, 7  ;;  %v9817_v23 = vrot.slane %v6087_v49, 2  ;;  %v5522_v62 = vmin.u32 %v529_v21, %v6460_v24  ;;  %v622_v1 = vmul.u32 %v6434_v16, %v606_v20  ;;  %v9824_v21 = vld [vmem:[#allocation12_spill] sm:$0xff] }
  0x73   :  { %vm682_vm15 = vcmp.gt.s32.totalorder %v681_v9, 0  ;;  %v196_v31 = vsel %vm190_vm11, %v6311_v63, %v6352_v0  ;;  %v9818_v60 = vrot.slane %v6188_v10, 7  ;;  %v9819_v33 = vmov %v9809_v55 }
  0x74   :  { %v195_v4 = vsel %vm190_vm11, %v9817_v23, %v9816_v57  ;;  %v198_v49 = vsel %vm190_vm11, %v6328_v17, %v6354_v51  ;;  %v626_v14 = vsel %vm624_vm1, %v625_v12, %v6466_v42  ;;  %v9820_v16 = vcombine.low %v6196_v30, %v6196_v30  ;;  %v9833_v23 = vld [vmem:[#allocation8_spill] sm:$0xff] }
  0x75   :  { %v197_v43 = vsel %vm190_vm11, %v9819_v33, %v9818_v60  ;;  %v201_v63 = vsel %vm199_vm13, %v192_v18, %v6196_v30  ;;  %vm5520_vm2 = vcmp.lt.s32.totalorder %v5519_v54, 0  ;;  %v683_v10 = vsel %vm682_vm15, %v681_v9, 0 }
  0x76   :  { %v200_v25 = vsel %vm199_vm13, %v191_v15, %v9820_v16  ;;  %v9821_v53 = vcombine.low %v6211_v40, %v6211_v40  ;;  %v6557_v17 = vsel %vm199_vm13, %v194_v19, %v6211_v40  ;;  %v330_v51 = vor.u32 %v329_v59, %v328_v5  ;;  %v9828_v15 = vld [vmem:[#allocation20_spill] sm:$0xff] }
  0x77   :  { %v334_v42 = vor.u32 4788187, %v333_v41  ;;  %v9823_v58 = vcombine.low %v9822_v48, %v9822_v48  ;;  %v531_v30 = vclz %v5522_v62  ;;  %v6565_v56 = vadd.s32 %v626_v14, %v622_v1 }
  0x78   :  { %v202_v0 = vsel %vm199_vm13, %v193_v52, %v9821_v53  ;;  %v685_v11 = vand.u32 31, %v683_v10  ;;  %v6569_v55 = vsel %vm199_vm13, %v196_v31, %v9822_v48  ;;  %v9825_v40 = vcombine.low %v9824_v21, %v9824_v21 }
  0x79   :  { %v6563_v44 = vsel %vm199_vm13, %v195_v4, %v9823_v58  ;;  %v6579_v47 = vsel %vm199_vm13, %v198_v49, %v9824_v21  ;;  %v6581_v27 = vsel %vm5520_vm2, 0, %v5519_v54  ;;  %v6585_v18 = vsel %vm208_vm14, %v200_v25, %v9828_v15  ;;  %v9836_v25 = vld [vmem:[#allocation15_spill] sm:$0xff] }
  0x7a   :  { %v6575_v26 = vsel %vm199_vm13, %v197_v43, %v9825_v40  ;;  %9827 = vst [vmem:[#allocation12_spill] sm:$0xff] %v6579_v47  ;;  %9829 = vst [vmem:[#allocation32_spill] sm:$0xff] %v6585_v18  ;;  %v6589_v20 = vsel %vm208_vm14, %v201_v63, %v6390_v32  ;;  %v6593_v12 = vsel %vm208_vm14, %v202_v0, %v6407_v45  ;;  %v6595_v29 = vsub.s32 32, %v685_v11  ;;  %v9837_v63 = vld [vmem:[#allocation14_spill] sm:$0xff] }
  0x7b   :  { %9826 = vst [vmem:[#allocation11_spill] sm:$0xff] %v6575_v26  ;;  %9830 = vst [vmem:[#allocation33_spill] sm:$0xff] %v6589_v20  ;;  %v335_v7 = vand.u32 2147483647, %v334_v42  ;;  %v337_v52 = vcvt.s32.f32 %v330_v51  ;;  %v9580_v9 = vand.u32 2147483647, %v6424_v28  ;;  %v688_v62 = vshll.u32 %v9786_v37, %v685_v11 }
  0x7c   :  { %9831 = vst [vmem:[#allocation34_spill] sm:$0xff] %v6593_v12  ;;  %v778_v54 = vand.u32 2139095040, %v6488_v46  ;;  %v435_v19 = vsub.s32 4294967266, %v6581_v27  ;;  %v5523_v5 = vadd.s32 4294967294, %v531_v30  ;;  %v628_v59 = vadd.s32 536870912, %v6565_v56 }
  0x7d   :  { %v9832_v41 = vmov 2102212464   ;;  %vm257_vm3 = vcmp.lt.s32.totalorder %v9833_v23, 0  ;;  %v6603_v4 = vshrl.u32 %v683_v10, 5  ;;  %v9834_v1 = vmov 2475754826  }
  0x7e   :  { %v697_v57 = vshll.u32 %v9832_v41, %v685_v11  ;;  %v689_v31 = vshrl.u32 %v9834_v1, %v6595_v29  ;;  %v691_v60 = vshll.u32 %v9834_v1, %v685_v11  ;;  %v9835_v33 = vmov 2131351028  }
  0x7f   :  { %v692_v43 = vshrl.u32 %v9835_v33, %v6595_v29  ;;  %v694_v49 = vshll.u32 %v9835_v33, %v685_v11  ;;  %v695_v14 = vshrl.u32 %v9832_v41, %v6595_v29  ;;  %v698_v16 = vshrl.u32 %v9795_v2, %v6595_v29 }
  0x80   :  { %v415_v10 = vadd.s32 %v9837_v63, %v9836_v25  ;;  %v431_v53 = vsub.s32 32, %v6581_v27  ;;  %v678_v0 = vand.u32 8388607, %v9580_v9  ;;  %v779_v51 = vshrl.u32 %v778_v54, 23 }
  0x81   :  { %v338_v42 = vmul.f32 %v337_v52, %v335_v7  ;;  %v699_v48 = vor.u32 %v698_v16, %v697_v57  ;;  %v700_v58 = vshll.u32 %v9795_v2, %v685_v11  ;;  %v701_v30 = vshrl.u32 %v9796_v22, %v6595_v29  ;;  %v9850_v7 = vld [vmem:[#allocation10_spill] sm:$0xff] }
  0x82   :  { %v436_v21 = vadd.s32 127, %v435_v19  ;;  %vm5524_vm4 = vcmp.lt.s32.totalorder %v5523_v5, 0  ;;  %v6624_v40 = vshrl.u32 %v628_v59, 30  ;;  %v690_v45 = vor.u32 %v689_v31, %v688_v62 }
  0x83   :  { %v693_v32 = vor.u32 %v692_v43, %v691_v60  ;;  %v696_v25 = vor.u32 %v695_v14, %v694_v49  ;;  %v702_v63 = vor.u32 %v701_v30, %v700_v58  ;;  %vm706_vm5 = vcmp.lt.s32.totalorder %v6603_v4, 4  ;;  %v9841_v14 = vld [vmem:[#allocation16_spill] sm:$0xff] }
  0x84   :  { %v9838_v9 = vand.u32 2147483647, %v9833_v23  ;;  %vm703_vm7 = vcmp.lt.s32.totalorder %v6603_v4, 1  ;;  %vm705_vm8 = vcmp.lt.s32.totalorder %v6603_v4, 3  ;;  %v5533_v11 = vadd.s32 4294967169, %v779_v51 }
  0x85   :  { %v339_v52 = vxor.u32 2147483648, %v338_v42  ;;  %v679_v54 = vor.u32 8388608, %v678_v0  ;;  %v712_v19 = vsel %vm706_vm5, %v699_v48, 920167782  ;;  %v716_v59 = vsel %vm706_vm5, %v702_v63, 1326507024 }
  0x86   :  { %vm6629_vm6 = vcmp.le.f32.partialorder %v9838_v9, 0.7853982  ;;  %v432_v57 = vshll.u32 %v6393_v36, %v6581_v27  ;;  %v433_v9 = vshrl.u32 %v415_v10, %v431_v53  ;;  %v6642_v62 = vsel %vm5524_vm4, 0, %v5523_v5  ;;  %v9842_v53 = vld [vmem:[#allocation18_spill] sm:$0xff]  ;;  %v9843_v0 = vld [vmem:[#allocation17_spill] sm:$0xff] }
  0x87   :  { %v630_v31 = vshll.u32 %v6624_v40, 30  ;;  %v437_v60 = vshll.u32 %v436_v21, 23  ;;  %vm704_vm9 = vcmp.lt.s32.totalorder %v6603_v4, 2  ;;  %v711_v43 = vsel %vm703_vm7, %v690_v45, %v693_v32 }
  0x88   :  { %v713_v49 = vsel %vm705_vm8, %v696_v25, %v712_v19  ;;  %v715_v36 = vsel %vm703_vm7, %v693_v32, %v696_v25  ;;  %v717_v27 = vsel %vm705_vm8, %v699_v48, %v716_v59  ;;  %v785_v5 = vadd.s32 1, %v5533_v11  ;;  %v9844_v59 = vld [vmem:[#allocation19_spill] sm:$0xff] }
  0x89   :  { %v340_v10 = vsel %vm257_vm3, %v339_v52, %v338_v42  ;;  %v519_v51 = vadd.s32 %v9843_v0, %v9842_v53  ;;  %v539_v58 = vsub.s32 4294967266, %v6642_v62  ;;  %v6660_v30 = vshll.u32 %v679_v54, 8 }
  0x8a   :  { %v6662_v21 = vor.u32 %v433_v9, %v432_v57  ;;  %v6665_v63 = vsub.s32 %v6565_v56, %v630_v31  ;;  %v714_v19 = vsel %vm704_vm9, %v711_v43, %v713_v49  ;;  %vm786_vm10 = vcmp.gt.s32.totalorder %v785_v5, 0 }
  0x8b   :  { %v438_v48 = vor.u32 4788187, %v437_v60  ;;  %v535_v11 = vsub.s32 32, %v6642_v62  ;;  %v718_v42 = vsel %vm704_vm9, %v715_v36, %v717_v27  ;;  %v787_v52 = vsel %vm786_vm10, %v785_v5, 0 }
  0x8c   :  { %v6675_v54 = vsel %vm6629_vm6, %v9833_v23, %v340_v10  ;;  %v687_v56 = vshrl.u32 %v9786_v37, %v6595_v29  ;;  %v9581_v9 = vand.u32 2147483647, %v6488_v46  ;;  %v540_v31 = vadd.s32 127, %v539_v58 }
  0x8d   :  { %v708_v60 = vsel %vm706_vm5, %v696_v25, 2102212464  ;;  %v6684_v43 = vmul.u32.u64.low %v6660_v30, %v714_v19  ;;  %v6685_v49 = vmul.u32.u64.high %v6660_v30, %v714_v19, %v6684_v43  ;;  %v633_v36 = vsub.s32 0, %v6665_v63 }
  0x8e   :  { %v6690_v27 = vmul.u32.u64.low %v6660_v30, %v718_v42  ;;  %v6691_v5 = vmul.u32.u64.high %v6660_v30, %v718_v42, %v6690_v27  ;;  %v789_v10 = vand.u32 31, %v787_v52  ;;  %v439_v53 = vand.u32 2147483647, %v438_v48 }
  0x8f   :  { %v441_v29 = vcvt.s32.f32 %v6662_v21  ;;  %v536_v0 = vshll.u32 %v6460_v24, %v6642_v62  ;;  %v537_v58 = vshrl.u32 %v519_v51, %v535_v11  ;;  %v707_v25 = vsel %vm703_vm7, %v687_v56, %v690_v45 }
  0x90   :  { %v709_v19 = vsel %vm705_vm8, %v693_v32, %v708_v60  ;;  %v782_v57 = vand.u32 8388607, %v9581_v9  ;;  %v790_v16 = vsub.s32 32, %v789_v10  ;;  %v788_v42 = vshrl.u32 %v787_v52, 5 }
  0x91   :  { %v792_v27 = vshll.u32 %v9786_v37, %v789_v10  ;;  %v795_v48 = vshll.u32 %v9834_v1, %v789_v10  ;;  %v801_v21 = vshll.u32 %v9832_v41, %v789_v10  ;;  %v541_v15 = vshll.u32 %v540_v31, 23 }
  0x92   :  { %v5526_v24 = vmin.u32 %v633_v36, %v6665_v63  ;;  %v793_v62 = vshrl.u32 %v9834_v1, %v790_v16  ;;  %v798_v45 = vshll.u32 %v9835_v33, %v789_v10  ;;  %v796_v32 = vshrl.u32 %v9835_v33, %v790_v16 }
  0x93   :  { %v799_v51 = vshrl.u32 %v9832_v41, %v790_v16  ;;  %v802_v11 = vshrl.u32 %v9795_v2, %v790_v16  ;;  %v804_v52 = vshll.u32 %v9795_v2, %v789_v10  ;;  %v710_v56 = vsel %vm704_vm9, %v707_v25, %v709_v19 }
  0x94   :  { %v783_v60 = vor.u32 8388608, %v782_v57  ;;  %v794_v9 = vor.u32 %v793_v62, %v792_v27  ;;  %v805_v31 = vshrl.u32 %v9796_v22, %v790_v16  ;;  %v729_v36 = vadd.s32 1, %v6685_v49 }
  0x95   :  { %v797_v12 = vor.u32 %v796_v32, %v795_v48  ;;  %v803_v46 = vor.u32 %v802_v11, %v801_v21  ;;  %vm807_vm11 = vcmp.lt.s32.totalorder %v788_v42, 1  ;;  %v538_v47 = vor.u32 %v537_v58, %v536_v0 }
  0x96   :  { %v542_v8 = vor.u32 4788187, %v541_v15  ;;  %vm728_vm12 = vc.u32 %v6691_v5, %v6684_v43  ;;  %v800_v26 = vor.u32 %v799_v51, %v798_v45  ;;  %vm361_vm13 = vcmp.lt.s32.totalorder %v9845_v38, 0 }
  0x97   :  { %v635_v10 = vclz %v5526_v24  ;;  %v806_v4 = vor.u32 %v805_v31, %v804_v52  ;;  %vm809_vm1 = vcmp.lt.s32.totalorder %v788_v42, 3  ;;  %vm810_vm15 = vcmp.lt.s32.totalorder %v788_v42, 4 }
  0x98   :  { %v726_v57 = vmul.u32 %v6660_v30, %v710_v56  ;;  %v791_v25 = vshrl.u32 %v9786_v37, %v790_v16  ;;  %vm808_vm2 = vcmp.lt.s32.totalorder %v788_v42, 2  ;;  %v815_v19 = vsel %vm807_vm11, %v794_v9, %v797_v12 }
  0x99   :  { %v730_v0 = vsel %vm728_vm12, %v729_v36, %v6685_v49  ;;  %v812_v15 = vsel %vm810_vm15, %v800_v26, 2102212464  ;;  %v816_v58 = vsel %vm810_vm15, %v803_v46, 920167782  ;;  %v823_v27 = vshll.u32 %v783_v60, 8 }
  0x9a   :  { %v442_v48 = vmul.f32 %v441_v29, %v439_v53  ;;  %v543_v21 = vand.u32 2147483647, %v542_v8  ;;  %v545_v24 = vcvt.s32.f32 %v538_v47  ;;  %v817_v62 = vsel %vm809_vm1, %v800_v26, %v816_v58 }
  0x9b   :  { %v5527_v45 = vadd.s32 4294967294, %v635_v10  ;;  %v818_v30 = vsel %vm808_vm2, %v815_v19, %v817_v62  ;;  %v819_v16 = vsel %vm807_vm11, %v797_v12, %v800_v26  ;;  %v820_v32 = vsel %vm810_vm15, %v806_v4, 1326507024 }
  0x9c   :  { %v6729_v51 = vadd.s32 %v730_v0, %v726_v57  ;;  %v811_v49 = vsel %vm807_vm11, %v791_v25, %v794_v9  ;;  %v813_v11 = vsel %vm809_vm1, %v797_v12, %v812_v15  ;;  %v821_v52 = vsel %vm809_vm1, %v803_v46, %v820_v32 }
  0x9d   :  { %5818 = vcosq.f32 %v6675_v54  ;;  %v822_v8 = vsel %vm808_vm2, %v819_v16, %v821_v52  ;;  %v6736_v47 = vmul.u32.u64.low %v823_v27, %v818_v30  ;;  %v6737_v53 = vmul.u32.u64.high %v823_v27, %v818_v30, %v6736_v47 }
  0x9e   :  { %v9846_v26 = vsub.s32 4, %v9841_v14  ;;  %5820 = vsinq.f32 %v6675_v54  ;;  %v443_v9 = vxor.u32 2147483648, %v442_v48  ;;  %v546_v12 = vmul.f32 %v545_v24, %v543_v21 }
  0x9f   :  { %v814_v46 = vsel %vm808_vm2, %v811_v49, %v813_v11  ;;  %v6747_v56 = vmul.u32.u64.low %v823_v27, %v822_v8  ;;  %v6748_v60 = vmul.u32.u64.high %v823_v27, %v822_v8, %v6747_v56  ;;  %v882_v31 = vand.u32 2139095040, %v6496_v13 }
  0xa0   :  { %v342_v29 = vsel %vm257_vm3, %v9846_v26, %v9841_v14  ;;  %v6754_v36 = vsel %vm208_vm14, %v6557_v17, %v6419_v35  ;;  %v549_v10 = vsub.s32 4, %v6403_v6  ;;  %vm5528_vm4 = vcmp.lt.s32.totalorder %v5527_v45, 0 }
  0xa1   :  { %v732_v14 = vadd.s32 536870912, %v6729_v51  ;;  %v6760_v54 = vsel %vm6629_vm6, 0, %v342_v29  ;;  %v9848_v42 = vsub.s32 4, %v9844_v59  ;;  %v833_v57 = vadd.s32 1, %v6737_v53 }
  0xa2   :  { %9847 = vst [vmem:[#allocation15_spill] sm:$0xff] %v6760_v54  ;;  %v883_v25 = vshrl.u32 %v882_v31, 23  ;;  %v9849_v17 = vand.u32 2147483647, %v9845_v38  ;;  %v444_v19 = vsel %vm361_vm13, %v443_v9, %v442_v48  ;;  %v547_v0 = vxor.u32 2147483648, %v546_v12 }
  0xa3   :  { %v446_v4 = vsel %vm361_vm13, %v9848_v42, %v9844_v59  ;;  %v830_v15 = vmul.u32 %v823_v27, %v814_v46  ;;  %v9851_v58 = vand.u32 2147483647, %v9850_v7  ;;  %vm465_vm6 = vcmp.lt.s32.totalorder %v9850_v7, 0 }
  0xa4   :  { %vm360_vm3 = vcmp.le.f32.partialorder %v9849_v17, 0.7853982  ;;  %v638_v59 = vsel %vm5528_vm4, 0, %v5527_v45  ;;  %vm832_vm7 = vc.u32 %v6748_v60, %v6736_v47  ;;  %v348_v24 = vadd.s32 3, %v6760_v54 }
  0xa5   :  { %vm6774_vm5 = vcmp.le.f32.partialorder %v9851_v58, 0.7853982  ;;  %v6782_v62 = vsel %vm360_vm3, 0, %v446_v4  ;;  %v550_v48 = vsel %vm465_vm6, %v549_v10, %v6403_v6  ;;  %v6785_v30 = vshrl.u32 %v732_v14, 30 }
  0xa6   :  { %9854 = vst [vmem:[#allocation14_spill] sm:$0xff] %v6782_v62  ;;  %v447_v27 = vsel %vm360_vm3, %v9845_v38, %v444_v19  ;;  %v623_v16 = vadd.s32 %v6465_v50, %v6480_v3  ;;  %v834_v32 = vsel %vm832_vm7, %v833_v57, %v6737_v53  ;;  %v5537_v49 = vadd.s32 4294967169, %v883_v25 }
  0xa7   :  { %v548_v45 = vsel %vm465_vm6, %v547_v0, %v546_v12  ;;  %v639_v11 = vsub.s32 32, %v638_v59  ;;  %v643_v52 = vsub.s32 4294967266, %v638_v59  ;;  %v6791_v8 = vadd.s32 %v834_v32, %v830_v15  ;;  %v6793_v26 = vpop.eup %5818 }
  0xa8   :  { %9855 = vst [vmem:[#allocation16_spill] sm:$0xff] %v6793_v26  ;;  %v6798_v6 = vsel %vm208_vm14, %v6563_v44, %v6412_v34  ;;  %v6803_v29 = vsel %vm208_vm14, %v6569_v55, %v6436_v39  ;;  %v452_v50 = vadd.s32 3, %v6782_v62  ;;  %v889_v3 = vadd.s32 1, %v5537_v49  ;;  %v6806_v53 = vpop.eup %5820  ;;  %v9860_v62 = vld [vmem:[#allocation13_spill] sm:$0xff] }
  0xa9   :  { %9856 = vst [vmem:[#allocation18_spill] sm:$0xff] %v6803_v29  ;;  %9857 = vst [vmem:[#allocation17_spill] sm:$0xff] %v6806_v53  ;;  %v6808_v9 = vand.u32 3, %v348_v24  ;;  %5822 = vcosq.f32 %v447_v27  ;;  %v6812_v12 = vsel %vm6774_vm5, 0, %v550_v48  ;;  %v734_v44 = vshll.u32 %v6785_v30, 30 }
  0xaa   :  { %9858 = vst [vmem:[#allocation19_spill] sm:$0xff] %v6812_v12  ;;  %v551_v46 = vsel %vm6774_vm5, %v9850_v7, %v548_v45  ;;  %v836_v55 = vadd.s32 536870912, %v6791_v8  ;;  %v9587_v56 = vand.u32 2147483647, %v6496_v13  ;;  %vm890_vm8 = vcmp.gt.s32.totalorder %v889_v3, 0 }
  0xab   :  { %v640_v31 = vshll.u32 %v6665_v63, %v638_v59  ;;  %v641_v10 = vshrl.u32 %v623_v16, %v639_v11  ;;  %v644_v14 = vadd.s32 127, %v643_v52  ;;  %v891_v42 = vsel %vm890_vm8, %v889_v3, 0 }
  0xac   :  { %5824 = vsinq.f32 %v447_v27  ;;  %v6821_v4 = vand.u32 3, %v452_v50  ;;  %v6824_v57 = vadd.s32 3, %v6812_v12  ;;  %v893_v25 = vand.u32 31, %v891_v42 }
  0xad   :  { %v6829_v0 = vsub.s32 %v6729_v51, %v734_v44  ;;  %v986_v15 = vand.u32 2139095040, %v6500_v61  ;;  %5826 = vcosq.f32 %v551_v46  ;;  %v6832_v63 = vshrl.u32 %v836_v55, 30 }
  0xae   :  { %v886_v58 = vand.u32 8388607, %v9587_v56  ;;  %v894_v21 = vsub.s32 32, %v893_v25  ;;  %v6836_v59 = vor.u32 %v641_v10, %v640_v31  ;;  %v645_v24 = vshll.u32 %v644_v14, 23 }
  0xaf   :  { %v896_v48 = vshll.u32 %v9786_v37, %v893_v25  ;;  %v899_v27 = vshll.u32 %v9834_v1, %v893_v25  ;;  %vm354_vm9 = vcmp.eq.s32.totalorder %v6808_v9, 2  ;;  %v902_v32 = vshll.u32 %v9835_v33, %v893_v25 }
  0xb0   :  { %v897_v51 = vshrl.u32 %v9834_v1, %v894_v21  ;;  %v900_v16 = vshrl.u32 %v9835_v33, %v894_v21  ;;  %v905_v49 = vshll.u32 %v9832_v41, %v893_v25  ;;  %v737_v45 = vsub.s32 0, %v6829_v0 }
  0xb1   :  { %v892_v11 = vshrl.u32 %v891_v42, 5  ;;  %v903_v52 = vshrl.u32 %v9832_v41, %v894_v21  ;;  %v987_v50 = vshrl.u32 %v986_v15, 23  ;;  %vm351_vm10 = vcmp.eq.s32.totalorder %v6808_v9, 0 }
  0xb2   :  { %v838_v3 = vshll.u32 %v6832_v63, 30  ;;  %v887_v44 = vor.u32 8388608, %v886_v58  ;;  %v906_v55 = vshrl.u32 %v9795_v2, %v894_v21  ;;  %v908_v31 = vshll.u32 %v9795_v2, %v893_v25 }
  0xb3   :  { %v6851_v10 = vpop.eup %5822  ;;  %5828 = vsinq.f32 %v551_v46  ;;  %v653_v14 = vsub.s32 4, %v6624_v40  ;;  %v895_v56 = vshrl.u32 %v9786_v37, %v894_v21  ;;  %v898_v42 = vor.u32 %v897_v51, %v896_v48 }
  0xb4   :  { %9859 = vst [vmem:[#allocation35_spill] sm:$0xff] %v6851_v10  ;;  %v901_v17 = vor.u32 %v900_v16, %v899_v27  ;;  %v904_v19 = vor.u32 %v903_v52, %v902_v32  ;;  %v907_v15 = vor.u32 %v906_v55, %v905_v49  ;;  %v909_v12 = vshrl.u32 %v9796_v22, %v894_v21 }
  0xb5   :  { %vm569_vm11 = vcmp.lt.s32.totalorder %v9860_v62, 0  ;;  %v646_v58 = vor.u32 4788187, %v645_v24  ;;  %v649_v54 = vcvt.s32.f32 %v6836_v59  ;;  %vm911_vm12 = vcmp.lt.s32.totalorder %v892_v11, 1 }
  0xb6   :  { %v5541_v25 = vadd.s32 4294967169, %v987_v50  ;;  %v6858_v39 = vpop.eup %5824  ;;  %vm350_vm13 = vcmp.lt.s32.totalorder %v6808_v9, 2  ;;  %vm455_vm1 = vcmp.eq.s32.totalorder %v6821_v4, 0  ;;  %vm458_vm15 = vcmp.eq.s32.totalorder %v6821_v4, 2 }
  0xb7   :  { %9861 = vst [vmem:[#allocation36_spill] sm:$0xff] %v6858_v39  ;;  %v5530_v46 = vmin.u32 %v737_v45, %v6829_v0  ;;  %v6865_v48 = vsub.s32 %v6791_v8, %v838_v3  ;;  %v910_v21 = vor.u32 %v909_v12, %v908_v31  ;;  %v927_v27 = vshll.u32 %v887_v44, 8  ;;  %v6868_v24 = vpop.eup %5826 }
  0xb8   :  { %vm912_vm2 = vcmp.lt.s32.totalorder %v892_v11, 2  ;;  %vm913_vm4 = vcmp.lt.s32.totalorder %v892_v11, 3  ;;  %vm914_vm3 = vcmp.lt.s32.totalorder %v892_v11, 4  ;;  %v915_v59 = vsel %vm911_vm12, %v895_v56, %v898_v42  ;;  %9862 = vst [vmem:[#allocation37_spill] sm:$0xff] %v6868_v24 }
  0xb9   :  { %v916_v51 = vsel %vm914_vm3, %v904_v19, 2102212464  ;;  %v919_v16 = vsel %vm911_vm12, %v898_v42, %v901_v17  ;;  %v920_v32 = vsel %vm914_vm3, %v907_v15, 920167782  ;;  %v923_v49 = vsel %vm911_vm12, %v901_v17, %v904_v19 }
  0xba   :  { %v917_v52 = vsel %vm913_vm4, %v901_v17, %v916_v51  ;;  %v921_v45 = vsel %vm913_vm4, %v904_v19, %v920_v32  ;;  %v924_v50 = vsel %vm914_vm3, %v910_v21, 1326507024  ;;  %v993_v8 = vadd.s32 1, %v5541_v25 }
  0xbb   :  { %v647_v3 = vand.u32 2147483647, %v646_v58  ;;  %v739_v12 = vclz %v5530_v46  ;;  %v922_v44 = vsel %vm912_vm2, %v919_v16, %v921_v45  ;;  %v925_v55 = vsel %vm913_vm4, %v907_v15, %v924_v50 }
  0xbc   :  { %v9863_v56 = vxor.u32 2147483648, %v6793_v26  ;;  %v841_v42 = vsub.s32 0, %v6865_v48  ;;  %v918_v34 = vsel %vm912_vm2, %v915_v59, %v917_v52  ;;  %v926_v17 = vsel %vm912_vm2, %v923_v49, %v925_v55 }
  0xbd   :  { %v6881_v19 = vmul.u32.u64.low %v927_v27, %v926_v17  ;;  %v6882_v21 = vmul.u32.u64.high %v927_v27, %v926_v17, %v6881_v19  ;;  %v6884_v58 = vmul.u32.u64.low %v927_v27, %v922_v44  ;;  %v6885_v25 = vmul.u32.u64.high %v927_v27, %v922_v44, %v6884_v58  ;;  %v6888_v15 = vpop.eup %5828 }
  0xbe   :  { %v356_v31 = vsel %vm354_vm9, %v9863_v56, %v6806_v53  ;;  %9864 = vst [vmem:[#allocation38_spill] sm:$0xff] %v6888_v15  ;;  %v9865_v46 = vxor.u32 2147483648, %v6806_v53  ;;  %v9596_v16 = vxor.u32 2147483648, %v6858_v39  ;;  %v9595_v11 = vxor.u32 2147483648, %v6851_v10 }
  0xbf   :  { %vm994_vm5 = vcmp.gt.s32.totalorder %v993_v8, 0  ;;  %v650_v59 = vmul.f32 %v649_v54, %v647_v3  ;;  %v654_v32 = vsel %vm569_vm11, %v653_v14, %v6624_v40  ;;  %v5531_v49 = vadd.s32 4294967294, %v739_v12 }
  0xc0   :  { %v353_v51 = vsel %vm351_vm10, %v6793_v26, %v9865_v46  ;;  %v995_v52 = vsel %vm994_vm5, %v993_v8, 0  ;;  %v5534_v45 = vmin.u32 %v841_v42, %v6865_v48  ;;  %v934_v50 = vmul.u32 %v927_v27, %v918_v34 }
  0xc1   :  { %v9597_v44 = vand.u32 2147483647, %v6500_v61  ;;  %v997_v55 = vand.u32 31, %v995_v52  ;;  %v6903_v56 = vand.u32 3, %v6824_v57  ;;  %v9866_v17 = vand.u32 2147483647, %v9860_v62 }
  0xc2   :  { %vm936_vm7 = vc.u32 %v6882_v21, %v6884_v58  ;;  %v937_v40 = vadd.s32 1, %v6885_v25  ;;  %v6916_v34 = vsel %vm350_vm13, %v353_v51, %v356_v31  ;;  %v6923_v54 = vsel %vm455_vm1, %v6851_v10, %v9596_v16 }
  0xc3   :  { %vm6907_vm6 = vcmp.le.f32.partialorder %v9866_v17, 0.7853982  ;;  %v6930_v57 = vsel %vm458_vm15, %v9595_v11, %v6858_v39  ;;  %v998_v14 = vsub.s32 32, %v997_v55  ;;  %vm5532_vm8 = vcmp.lt.s32.totalorder %v5531_v49, 0 }
  0xc4   :  { %v6935_v9 = vsel %vm6907_vm6, 0, %v654_v32  ;;  %v938_v8 = vsel %vm936_vm7, %v937_v40, %v6885_v25  ;;  %v651_v3 = vxor.u32 2147483648, %v650_v59  ;;  %v843_v12 = vclz %v5534_v45 }
  0xc5   :  { %9869 = vst [vmem:[#allocation39_spill] sm:$0xff] %v6935_v9  ;;  %v6938_v31 = vadd.s32 %v938_v8, %v934_v50  ;;  %v990_v42 = vand.u32 8388607, %v9597_v44  ;;  %v1000_v46 = vshll.u32 %v9786_v37, %v997_v55  ;;  %v1001_v51 = vshrl.u32 %v9834_v1, %v998_v14 }
  0xc6   :  { %v1003_v17 = vshll.u32 %v9834_v1, %v997_v55  ;;  %v1004_v11 = vshrl.u32 %v9835_v33, %v998_v14  ;;  %v727_v25 = vadd.s32 %v6684_v43, %v6691_v5  ;;  %v6949_v40 = vsel %vm5532_vm8, 0, %v5531_v49 }
  0xc7   :  { %v6951_v45 = vshrl.u32 %v995_v52, 5  ;;  %v1006_v50 = vshll.u32 %v9835_v33, %v997_v55  ;;  %v1007_v8 = vshrl.u32 %v9832_v41, %v998_v14  ;;  %v1009_v16 = vshll.u32 %v9832_v41, %v997_v55 }
  0xc8   :  { %v1010_v44 = vshrl.u32 %v9795_v2, %v998_v14  ;;  %v652_v27 = vsel %vm569_vm11, %v651_v3, %v650_v59  ;;  %v940_v32 = vadd.s32 536870912, %v6938_v31  ;;  %v991_v10 = vor.u32 8388608, %v990_v42 }
  0xc9   :  { %v1012_v43 = vshll.u32 %v9795_v2, %v997_v55  ;;  %vm559_vm9 = vcmp.eq.s32.totalorder %v6903_v56, 0  ;;  %vm562_vm10 = vcmp.eq.s32.totalorder %v6903_v56, 2  ;;  %v5535_v5 = vadd.s32 4294967294, %v843_v12 }
  0xca   :  { %v1002_v49 = vor.u32 %v1001_v51, %v1000_v46  ;;  %v1005_v52 = vor.u32 %v1004_v11, %v1003_v17  ;;  %v1013_v39 = vshrl.u32 %v9796_v22, %v998_v14  ;;  %vm673_vm12 = vcmp.lt.s32.totalorder %v6424_v28, 0 }
  0xcb   :  { %v747_v26 = vsub.s32 4294967266, %v6949_v40  ;;  %v757_v59 = vsub.s32 4, %v6785_v30  ;;  %v1011_v3 = vor.u32 %v1010_v44, %v1009_v16  ;;  %vm1015_vm11 = vcmp.lt.s32.totalorder %v6951_v45, 1 }
  0xcc   :  { %v655_v55 = vsel %vm6907_vm6, %v9860_v62, %v652_v27  ;;  %v1008_v42 = vor.u32 %v1007_v8, %v1006_v50  ;;  %v1014_v53 = vor.u32 %v1013_v39, %v1012_v43  ;;  %vm1018_vm13 = vcmp.lt.s32.totalorder %v6951_v45, 4 }
  0xcd   :  { %v743_v11 = vsub.s32 32, %v6949_v40  ;;  %v6973_v12 = vshrl.u32 %v940_v32, 30  ;;  %vm1017_vm1 = vcmp.lt.s32.totalorder %v6951_v45, 3  ;;  %v6976_v46 = vshll.u32 %v991_v10, 8 }
  0xce   :  { %vm454_vm15 = vcmp.lt.s32.totalorder %v6821_v4, 2  ;;  %v9870_v16 = vand.u32 2147483647, %v6424_v28  ;;  %vm5536_vm4 = vcmp.lt.s32.totalorder %v5535_v5, 0  ;;  %vm1016_vm3 = vcmp.lt.s32.totalorder %v6951_v45, 2 }
  0xcf   :  { %v1023_v39 = vsel %vm1015_vm11, %v1002_v49, %v1005_v52  ;;  %v1090_v19 = vand.u32 2139095040, %v6585_v18  ;;  %vm558_vm5 = vcmp.lt.s32.totalorder %v6903_v56, 2  ;;  %v744_v10 = vshll.u32 %v6829_v0, %v6949_v40  ;;  %v9877_v56 = vld [vmem:[#allocation11_spill] sm:$0xff] }
  0xd0   :  { %vm6981_vm2 = vcmp.le.f32.partialorder %v9870_v16, 0.7853982  ;;  %v748_v27 = vadd.s32 127, %v747_v26  ;;  %v999_v51 = vshrl.u32 %v9786_v37, %v998_v14  ;;  %v1024_v17 = vsel %vm1018_vm13, %v1011_v3, 920167782 }
  0xd1   :  { %v1020_v32 = vsel %vm1018_vm13, %v1008_v42, 2102212464  ;;  %v1025_v50 = vsel %vm1017_vm1, %v1008_v42, %v1024_v17  ;;  %v1027_v8 = vsel %vm1015_vm11, %v1005_v52, %v1008_v42  ;;  %v1028_v43 = vsel %vm1018_vm13, %v1014_v53, 1326507024 }
  0xd2   :  { %v7003_v16 = vsel %vm5536_vm4, 0, %v5535_v5  ;;  %v942_v26 = vshll.u32 %v6973_v12, 30  ;;  %v1026_v0 = vsel %vm1016_vm3, %v1023_v39, %v1025_v50  ;;  %v1029_v14 = vsel %vm1017_vm1, %v1011_v3, %v1028_v43 }
  0xd3   :  { %v1030_v40 = vsel %vm1016_vm3, %v1027_v8, %v1029_v14  ;;  %v7013_v17 = vmul.u32.u64.low %v6976_v46, %v1026_v0  ;;  %v7014_v35 = vmul.u32.u64.high %v6976_v46, %v1026_v0, %v7013_v17  ;;  %v1091_v42 = vshrl.u32 %v1090_v19, 23 }
  0xd4   :  { %vm9642_vm6 = vweird.f32 %v9833_v23  ;;  %v745_v53 = vshrl.u32 %v727_v25, %v743_v11  ;;  %v749_v5 = vshll.u32 %v748_v27, 23  ;;  %v1019_v29 = vsel %vm1015_vm11, %v999_v51, %v1002_v49 }
  0xd5   :  { %v1021_v39 = vsel %vm1017_vm1, %v1005_v52, %v1020_v32  ;;  %vm9641_vm7 = vweird.f32 %v9845_v38  ;;  %vm9640_vm8 = vweird.f32 %v9850_v7  ;;  %v758_v3 = vsel %vm673_vm12, %v757_v59, %v6785_v30 }
  0xd6   :  { %v7028_v19 = vmul.u32.u64.low %v6976_v46, %v1030_v40  ;;  %v7029_v50 = vmul.u32.u64.high %v6976_v46, %v1030_v40, %v7028_v19  ;;  %v5545_v25 = vadd.s32 4294967169, %v1091_v42  ;;  %v9873_v11 = vxor.u32 2147483648, %v6888_v15 }
  0xd7   :  { %v9874_v52 = vxor.u32 2147483648, %v6868_v24  ;;  %v851_v51 = vsub.s32 4294967266, %v7003_v16  ;;  %v7043_v30 = vsub.s32 %v6938_v31, %v942_v26  ;;  %5830 = vcosq.f32 %v655_v55  ;;  %v9876_v19 = vld [vmem:[#allocation24_spill] sm:$0xff] }
  0xd8   :  { %v561_v49 = vsel %vm559_vm9, %v6868_v24, %v9873_v11  ;;  %v1022_v59 = vsel %vm1016_vm3, %v1019_v29, %v1021_v39  ;;  %v1041_v32 = vadd.s32 1, %v7014_v35  ;;  %v1097_v8 = vadd.s32 1, %v5545_v25 }
  0xd9   :  { %v564_v27 = vsel %vm562_vm10, %v9874_v52, %v6888_v15  ;;  %5832 = vsinq.f32 %v655_v55  ;;  %v746_v43 = vor.u32 %v745_v53, %v744_v10  ;;  %v750_v0 = vor.u32 4788187, %v749_v5  ;;  %v9879_v52 = vld [vmem:[#allocation28_spill] sm:$0xff] }
  0xda   :  { %v7050_v14 = vsel %vm6981_vm2, 0, %v758_v3  ;;  %v831_v40 = vadd.s32 %v6736_v47, %v6748_v60  ;;  %v847_v31 = vsub.s32 32, %v7003_v16  ;;  %vm1040_vm9 = vc.u32 %v7029_v50, %v7013_v17 }
  0xdb   :  { %9875 = vst [vmem:[#allocation40_spill] sm:$0xff] %v7050_v14  ;;  %v1194_v29 = vand.u32 2139095040, %v6589_v20  ;;  %v461_v45 = vsel %vm454_vm15, %v6923_v54, %v6930_v57  ;;  %v852_v55 = vadd.s32 127, %v851_v51  ;;  %v945_v10 = vsub.s32 0, %v7043_v30 }
  0xdc   :  { %v1038_v26 = vmul.u32 %v6976_v46, %v1022_v59  ;;  %v565_v47 = vsel %vm558_vm5, %v561_v49, %v564_v27  ;;  %v660_v60 = vadd.s32 3, %v6935_v9  ;;  %v1042_v42 = vsel %vm1040_vm9, %v1041_v32, %v7014_v35  ;;  %v9880_v27 = vld [vmem:[#allocation12_spill] sm:$0xff] }
  0xdd   :  { %vm1098_vm10 = vcmp.gt.s32.totalorder %v1097_v8, 0  ;;  %v751_v53 = vand.u32 2147483647, %v750_v0  ;;  %v753_v5 = vcvt.s32.f32 %v746_v43  ;;  %v764_v39 = vadd.s32 3, %v7050_v14 }
  0xde   :  { %v9609_v4 = vand.u32 2147483647, %v6585_v18  ;;  %v848_v54 = vshll.u32 %v6865_v48, %v7003_v16  ;;  %v849_v57 = vshrl.u32 %v831_v40, %v847_v31  ;;  %v1099_v3 = vsel %vm1098_vm10, %v1097_v8, 0 }
  0xdf   :  { %v1195_v46 = vshrl.u32 %v1194_v29, 23  ;;  %v7075_v25 = vsel %vm208_vm14, %v9877_v56, %v9876_v19  ;;  %v853_v11 = vshll.u32 %v852_v55, 23  ;;  %v5538_v35 = vmin.u32 %v945_v10, %v7043_v30 }
  0xe0   :  { %9878 = vst [vmem:[#allocation24_spill] sm:$0xff] %v7075_v25  ;;  %v7078_v49 = vadd.s32 %v1042_v42, %v1038_v26  ;;  %v7083_v51 = vsel %vm208_vm14, %v9880_v27, %v9879_v52  ;;  %v7088_v48 = vsel %vm9642_vm6, nan, %v6916_v34  ;;  %v7090_v16 = vand.u32 3, %v660_v60 }
  0xe1   :  { %9881 = vst [vmem:[#allocation11_spill] sm:$0xff] %v7083_v51  ;;  %9882 = vst [vmem:[#allocation28_spill] sm:$0xff] %v7088_v48  ;;  %v1101_v59 = vand.u32 31, %v1099_v3  ;;  %v7094_v32 = vsel %vm9641_vm7, nan, %v461_v45  ;;  %v7098_v8 = vsel %vm9640_vm8, nan, %v565_v47  ;;  %v754_v43 = vmul.f32 %v753_v5, %v751_v53  ;;  %v7102_v40 = vpop.eup %5830 }
  0xe2   :  { %9883 = vst [vmem:[#allocation12_spill] sm:$0xff] %v7094_v32  ;;  %9884 = vst [vmem:[#allocation41_spill] sm:$0xff] %v7098_v8  ;;  %v7100_v0 = vand.u32 3, %v764_v39  ;;  %v850_v31 = vor.u32 %v849_v57, %v848_v54  ;;  %v1094_v34 = vand.u32 8388607, %v9609_v4  ;;  %v5549_v55 = vadd.s32 4294967169, %v1195_v46 }
  0xe3   :  { %9885 = vst [vmem:[#allocation42_spill] sm:$0xff] %v7102_v40  ;;  %v1102_v29 = vsub.s32 32, %v1101_v59  ;;  %v7106_v10 = vpop.eup %5832  ;;  %v854_v26 = vor.u32 4788187, %v853_v11  ;;  %v947_v45 = vclz %v5538_v35  ;;  %v1044_v60 = vadd.s32 536870912, %v7078_v49  ;;  %v9887_v11 = vld [vmem:[#allocation29_spill] sm:$0xff] }
  0xe4   :  { %9886 = vst [vmem:[#allocation43_spill] sm:$0xff] %v7106_v10  ;;  %v1100_v42 = vshrl.u32 %v1099_v3, 5  ;;  %vm666_vm14 = vcmp.eq.s32.totalorder %v7090_v16, 2  ;;  %v1104_v47 = vshll.u32 %v9786_v37, %v1101_v59  ;;  %v1107_v5 = vshll.u32 %v9834_v1, %v1101_v59 }
  0xe5   :  { %v1105_v53 = vshrl.u32 %v9834_v1, %v1102_v29  ;;  %v1108_v39 = vshrl.u32 %v9835_v33, %v1102_v29  ;;  %v1110_v54 = vshll.u32 %v9835_v33, %v1101_v59  ;;  %v1111_v57 = vshrl.u32 %v9832_v41, %v1102_v29 }
  0xe6   :  { %v1113_v46 = vshll.u32 %v9832_v41, %v1101_v59  ;;  %v1114_v56 = vshrl.u32 %v9795_v2, %v1102_v29  ;;  %v755_v35 = vxor.u32 2147483648, %v754_v43  ;;  %v1201_v27 = vadd.s32 1, %v5549_v55 }
  0xe7   :  { %v855_v4 = vand.u32 2147483647, %v854_v26  ;;  %v857_v14 = vcvt.s32.f32 %v850_v31  ;;  %v7120_v7 = vshrl.u32 %v1044_v60, 30  ;;  %v1095_v24 = vor.u32 8388608, %v1094_v34 }
  0xe8   :  { %vm663_vm11 = vcmp.eq.s32.totalorder %v7090_v16, 0  ;;  %v1106_v15 = vor.u32 %v1105_v53, %v1104_v47  ;;  %v1109_v38 = vor.u32 %v1108_v39, %v1107_v5  ;;  %v1116_v9 = vshll.u32 %v9795_v2, %v1101_v59 }
  0xe9   :  { %v1117_v23 = vshrl.u32 %v9796_v22, %v1102_v29  ;;  %v5539_v8 = vadd.s32 4294967294, %v947_v45  ;;  %v1112_v32 = vor.u32 %v1111_v57, %v1110_v54  ;;  %v1115_v3 = vor.u32 %v1114_v56, %v1113_v46 }
  0xea   :  { %vm1119_vm13 = vcmp.lt.s32.totalorder %v1100_v42, 1  ;;  %vm777_vm1 = vcmp.lt.s32.totalorder %v9887_v11, 0  ;;  %v1103_v55 = vshrl.u32 %v9786_v37, %v1102_v29  ;;  %vm1122_vm15 = vcmp.lt.s32.totalorder %v1100_v42, 4 }
  0xeb   :  { %v1118_v31 = vor.u32 %v1117_v23, %v1116_v9  ;;  %vm1202_vm4 = vcmp.gt.s32.totalorder %v1201_v27, 0  ;;  %v756_v34 = vsel %vm673_vm12, %v755_v35, %v754_v43  ;;  %v858_v26 = vmul.f32 %v857_v14, %v855_v4 }
  0xec   :  { %vm1121_vm3 = vcmp.lt.s32.totalorder %v1100_v42, 3  ;;  %v1135_v60 = vshll.u32 %v1095_v24, 8  ;;  %v1046_v59 = vshll.u32 %v7120_v7, 30  ;;  %vm1120_vm5 = vcmp.lt.s32.totalorder %v1100_v42, 2 }
  0xed   :  { %v1124_v45 = vsel %vm1122_vm15, %v1112_v32, 2102212464  ;;  %v1127_v47 = vsel %vm1119_vm13, %v1106_v15, %v1109_v38  ;;  %vm5540_vm9 = vcmp.lt.s32.totalorder %v5539_v8, 0  ;;  %v1128_v53 = vsel %vm1122_vm15, %v1115_v3, 920167782 }
  0xee   :  { %v1131_v23 = vsel %vm1119_vm13, %v1109_v38, %v1112_v32  ;;  %v1203_v9 = vsel %vm1202_vm4, %v1201_v27, 0  ;;  %v1123_v29 = vsel %vm1119_vm13, %v1103_v55, %v1106_v15  ;;  %v1125_v43 = vsel %vm1121_vm3, %v1109_v38, %v1124_v45 }
  0xef   :  { %v1129_v14 = vsel %vm1121_vm3, %v1112_v32, %v1128_v53  ;;  %v1132_v24 = vsel %vm1122_vm15, %v1118_v31, 1326507024  ;;  %v9888_v4 = vxor.u32 2147483648, %v7102_v40  ;;  %v759_v39 = vsel %vm6981_vm2, %v6424_v28, %v756_v34 }
  0xf0   :  { %v1130_v54 = vsel %vm1120_vm5, %v1127_v47, %v1129_v14  ;;  %v1133_v15 = vsel %vm1121_vm3, %v1115_v3, %v1132_v24  ;;  %v7151_v38 = vsub.s32 %v7078_v49, %v1046_v59  ;;  %v859_v56 = vxor.u32 2147483648, %v858_v26 }
  0xf1   :  { %v7143_v5 = vsel %vm666_vm14, %v9888_v4, %v7106_v10  ;;  %v1134_v32 = vsel %vm1120_vm5, %v1131_v23, %v1133_v15  ;;  %v7154_v57 = vmul.u32.u64.low %v1135_v60, %v1130_v54  ;;  %v7155_v46 = vmul.u32.u64.high %v1135_v60, %v1130_v54, %v7154_v57 }
  0xf2   :  { %v7159_v35 = vsel %vm5540_vm9, 0, %v5539_v8  ;;  %v1126_v44 = vsel %vm1120_vm5, %v1123_v29, %v1125_v43  ;;  %v1205_v27 = vand.u32 31, %v1203_v9  ;;  %5834 = vcosq.f32 %v759_v39 }
  0xf3   :  { %v7162_v55 = vmul.u32.u64.low %v1135_v60, %v1134_v32  ;;  %v7163_v31 = vmul.u32.u64.high %v1135_v60, %v1134_v32, %v7162_v55  ;;  %v9619_v49 = vand.u32 2147483647, %v6589_v20  ;;  %v9889_v3 = vxor.u32 2147483648, %v7106_v10 }
  0xf4   :  { %5836 = vsinq.f32 %v759_v39  ;;  %v935_v8 = vadd.s32 %v6884_v58, %v6882_v21  ;;  %v1206_v42 = vsub.s32 32, %v1205_v27  ;;  %v955_v59 = vsub.s32 4294967266, %v7159_v35 }
  0xf5   :  { %v7171_v34 = vsel %vm663_vm11, %v7102_v40, %v9889_v3  ;;  %v1049_v45 = vsub.s32 0, %v7151_v38  ;;  %v1142_v47 = vmul.u32 %v1135_v60, %v1126_v44  ;;  %v1145_v53 = vadd.s32 1, %v7155_v46 }
  0xf6   :  { %v860_v23 = vsel %vm777_vm1, %v859_v56, %v858_v26  ;;  %v1208_v29 = vshll.u32 %v9786_v37, %v1205_v27  ;;  %v1209_v43 = vshrl.u32 %v9834_v1, %v1206_v42  ;;  %v1211_v14 = vshll.u32 %v9834_v1, %v1205_v27 }
  0xf7   :  { %v9890_v24 = vand.u32 2147483647, %v9887_v11  ;;  %vm1144_vm2 = vc.u32 %v7163_v31, %v7154_v57  ;;  %v1198_v58 = vand.u32 8388607, %v9619_v49  ;;  %v1204_v60 = vshrl.u32 %v1203_v9, 5 }
  0xf8   :  { %v1212_v26 = vshrl.u32 %v9835_v33, %v1206_v42  ;;  %v951_v4 = vsub.s32 32, %v7159_v35  ;;  %v1146_v39 = vsel %vm1144_vm2, %v1145_v53, %v7155_v46  ;;  %v1214_v54 = vshll.u32 %v9835_v33, %v1205_v27 }
  0xf9   :  { %vm7185_vm12 = vcmp.le.f32.partialorder %v9890_v24, 0.7853982  ;;  %v1217_v15 = vshll.u32 %v9832_v41, %v1205_v27  ;;  %v952_v32 = vshll.u32 %v7043_v30, %v7159_v35  ;;  %v956_v56 = vadd.s32 127, %v955_v59 }
  0xfa   :  { %v5542_v44 = vmin.u32 %v1049_v45, %v7151_v38  ;;  %v1147_v55 = vadd.s32 %v1146_v39, %v1142_v47  ;;  %v1210_v3 = vor.u32 %v1209_v43, %v1208_v29  ;;  %v1213_v24 = vor.u32 %v1212_v26, %v1211_v14 }
  0xfb   :  { %v1215_v9 = vshrl.u32 %v9832_v41, %v1206_v42  ;;  %v1218_v49 = vshrl.u32 %v9795_v2, %v1206_v42  ;;  %v1220_v46 = vshll.u32 %v9795_v2, %v1205_v27  ;;  %v1221_v53 = vshrl.u32 %v9796_v22, %v1206_v42 }
  0xfc   :  { %v1148_v40 = vadd.s32 536870912, %v1147_v55  ;;  %vm1223_vm10 = vcmp.lt.s32.totalorder %v1204_v60, 1  ;;  %v1199_v10 = vor.u32 8388608, %v1198_v58  ;;  %v1207_v48 = vshrl.u32 %v9786_v37, %v1206_v42  ;;  %v7206_v59 = vpop.eup %5834 }
  0xfd   :  { %v1216_v30 = vor.u32 %v1215_v9, %v1214_v54  ;;  %v1219_v35 = vor.u32 %v1218_v49, %v1217_v15  ;;  %9893 = vst [vmem:[#allocation44_spill] sm:$0xff] %v7206_v59  ;;  %v953_v45 = vshrl.u32 %v935_v8, %v951_v4  ;;  %vm1225_vm14 = vcmp.lt.s32.totalorder %v1204_v60, 3 }
  0xfe   :  { %v7208_v47 = vshrl.u32 %v1148_v40, 30  ;;  %vm1226_vm11 = vcmp.lt.s32.totalorder %v1204_v60, 4  ;;  %v7210_v29 = vpop.eup %5836  ;;  %vm662_vm13 = vcmp.lt.s32.totalorder %v7090_v16, 2  ;;  %v1222_v27 = vor.u32 %v1221_v53, %v1220_v46 }
  0xff   :  { %9894 = vst [vmem:[#allocation45_spill] sm:$0xff] %v7210_v29  ;;  %vm1224_vm15 = vcmp.lt.s32.totalorder %v1204_v60, 2  ;;  %v1228_v43 = vsel %vm1226_vm11, %v1216_v30, 2102212464  ;;  %v1231_v14 = vsel %vm1223_vm10, %v1210_v3, %v1213_v24  ;;  %vm767_vm4 = vcmp.eq.s32.totalorder %v7100_v0, 0 }
 0x100   :  { %vm881_vm3 = vcmp.lt.s32.totalorder %v6496_v13, 0  ;;  %v957_v49 = vshll.u32 %v956_v56, 23  ;;  %v1051_v8 = vclz %v5542_v44  ;;  %v1150_v40 = vshll.u32 %v7208_v47, 30 }
 0x101   :  { %v1232_v42 = vsel %vm1226_vm11, %v1219_v35, 920167782  ;;  %v861_v58 = vsub.s32 4, %v6832_v63  ;;  %v1227_v26 = vsel %vm1223_vm10, %v1207_v48, %v1210_v3  ;;  %v1239_v39 = vshll.u32 %v1199_v10, 8 }
 0x102   :  { %v1233_v4 = vsel %vm1225_vm14, %v1216_v30, %v1232_v42  ;;  %v7222_v54 = vsub.s32 %v1147_v55, %v1150_v40  ;;  %v1229_v15 = vsel %vm1225_vm14, %v1213_v24, %v1228_v43  ;;  %v1235_v56 = vsel %vm1223_vm10, %v1213_v24, %v1216_v30 }
 0x103   :  { %v1234_v9 = vsel %vm1224_vm15, %v1231_v14, %v1233_v4  ;;  %vm9639_vm5 = vweird.f32 %v9860_v62  ;;  %vm766_vm9 = vcmp.lt.s32.totalorder %v7100_v0, 2  ;;  %v7232_v44 = vsel %vm7185_vm12, %v9887_v11, %v860_v23 }
 0x104   :  { %v9895_v48 = vand.u32 2147483647, %v6496_v13  ;;  %v954_v55 = vor.u32 %v953_v45, %v952_v32  ;;  %v965_v3 = vsub.s32 4, %v6973_v12  ;;  %v1236_v24 = vsel %vm1226_vm11, %v1222_v27, 1326507024 }
 0x105   :  { %v958_v46 = vor.u32 4788187, %v957_v49  ;;  %v5543_v53 = vadd.s32 4294967294, %v1051_v8  ;;  %v1153_v30 = vsub.s32 0, %v7222_v54  ;;  %v1237_v43 = vsel %vm1225_vm14, %v1219_v35, %v1236_v24  ;;  %v9898_v8 = vld [vmem:[#allocation34_spill] sm:$0xff] }
 0x106   :  { %vm7236_vm2 = vcmp.le.f32.partialorder %v9895_v48, 0.7853982  ;;  %v1230_v23 = vsel %vm1224_vm15, %v1227_v26, %v1229_v15  ;;  %v1238_v14 = vsel %vm1224_vm15, %v1235_v56, %v1237_v43  ;;  %5838 = vcosq.f32 %v7232_v44 }
 0x107   :  { %v7246_v40 = vmul.u32.u64.low %v1239_v39, %v1234_v9  ;;  %v7247_v42 = vmul.u32.u64.high %v1239_v39, %v1234_v9, %v7246_v40  ;;  %v5546_v32 = vmin.u32 %v1153_v30, %v7222_v54  ;;  %vm9638_vm10 = vweird.f32 %v6424_v28 }
 0x108   :  { %v7252_v45 = vmul.u32.u64.low %v1239_v39, %v1238_v14  ;;  %v7253_v27 = vmul.u32.u64.high %v1239_v39, %v1238_v14, %v7252_v45  ;;  %v9625_v49 = vxor.u32 2147483648, %v7210_v29  ;;  %v9624_v35 = vxor.u32 2147483648, %v7206_v59 }
 0x109   :  { %v862_v60 = vsel %vm777_vm1, %v861_v58, %v6832_v63  ;;  %v1298_v26 = vand.u32 2139095040, %v9898_v8  ;;  %vm770_vm14 = vcmp.eq.s32.totalorder %v7100_v0, 2  ;;  %v959_v4 = vand.u32 2147483647, %v958_v46 }
 0x10a   :  { %v961_v15 = vcvt.s32.f32 %v954_v55  ;;  %v1246_v9 = vmul.u32 %v1239_v39, %v1230_v23  ;;  %v966_v56 = vsel %vm881_vm3, %v965_v3, %v6973_v12  ;;  %vm5544_vm11 = vcmp.lt.s32.totalorder %v5543_v53, 0 }
 0x10b   :  { %v1249_v48 = vadd.s32 1, %v7247_v42  ;;  %v1299_v24 = vshrl.u32 %v1298_v26, 23  ;;  %v669_v63 = vsel %vm662_vm13, %v7171_v34, %v7143_v5  ;;  %v7273_v58 = vsel %vm7185_vm12, 0, %v862_v60 }
 0x10c   :  { %9899 = vst [vmem:[#allocation46_spill] sm:$0xff] %v7273_v58  ;;  %v1155_v46 = vclz %v5546_v32  ;;  %vm1248_vm1 = vc.u32 %v7253_v27, %v7246_v40  ;;  %v769_v12 = vsel %vm767_vm4, %v7206_v59, %v9625_v49  ;;  %v772_v39 = vsel %vm770_vm14, %v9624_v35, %v7210_v29 }
 0x10d   :  { %v1250_v16 = vsel %vm1248_vm1, %v1249_v48, %v7247_v42  ;;  %v5553_v5 = vadd.s32 4294967169, %v1299_v24  ;;  %v962_v34 = vmul.f32 %v961_v15, %v959_v4  ;;  %v7288_v21 = vsel %vm7236_vm2, 0, %v966_v56 }
 0x10e   :  { %9900 = vst [vmem:[#allocation47_spill] sm:$0xff] %v7288_v21  ;;  %v1054_v55 = vsel %vm5544_vm11, 0, %v5543_v53  ;;  %v1251_v3 = vadd.s32 %v1250_v16, %v1246_v9  ;;  %vm985_vm12 = vcmp.lt.s32.totalorder %v6500_v61, 0  ;;  %v1039_v30 = vadd.s32 %v7013_v17, %v7029_v50 }
 0x10f   :  { %v1055_v43 = vsub.s32 32, %v1054_v55  ;;  %v1305_v23 = vadd.s32 1, %v5553_v5  ;;  %v7295_v14 = vsel %vm9639_vm5, nan, %v669_v63  ;;  %v773_v42 = vsel %vm766_vm9, %v769_v12, %v772_v39 }
 0x110   :  { %v868_v32 = vadd.s32 3, %v7273_v58  ;;  %v5547_v45 = vadd.s32 4294967294, %v1155_v46  ;;  %v972_v53 = vadd.s32 3, %v7288_v21  ;;  %v1069_v60 = vsub.s32 4, %v7120_v7  ;;  %v7302_v4 = vpop.eup %5838 }
 0x111   :  { %v1252_v26 = vadd.s32 536870912, %v1251_v3  ;;  %vm1306_vm13 = vcmp.gt.s32.totalorder %v1305_v23, 0  ;;  %9901 = vst [vmem:[#allocation48_spill] sm:$0xff] %v7302_v4  ;;  %v963_v17 = vxor.u32 2147483648, %v962_v34  ;;  %v1059_v50 = vsub.s32 4294967266, %v1054_v55 }
 0x112   :  { %v9626_v15 = vand.u32 2147483647, %v9898_v8  ;;  %v1307_v9 = vsel %vm1306_vm13, %v1305_v23, 0  ;;  %v1056_v56 = vshll.u32 %v7151_v38, %v1054_v55  ;;  %v1057_v0 = vshrl.u32 %v1039_v30, %v1055_v43 }
 0x113   :  { %v7306_v48 = vshrl.u32 %v1252_v26, 30  ;;  %v1309_v24 = vand.u32 31, %v1307_v9  ;;  %v7310_v63 = vsel %vm9638_vm10, nan, %v773_v42  ;;  %5840 = vsinq.f32 %v7232_v44 }
 0x114   :  { %9902 = vst [vmem:[#allocation49_spill] sm:$0xff] %v7310_v63  ;;  %v7313_v46 = vand.u32 3, %v868_v32  ;;  %vm5548_vm15 = vcmp.lt.s32.totalorder %v5547_v45, 0  ;;  %v7316_v39 = vand.u32 3, %v972_v53  ;;  %v7321_v5 = vsel %vm881_vm3, %v963_v17, %v962_v34 }
 0x115   :  { %v1254_v16 = vshll.u32 %v7306_v48, 30  ;;  %v1310_v38 = vsub.s32 32, %v1309_v24  ;;  %v1060_v55 = vadd.s32 127, %v1059_v50  ;;  %v7326_v30 = vsel %vm985_vm12, %v1069_v60, %v7120_v7 }
 0x116   :  { %v1302_v44 = vand.u32 8388607, %v9626_v15  ;;  %v7330_v43 = vor.u32 %v1057_v0, %v1056_v56  ;;  %v7332_v23 = vsel %vm5548_vm15, 0, %v5547_v45  ;;  %v1402_v32 = vand.u32 2139095040, %v6754_v36 }
 0x117   :  { %v7334_v42 = vsub.s32 %v1251_v3, %v1254_v16  ;;  %v1312_v34 = vshll.u32 %v9786_v37, %v1309_v24  ;;  %v1313_v53 = vshrl.u32 %v9834_v1, %v1310_v38  ;;  %v1315_v26 = vshll.u32 %v9834_v1, %v1309_v24 }
 0x118   :  { %v1316_v7 = vshrl.u32 %v9835_v33, %v1310_v38  ;;  %v1308_v17 = vshrl.u32 %v1307_v9, 5  ;;  %v1318_v50 = vshll.u32 %v9835_v33, %v1309_v24  ;;  %v1319_v45 = vshrl.u32 %v9832_v41, %v1310_v38 }
 0x119   :  { %v1257_v60 = vsub.s32 0, %v7334_v42  ;;  %v1061_v56 = vshll.u32 %v1060_v55, 23  ;;  %v1303_v3 = vor.u32 8388608, %v1302_v44  ;;  %v1321_v0 = vshll.u32 %v9832_v41, %v1309_v24 }
 0x11a   :  { %v1322_v16 = vshrl.u32 %v9795_v2, %v1310_v38  ;;  %v1143_v35 = vadd.s32 %v7154_v57, %v7163_v31  ;;  %v1163_v49 = vsub.s32 4294967266, %v7332_v23  ;;  %v1324_v12 = vshll.u32 %v9795_v2, %v1309_v24 }
 0x11b   :  { %v5550_v15 = vmin.u32 %v1257_v60, %v7334_v42  ;;  %v1314_v9 = vor.u32 %v1313_v53, %v1312_v34  ;;  %v1317_v28 = vor.u32 %v1316_v7, %v1315_v26  ;;  %v1325_v29 = vshrl.u32 %v9796_v22, %v1310_v38 }
 0x11c   :  { %v1323_v59 = vor.u32 %v1322_v16, %v1321_v0  ;;  %v1320_v44 = vor.u32 %v1319_v45, %v1318_v50  ;;  %vm1327_vm4 = vcmp.lt.s32.totalorder %v1308_v17, 1  ;;  %v1403_v62 = vshrl.u32 %v1402_v32, 23 }
 0x11d   :  { %v1259_v55 = vclz %v5550_v15  ;;  %v7352_v21 = vpop.eup %5840  ;;  %v9904_v58 = vand.u32 2147483647, %v6500_v61  ;;  %v1062_v31 = vor.u32 4788187, %v1061_v56  ;;  %v1311_v24 = vshrl.u32 %v9786_v37, %v1310_v38 }
 0x11e   :  { %9903 = vst [vmem:[#allocation50_spill] sm:$0xff] %v7352_v21  ;;  %vm1329_vm9 = vcmp.lt.s32.totalorder %v1308_v17, 3  ;;  %v1343_v34 = vshll.u32 %v1303_v3, 8  ;;  %v1326_v26 = vor.u32 %v1325_v29, %v1324_v12  ;;  %vm1328_vm14 = vcmp.lt.s32.totalorder %v1308_v17, 2 }
 0x11f   :  { %vm7356_vm3 = vcmp.le.f32.partialorder %v9904_v58, 0.7853982  ;;  %v5551_v53 = vadd.s32 4294967294, %v1259_v55  ;;  %vm1330_vm11 = vcmp.lt.s32.totalorder %v1308_v17, 4  ;;  %vm874_vm1 = vcmp.eq.s32.totalorder %v7313_v46, 2 }
 0x120   :  { %v1159_v15 = vsub.s32 32, %v7332_v23  ;;  %v1332_v32 = vsel %vm1330_vm11, %v1320_v44, 2102212464  ;;  %v1335_v58 = vsel %vm1327_vm4, %v1314_v9, %v1317_v28  ;;  %v1336_v7 = vsel %vm1330_vm11, %v1323_v59, 920167782 }
 0x121   :  { %v1164_v60 = vadd.s32 127, %v1163_v49  ;;  %vm5552_vm13 = vcmp.lt.s32.totalorder %v5551_v53, 0  ;;  %v1337_v38 = vsel %vm1329_vm9, %v1320_v44, %v1336_v7  ;;  %v5557_v50 = vadd.s32 4294967169, %v1403_v62 }
 0x122   :  { %v1331_v45 = vsel %vm1327_vm4, %v1311_v24, %v1314_v9  ;;  %v1333_v29 = vsel %vm1329_vm9, %v1317_v28, %v1332_v32  ;;  %v1338_v12 = vsel %vm1328_vm14, %v1335_v58, %v1337_v38  ;;  %v1339_v56 = vsel %vm1327_vm4, %v1317_v28, %v1320_v44 }
 0x123   :  { %v1063_v3 = vand.u32 2147483647, %v1062_v31  ;;  %v1065_v0 = vcvt.s32.f32 %v7330_v43  ;;  %v1262_v16 = vsel %vm5552_vm13, 0, %v5551_v53  ;;  %v1340_v55 = vsel %vm1330_vm11, %v1326_v26, 1326507024 }
 0x124   :  { %v1160_v49 = vshll.u32 %v7222_v54, %v7332_v23  ;;  %v1341_v7 = vsel %vm1329_vm9, %v1323_v59, %v1340_v55  ;;  %v7376_v62 = vmul.u32.u64.low %v1343_v34, %v1338_v12  ;;  %v7377_v63 = vmul.u32.u64.high %v1343_v34, %v1338_v12, %v7376_v62 }
 0x125   :  { %v1161_v9 = vshrl.u32 %v1143_v35, %v1159_v15  ;;  %v1165_v24 = vshll.u32 %v1164_v60, 23  ;;  %v1334_v32 = vsel %vm1328_vm14, %v1331_v45, %v1333_v29  ;;  %v1342_v28 = vsel %vm1328_vm14, %v1339_v56, %v1341_v7 }
 0x126   :  { %v1267_v44 = vsub.s32 4294967266, %v1262_v16  ;;  %v7382_v43 = vmul.u32.u64.low %v1343_v34, %v1342_v28  ;;  %v7383_v31 = vmul.u32.u64.high %v1343_v34, %v1342_v28, %v7382_v43  ;;  %v1409_v53 = vadd.s32 1, %v5557_v50 }
 0x127   :  { %v967_v59 = vsel %vm7236_vm2, %v6496_v13, %v7321_v5  ;;  %v7390_v54 = vmul.f32 %v1065_v0, %v1063_v3  ;;  %v7395_v35 = vsel %vm7356_vm3, 0, %v7326_v30  ;;  %v1247_v23 = vadd.s32 %v7246_v40, %v7253_v27 }
 0x128   :  { %9907 = vst [vmem:[#allocation51_spill] sm:$0xff] %v7395_v35  ;;  %v1350_v17 = vmul.u32 %v1343_v34, %v1334_v32  ;;  %v1353_v15 = vadd.s32 1, %v7377_v63  ;;  %vm1410_vm15 = vcmp.gt.s32.totalorder %v1409_v53, 0  ;;  %v1162_v58 = vor.u32 %v1161_v9, %v1160_v49 }
 0x129   :  { %v1166_v60 = vor.u32 4788187, %v1165_v24  ;;  %v9635_v38 = vand.u32 2147483647, %v6754_v36  ;;  %v1411_v10 = vsel %vm1410_vm15, %v1409_v53, 0  ;;  %v1263_v5 = vsub.s32 32, %v1262_v16 }
 0x12a   :  { %v1268_v50 = vadd.s32 127, %v1267_v44  ;;  %vm1352_vm2 = vc.u32 %v7383_v31, %v7376_v62  ;;  %v1413_v45 = vand.u32 31, %v1411_v10  ;;  %v9908_v30 = vxor.u32 2147483648, %v7302_v4 }
 0x12b   :  { %5842 = vcosq.f32 %v967_v59  ;;  %v7411_v27 = vadd.s32 3, %v7395_v35  ;;  %v1354_v34 = vsel %vm1352_vm2, %v1353_v15, %v7377_v63  ;;  %v1167_v3 = vand.u32 2147483647, %v1166_v60 }
 0x12c   :  { %v7408_v40 = vsel %vm874_vm1, %v9908_v30, %v7352_v21  ;;  %5844 = vsinq.f32 %v967_v59  ;;  %v1355_v12 = vadd.s32 %v1354_v34, %v1350_v17  ;;  %v1414_v56 = vsub.s32 32, %v1413_v45 }
 0x12d   :  { %v1169_v0 = vcvt.s32.f32 %v1162_v58  ;;  %v1264_v55 = vshll.u32 %v7334_v42, %v1262_v16  ;;  %v1406_v49 = vand.u32 8388607, %v9635_v38  ;;  %v1265_v7 = vshrl.u32 %v1247_v23, %v1263_v5 }
 0x12e   :  { %v1269_v9 = vshll.u32 %v1268_v50, 23  ;;  %v1356_v24 = vadd.s32 536870912, %v1355_v12  ;;  %v1412_v32 = vshrl.u32 %v1411_v10, 5  ;;  %vm871_vm4 = vcmp.eq.s32.totalorder %v7313_v46, 0 }
 0x12f   :  { %v1416_v63 = vshll.u32 %v9786_v37, %v1413_v45  ;;  %v1417_v28 = vshrl.u32 %v9834_v1, %v1414_v56  ;;  %v1419_v44 = vshll.u32 %v9834_v1, %v1413_v45  ;;  %v1420_v43 = vshrl.u32 %v9835_v33, %v1414_v56 }
 0x130   :  { %v7423_v53 = vshrl.u32 %v1356_v24, 30  ;;  %v1422_v42 = vshll.u32 %v9835_v33, %v1413_v45  ;;  %v1423_v16 = vshrl.u32 %v9832_v41, %v1414_v56  ;;  %v1425_v59 = vshll.u32 %v9832_v41, %v1413_v45 }
 0x131   :  { %v7428_v23 = vmul.f32 %v1169_v0, %v1167_v3  ;;  %v1407_v17 = vor.u32 8388608, %v1406_v49  ;;  %v1426_v15 = vshrl.u32 %v9795_v2, %v1414_v56  ;;  %v1506_v58 = vand.u32 2139095040, %v6798_v6 }
 0x132   :  { %v1266_v60 = vor.u32 %v1265_v7, %v1264_v55  ;;  %v1270_v10 = vor.u32 4788187, %v1269_v9  ;;  %v1358_v5 = vshll.u32 %v7423_v53, 30  ;;  %v1428_v50 = vshll.u32 %v9795_v2, %v1413_v45 }
 0x133   :  { %v1418_v30 = vor.u32 %v1417_v28, %v1416_v63  ;;  %v1421_v34 = vor.u32 %v1420_v43, %v1419_v44  ;;  %v1427_v24 = vor.u32 %v1426_v15, %v1425_v59  ;;  %v1429_v38 = vshrl.u32 %v9796_v22, %v1414_v56 }
 0x134   :  { %v7435_v29 = vsub.s32 %v1355_v12, %v1358_v5  ;;  %v1415_v3 = vshrl.u32 %v9786_v37, %v1414_v56  ;;  %v1424_v0 = vor.u32 %v1423_v16, %v1422_v42  ;;  %vm1431_vm9 = vcmp.lt.s32.totalorder %v1412_v32, 1 }
 0x135   :  { %v7438_v49 = vpop.eup %5842  ;;  %v1430_v26 = vor.u32 %v1429_v38, %v1428_v50  ;;  %vm1433_vm14 = vcmp.lt.s32.totalorder %v1412_v32, 3  ;;  %vm1434_vm11 = vcmp.lt.s32.totalorder %v1412_v32, 4  ;;  %v1507_v55 = vshrl.u32 %v1506_v58, 23 }
 0x136   :  { %9909 = vst [vmem:[#allocation52_spill] sm:$0xff] %v7438_v49  ;;  %v7440_v7 = vpop.eup %5844  ;;  %vm1089_vm1 = vcmp.lt.s32.totalorder %v6585_v18, 0  ;;  %v1361_v45 = vsub.s32 0, %v7435_v29  ;;  %vm1432_vm13 = vcmp.lt.s32.totalorder %v1412_v32, 2  ;;  %v1436_v12 = vsel %vm1434_vm11, %v1424_v0, 2102212464 }
 0x137   :  { %9910 = vst [vmem:[#allocation53_spill] sm:$0xff] %v7440_v7  ;;  %v1447_v9 = vshll.u32 %v1407_v17, 8  ;;  %v1271_v63 = vand.u32 2147483647, %v1270_v10  ;;  %v1273_v56 = vcvt.s32.f32 %v1266_v60  ;;  %v1439_v28 = vsel %vm1431_vm9, %v1418_v30, %v1421_v34 }
 0x138   :  { %v1440_v44 = vsel %vm1434_vm11, %v1427_v24, 920167782  ;;  %v5554_v38 = vmin.u32 %v1361_v45, %v7435_v29  ;;  %v1435_v43 = vsel %vm1431_vm9, %v1415_v3, %v1418_v30  ;;  %v1437_v42 = vsel %vm1433_vm14, %v1421_v34, %v1436_v12 }
 0x139   :  { %v1441_v16 = vsel %vm1433_vm14, %v1424_v0, %v1440_v44  ;;  %v9911_v59 = vand.u32 2147483647, %v6585_v18  ;;  %vm1193_vm2 = vcmp.lt.s32.totalorder %v6589_v20, 0  ;;  %v1443_v58 = vsel %vm1431_vm9, %v1421_v34, %v1424_v0 }
 0x13a   :  { %v1442_v17 = vsel %vm1432_vm13, %v1439_v28, %v1441_v16  ;;  %v1444_v60 = vsel %vm1434_vm11, %v1430_v26, 1326507024  ;;  %v5561_v10 = vadd.s32 4294967169, %v1507_v55  ;;  %v9914_v5 = vxor.u32 2147483648, %v7352_v21 }
 0x13b   :  { %vm7453_vm15 = vcmp.le.f32.partialorder %v9911_v59, 0.7853982  ;;  %v9915_v30 = vxor.u32 2147483648, %v7390_v54  ;;  %v1173_v45 = vsub.s32 4, %v7208_v47  ;;  %v1363_v12 = vclz %v5554_v38 }
 0x13c   :  { %v7466_v50 = vsel %vm871_vm4, %v7302_v4, %v9914_v5  ;;  %v1274_v34 = vmul.f32 %v1273_v56, %v1271_v63  ;;  %v1445_v26 = vsel %vm1433_vm14, %v1427_v24, %v1444_v60  ;;  %v1438_v44 = vsel %vm1432_vm13, %v1435_v43, %v1437_v42 }
 0x13d   :  { %v1068_v3 = vsel %vm985_vm12, %v9915_v30, %v7390_v54  ;;  %v7475_v0 = vmul.u32.u64.low %v1447_v9, %v1442_v17  ;;  %v7476_v55 = vmul.u32.u64.high %v1447_v9, %v1442_v17, %v7475_v0  ;;  %v5555_v28 = vadd.s32 4294967294, %v1363_v12 }
 0x13e   :  { %v1446_v16 = vsel %vm1432_vm13, %v1443_v58, %v1445_v26  ;;  %v1513_v59 = vadd.s32 1, %v5561_v10  ;;  %v7482_v5 = vand.u32 3, %v7411_v27  ;;  %v1171_v54 = vxor.u32 2147483648, %v7428_v23 }
 0x13f   :  { %v7485_v30 = vmul.u32.u64.low %v1447_v9, %v1446_v16  ;;  %v7486_v38 = vmul.u32.u64.high %v1447_v9, %v1446_v16, %v7485_v30  ;;  %v1071_v63 = vsel %vm7356_vm3, %v6500_v61, %v1068_v3  ;;  %vm5556_vm12 = vcmp.lt.s32.totalorder %v5555_v28, 0 }
 0x140   :  { %vm1514_vm4 = vcmp.gt.s32.totalorder %v1513_v59, 0  ;;  %v1174_v32 = vsel %vm1089_vm1, %v1173_v45, %v7208_v47  ;;  %v1366_v56 = vsel %vm5556_vm12, 0, %v5555_v28  ;;  %v1454_v27 = vmul.u32 %v1447_v9, %v1438_v44 }
 0x141   :  { %v1457_v43 = vadd.s32 1, %v7476_v55  ;;  %v1275_v42 = vxor.u32 2147483648, %v1274_v34  ;;  %v1371_v17 = vsub.s32 4294967266, %v1366_v56  ;;  %v9636_v58 = vand.u32 2147483647, %v6798_v6 }
 0x142   :  { %v1515_v60 = vsel %vm1514_vm4, %v1513_v59, 0  ;;  %5846 = vcosq.f32 %v1071_v63  ;;  %v1172_v57 = vsel %vm1089_vm1, %v1171_v54, %v7428_v23  ;;  %vm1456_vm3 = vc.u32 %v7486_v38, %v7475_v0 }
 0x143   :  { %v1351_v47 = vadd.s32 %v7376_v62, %v7383_v31  ;;  %v1367_v9 = vsub.s32 32, %v1366_v56  ;;  %v1372_v3 = vadd.s32 127, %v1371_v17  ;;  %v1458_v45 = vsel %vm1456_vm3, %v1457_v43, %v7476_v55 }
 0x144   :  { %5848 = vsinq.f32 %v1071_v63  ;;  %v7508_v12 = vsel %vm7453_vm15, 0, %v1174_v32  ;;  %v9917_v26 = vand.u32 2147483647, %v6589_v20  ;;  %v1459_v23 = vadd.s32 %v1458_v45, %v1454_v27 }
 0x145   :  { %9916 = vst [vmem:[#allocation54_spill] sm:$0xff] %v7508_v12  ;;  %v1517_v44 = vand.u32 31, %v1515_v60  ;;  %v1175_v62 = vsel %vm7453_vm15, %v6585_v18, %v1172_v57  ;;  %v1276_v31 = vsel %vm1193_vm2, %v1275_v42, %v1274_v34  ;;  %v1510_v55 = vand.u32 8388607, %v9636_v58 }
 0x146   :  { %vm7512_vm9 = vcmp.le.f32.partialorder %v9917_v26, 0.7853982  ;;  %v7523_v16 = vshrl.u32 %v1515_v60, 5  ;;  %v1460_v59 = vadd.s32 536870912, %v1459_v23  ;;  %v1368_v32 = vshll.u32 %v7435_v29, %v1366_v56 }
 0x147   :  { %v1518_v54 = vsub.s32 32, %v1517_v44  ;;  %v1520_v30 = vshll.u32 %v9786_v37, %v1517_v44  ;;  %v1523_v63 = vshll.u32 %v9834_v1, %v1517_v44  ;;  %v1369_v27 = vshrl.u32 %v1351_v47, %v1367_v9 }
 0x148   :  { %v1373_v43 = vshll.u32 %v1372_v3, 23  ;;  %v1529_v15 = vshll.u32 %v9832_v41, %v1517_v44  ;;  %v7529_v17 = vshrl.u32 %v1460_v59, 30  ;;  %v1526_v60 = vshll.u32 %v9835_v33, %v1517_v44 }
 0x149   :  { %v1521_v34 = vshrl.u32 %v9834_v1, %v1518_v54  ;;  %v1524_v42 = vshrl.u32 %v9835_v33, %v1518_v54  ;;  %v1511_v57 = vor.u32 8388608, %v1510_v55  ;;  %v1527_v45 = vshrl.u32 %v9832_v41, %v1518_v54 }
 0x14a   :  { %v1530_v26 = vshrl.u32 %v9795_v2, %v1518_v54  ;;  %v1532_v58 = vshll.u32 %v9795_v2, %v1517_v44  ;;  %v1462_v29 = vshll.u32 %v7529_v17, 30  ;;  %vm1535_vm14 = vcmp.lt.s32.totalorder %v7523_v16, 1 }
 0x14b   :  { %v1522_v56 = vor.u32 %v1521_v34, %v1520_v30  ;;  %v1525_v47 = vor.u32 %v1524_v42, %v1523_v63  ;;  %vm975_vm11 = vcmp.eq.s32.totalorder %v7316_v39, 0  ;;  %vm978_vm1 = vcmp.eq.s32.totalorder %v7316_v39, 2 }
 0x14c   :  { %v1370_v9 = vor.u32 %v1369_v27, %v1368_v32  ;;  %v1374_v3 = vor.u32 4788187, %v1373_v43  ;;  %v1531_v59 = vor.u32 %v1530_v26, %v1529_v15  ;;  %v1533_v55 = vshrl.u32 %v9796_v22, %v1518_v54  ;;  %v7542_v24 = vpop.eup %5846 }
 0x14d   :  { %9920 = vst [vmem:[#allocation55_spill] sm:$0xff] %v7542_v24  ;;  %v7544_v10 = vsub.s32 %v1459_v23, %v1462_v29  ;;  %v1519_v44 = vshrl.u32 %v9786_v37, %v1518_v54  ;;  %v1528_v35 = vor.u32 %v1527_v45, %v1526_v60  ;;  %vm1538_vm13 = vcmp.lt.s32.totalorder %v7523_v16, 4 }
 0x14e   :  { %vm1079_vm15 = vcmp.eq.s32.totalorder %v7482_v5, 0  ;;  %vm1082_vm12 = vcmp.eq.s32.totalorder %v7482_v5, 2  ;;  %v1180_v30 = vadd.s32 3, %v7508_v12  ;;  %v1277_v63 = vsub.s32 4, %v7306_v48  ;;  %v7553_v27 = vpop.eup %5848 }
 0x14f   :  { %v1534_v32 = vor.u32 %v1533_v55, %v1532_v58  ;;  %vm1537_vm4 = vcmp.lt.s32.totalorder %v7523_v16, 3  ;;  %9921 = vst [vmem:[#allocation56_spill] sm:$0xff] %v7553_v27  ;;  %vm870_vm3 = vcmp.lt.s32.totalorder %v7313_v46, 2  ;;  %5850 = vcosq.f32 %v1175_v62 }
 0x150   :  { %vm1536_vm10 = vcmp.lt.s32.totalorder %v7523_v16, 2  ;;  %v1540_v23 = vsel %vm1538_vm13, %v1528_v35, 2102212464  ;;  %v1543_v54 = vsel %vm1535_vm14, %v1522_v56, %v1525_v47  ;;  %vm974_vm5 = vcmp.lt.s32.totalorder %v7316_v39, 2 }
 0x151   :  { %v7565_v58 = vsel %vm7512_vm9, %v6589_v20, %v1276_v31  ;;  %v1465_v43 = vsub.s32 0, %v7544_v10  ;;  %v1544_v15 = vsel %vm1538_vm13, %v1531_v59, 920167782  ;;  %v1551_v34 = vshll.u32 %v1511_v57, 8 }
 0x152   :  { %vm1078_vm8 = vcmp.lt.s32.totalorder %v7482_v5, 2  ;;  %v1375_v42 = vand.u32 2147483647, %v1374_v3  ;;  %v1377_v60 = vcvt.s32.f32 %v1370_v9  ;;  %v1539_v45 = vsel %vm1535_vm14, %v1519_v44, %v1522_v56 }
 0x153   :  { %v1545_v26 = vsel %vm1537_vm4, %v1528_v35, %v1544_v15  ;;  %v1541_v31 = vsel %vm1537_vm4, %v1525_v47, %v1540_v23  ;;  %v1547_v55 = vsel %vm1535_vm14, %v1525_v47, %v1528_v35  ;;  %v1548_v57 = vsel %vm1538_vm13, %v1534_v32, 1326507024 }
 0x154   :  { %v1546_v29 = vsel %vm1536_vm10, %v1543_v54, %v1545_v26  ;;  %v9646_v9 = vxor.u32 2147483648, %v7553_v27  ;;  %v9645_v3 = vxor.u32 2147483648, %v7542_v24  ;;  %5852 = vsinq.f32 %v1175_v62 }
 0x155   :  { %v1278_v56 = vsel %vm1193_vm2, %v1277_v63, %v7306_v48  ;;  %vm867_vm7 = vweird.f32 %v9887_v11  ;;  %vm971_vm6 = vweird.f32 %v6496_v13  ;;  %vm1075_vm0 = vweird.f32 %v6500_v61  ;;  %v9922_v63 = vld [vmem:[#allocation18_spill] sm:$0xff] }
 0x156   :  { %v5558_v35 = vmin.u32 %v1465_v43, %v7544_v10  ;;  %v1549_v47 = vsel %vm1537_vm4, %v1531_v59, %v1548_v57  ;;  %v7594_v44 = vmul.u32.u64.low %v1551_v34, %v1546_v29  ;;  %v7595_v32 = vmul.u32.u64.high %v1551_v34, %v1546_v29, %v7594_v44 }
 0x157   :  { %5854 = vcosq.f32 %v7565_v58  ;;  %v1542_v48 = vsel %vm1536_vm10, %v1539_v45, %v1541_v31  ;;  %v1550_v62 = vsel %vm1536_vm10, %v1547_v55, %v1549_v47  ;;  %v1610_v23 = vand.u32 2139095040, %v9922_v63 }
 0x158   :  { %v1378_v54 = vmul.f32 %v1377_v60, %v1375_v42  ;;  %v1381_v43 = vsub.s32 4, %v7423_v53  ;;  %v7605_v15 = vmul.u32.u64.low %v1551_v34, %v1550_v62  ;;  %v7606_v26 = vmul.u32.u64.high %v1551_v34, %v1550_v62, %v7605_v15 }
 0x159   :  { %v9923_v59 = vxor.u32 2147483648, %v7440_v7  ;;  %v9924_v45 = vxor.u32 2147483648, %v7438_v49  ;;  %v7618_v31 = vand.u32 3, %v1180_v30  ;;  %v1611_v42 = vshrl.u32 %v1610_v23, 23  ;;  %v7625_v62 = vpop.eup %5850 }
 0x15a   :  { %v7622_v60 = vsel %vm7512_vm9, 0, %v1278_v56  ;;  %v1467_v55 = vclz %v5558_v35  ;;  %v1558_v57 = vmul.u32 %v1551_v34, %v1542_v48  ;;  %v1561_v47 = vadd.s32 1, %v7595_v32  ;;  %9926 = vst [vmem:[#allocation58_spill] sm:$0xff] %v7625_v62 }
 0x15b   :  { %v977_v29 = vsel %vm975_vm11, %v7438_v49, %v9923_v59  ;;  %v980_v16 = vsel %vm978_vm1, %v9924_v45, %v7440_v7  ;;  %9925 = vst [vmem:[#allocation57_spill] sm:$0xff] %v7622_v60  ;;  %v1081_v15 = vsel %vm1079_vm15, %v7542_v24, %v9646_v9  ;;  %v1084_v28 = vsel %vm1082_vm12, %v9645_v3, %v7553_v27 }
 0x15c   :  { %vm1297_vm10 = vcmp.lt.s32.totalorder %v9898_v8, 0  ;;  %v5565_v30 = vadd.s32 4294967169, %v1611_v42  ;;  %v877_v34 = vsel %vm870_vm3, %v7466_v50, %v7408_v40  ;;  %v1379_v56 = vxor.u32 2147483648, %v1378_v54 }
 0x15d   :  { %v1382_v35 = vsel %vm1297_vm10, %v1381_v43, %v7423_v53  ;;  %vm1560_vm2 = vc.u32 %v7606_v26, %v7594_v44  ;;  %v981_v48 = vsel %vm974_vm5, %v977_v29, %v980_v16  ;;  %v1284_v23 = vadd.s32 3, %v7622_v60 }
 0x15e   :  { %v1562_v59 = vsel %vm1560_vm2, %v1561_v47, %v7595_v32  ;;  %v1617_v45 = vadd.s32 1, %v5565_v30  ;;  %v1085_v46 = vsel %vm1078_vm8, %v1081_v15, %v1084_v28  ;;  %v9927_v40 = vand.u32 2147483647, %v9898_v8  ;;  %v7659_v42 = vpop.eup %5852 }
 0x15f   :  { %v5559_v53 = vadd.s32 4294967294, %v1467_v55  ;;  %v1563_v43 = vadd.s32 %v1562_v59, %v1558_v57  ;;  %9930 = vst [vmem:[#allocation59_spill] sm:$0xff] %v7659_v42  ;;  %vm1186_vm5 = vcmp.eq.s32.totalorder %v7618_v31, 2  ;;  %v9644_v39 = vxor.u32 2147483648, %v7625_v62 }
 0x160   :  { %vm7655_vm9 = vcmp.le.f32.partialorder %v9927_v40, 0.7853982  ;;  %vm1618_vm14 = vcmp.gt.s32.totalorder %v1617_v45, 0  ;;  %v1380_v5 = vsel %vm1297_vm10, %v1379_v56, %v1378_v54  ;;  %v9647_v16 = vand.u32 2147483647, %v9922_v63 }
 0x161   :  { %v7665_v32 = vsel %vm7655_vm9, 0, %v1382_v35  ;;  %v1564_v29 = vadd.s32 536870912, %v1563_v43  ;;  %v1619_v47 = vsel %vm1618_vm14, %v1617_v45, 0  ;;  %v7670_v55 = vpop.eup %5854  ;;  %v7674_v57 = vsel %vm867_vm7, nan, %v877_v34 }
 0x162   :  { %9931 = vst [vmem:[#allocation60_spill] sm:$0xff] %v7665_v32  ;;  %9932 = vst [vmem:[#allocation61_spill] sm:$0xff] %v7670_v55  ;;  %v7678_v15 = vsel %vm971_vm6, nan, %v981_v48  ;;  %v7682_v28 = vsel %vm1075_vm0, nan, %v1085_v46  ;;  %v7684_v30 = vand.u32 3, %v1284_v23  ;;  %vm5560_vm8 = vcmp.lt.s32.totalorder %v5559_v53, 0 }
 0x163   :  { %v7687_v56 = vshrl.u32 %v1564_v29, 30  ;;  %v1621_v35 = vand.u32 31, %v1619_v47  ;;  %v7694_v34 = vsel %vm1186_vm5, %v9644_v39, %v7659_v42  ;;  %5856 = vsinq.f32 %v7565_v58 }
 0x164   :  { %v1383_v48 = vsel %vm7655_vm9, %v9898_v8, %v1380_v5  ;;  %v7701_v23 = vadd.s32 3, %v7665_v32  ;;  %v1614_v46 = vand.u32 8388607, %v9647_v16  ;;  %v1455_v29 = vadd.s32 %v7475_v0, %v7486_v38 }
 0x165   :  { %v1566_v45 = vshll.u32 %v7687_v56, 30  ;;  %v1622_v40 = vsub.s32 32, %v1621_v35  ;;  %v7709_v39 = vsel %vm5560_vm8, 0, %v5559_v53  ;;  %v1485_v58 = vsub.s32 4, %v7529_v17 }
 0x166   :  { %v1714_v50 = vand.u32 2139095040, %v7075_v25  ;;  %5858 = vcosq.f32 %v1383_v48  ;;  %v1624_v5 = vshll.u32 %v9786_v37, %v1621_v35  ;;  %v1627_v9 = vshll.u32 %v9834_v1, %v1621_v35 }
 0x167   :  { %v1625_v3 = vshrl.u32 %v9834_v1, %v1622_v40  ;;  %v1620_v59 = vshrl.u32 %v1619_v47, 5  ;;  %v1628_v16 = vshrl.u32 %v9835_v33, %v1622_v40  ;;  %v1630_v54 = vshll.u32 %v9835_v33, %v1621_v35 }
 0x168   :  { %v1631_v0 = vshrl.u32 %v9832_v41, %v1622_v40  ;;  %vm1401_vm11 = vcmp.lt.s32.totalorder %v6754_v36, 0  ;;  %v1475_v38 = vsub.s32 4294967266, %v7709_v39  ;;  %v7721_v53 = vsub.s32 %v1563_v43, %v1566_v45 }
 0x169   :  { %v1615_v61 = vor.u32 8388608, %v1614_v46  ;;  %v1633_v24 = vshll.u32 %v9832_v41, %v1621_v35  ;;  %vm1183_vm1 = vcmp.eq.s32.totalorder %v7618_v31, 0  ;;  %vm1287_vm13 = vcmp.eq.s32.totalorder %v7684_v30, 0 }
 0x16a   :  { %vm1290_vm15 = vcmp.eq.s32.totalorder %v7684_v30, 2  ;;  %5860 = vsinq.f32 %v1383_v48  ;;  %v1471_v47 = vsub.s32 32, %v7709_v39  ;;  %v1634_v27 = vshrl.u32 %v9795_v2, %v1622_v40 }
 0x16b   :  { %v1715_v13 = vshrl.u32 %v1714_v50, 23  ;;  %v1623_v32 = vshrl.u32 %v9786_v37, %v1622_v40  ;;  %v1626_v60 = vor.u32 %v1625_v3, %v1624_v5  ;;  %v1629_v43 = vor.u32 %v1628_v16, %v1627_v9 }
 0x16c   :  { %v1636_v45 = vshll.u32 %v9795_v2, %v1621_v35  ;;  %v1632_v46 = vor.u32 %v1631_v0, %v1630_v54  ;;  %v1635_v12 = vor.u32 %v1634_v27, %v1633_v24  ;;  %v1637_v49 = vshrl.u32 %v9796_v22, %v1622_v40 }
 0x16d   :  { %vm1639_vm12 = vcmp.lt.s32.totalorder %v1620_v59, 1  ;;  %vm1182_vm4 = vcmp.lt.s32.totalorder %v7618_v31, 2  ;;  %v9933_v48 = vand.u32 2147483647, %v6754_v36  ;;  %v1476_v50 = vadd.s32 127, %v1475_v38  ;;  %v7740_v3 = vpop.eup %5856 }
 0x16e   :  { %v1569_v11 = vsub.s32 0, %v7721_v53  ;;  %vm1641_vm10 = vcmp.lt.s32.totalorder %v1620_v59, 3  ;;  %v1655_v9 = vshll.u32 %v1615_v61, 8  ;;  %9936 = vst [vmem:[#allocation62_spill] sm:$0xff] %v7740_v3  ;;  %vm1286_vm2 = vcmp.lt.s32.totalorder %v7684_v30, 2 }
 0x16f   :  { %vm7735_vm3 = vcmp.le.f32.partialorder %v9933_v48, 0.7853982  ;;  %v1638_v24 = vor.u32 %v1637_v49, %v1636_v45  ;;  %vm1640_vm9 = vcmp.lt.s32.totalorder %v1620_v59, 2  ;;  %vm1642_vm5 = vcmp.lt.s32.totalorder %v1620_v59, 4 }
 0x170   :  { %v5569_v27 = vadd.s32 4294967169, %v1715_v13  ;;  %v1643_v16 = vsel %vm1639_vm12, %v1623_v32, %v1626_v60  ;;  %v1644_v54 = vsel %vm1642_vm5, %v1632_v46, 2102212464  ;;  %v1647_v35 = vsel %vm1639_vm12, %v1626_v60, %v1629_v43  ;;  %v7748_v48 = vpop.eup %5858 }
 0x171   :  { %v1648_v40 = vsel %vm1642_vm5, %v1635_v12, 920167782  ;;  %v1645_v5 = vsel %vm1641_vm10, %v1629_v43, %v1644_v54  ;;  %v1651_v61 = vsel %vm1639_vm12, %v1629_v43, %v1632_v46  ;;  %v1652_v38 = vsel %vm1642_vm5, %v1638_v24, 1326507024  ;;  %9937 = vst [vmem:[#allocation63_spill] sm:$0xff] %v7748_v48 }
 0x172   :  { %v1649_v0 = vsel %vm1641_vm10, %v1632_v46, %v1648_v40  ;;  %v9665_v49 = vxor.u32 2147483648, %v7740_v3  ;;  %v5562_v45 = vmin.u32 %v1569_v11, %v7721_v53  ;;  %v1653_v32 = vsel %vm1641_vm10, %v1635_v12, %v1652_v38 }
 0x173   :  { %v1650_v13 = vsel %vm1640_vm9, %v1647_v35, %v1649_v0  ;;  %v1486_v60 = vsel %vm1401_vm11, %v1485_v58, %v7529_v17  ;;  %v1654_v54 = vsel %vm1640_vm9, %v1651_v61, %v1653_v32  ;;  %v1472_v43 = vshll.u32 %v7544_v10, %v7709_v39 }
 0x174   :  { %v7758_v40 = vmul.u32.u64.low %v1655_v9, %v1650_v13  ;;  %v7759_v4 = vmul.u32.u64.high %v1655_v9, %v1650_v13, %v7758_v40  ;;  %v1473_v46 = vshrl.u32 %v1455_v29, %v1471_v47  ;;  %v1477_v24 = vshll.u32 %v1476_v50, 23  ;;  %v7765_v35 = vpop.eup %5860 }
 0x175   :  { %v1646_v11 = vsel %vm1640_vm9, %v1643_v16, %v1645_v5  ;;  %9938 = vst [vmem:[#allocation64_spill] sm:$0xff] %v7765_v35  ;;  %v7768_v12 = vand.u32 3, %v7701_v23  ;;  %v7770_v0 = vmul.u32.u64.low %v1655_v9, %v1654_v54  ;;  %v7771_v17 = vmul.u32.u64.high %v1655_v9, %v1654_v54, %v7770_v0 }
 0x176   :  { %v1721_v58 = vadd.s32 1, %v5569_v27  ;;  %v9939_v61 = vxor.u32 2147483648, %v7659_v42  ;;  %v1289_v10 = vsel %vm1287_vm13, %v7670_v55, %v9665_v49  ;;  %v9940_v39 = vxor.u32 2147483648, %v7670_v55 }
 0x177   :  { %v1571_v59 = vclz %v5562_v45  ;;  %v7790_v29 = vsel %vm7735_vm3, 0, %v1486_v60  ;;  %v1662_v47 = vmul.u32 %v1655_v9, %v1646_v11  ;;  %v1665_v50 = vadd.s32 1, %v7759_v4 }
 0x178   :  { %v1185_v38 = vsel %vm1183_vm1, %v7625_v62, %v9939_v61  ;;  %v1292_v23 = vsel %vm1290_vm15, %v9940_v39, %v7740_v3  ;;  %9941 = vst [vmem:[#allocation65_spill] sm:$0xff] %v7790_v29  ;;  %vm1722_vm14 = vcmp.gt.s32.totalorder %v1721_v58, 0  ;;  %v1474_v27 = vor.u32 %v1473_v46, %v1472_v43 }
 0x179   :  { %v1478_v16 = vor.u32 4788187, %v1477_v24  ;;  %v9666_v5 = vand.u32 2147483647, %v7075_v25  ;;  %v1723_v13 = vsel %vm1722_vm14, %v1721_v58, 0  ;;  %v7797_v32 = vsel %vm1182_vm4, %v1185_v38, %v7694_v34 }
 0x17a   :  { %vm1391_vm8 = vcmp.eq.s32.totalorder %v7768_v12, 0  ;;  %v9664_v45 = vxor.u32 2147483648, %v7748_v48  ;;  %vm1664_vm1 = vc.u32 %v7771_v17, %v7758_v40  ;;  %v7805_v9 = vsel %vm1286_vm2, %v1289_v10, %v1292_v23 }
 0x17b   :  { %vm1394_vm13 = vcmp.eq.s32.totalorder %v7768_v12, 2  ;;  %v5563_v60 = vadd.s32 4294967294, %v1571_v59  ;;  %v1666_v54 = vsel %vm1664_vm1, %v1665_v50, %v7759_v4  ;;  %v7810_v31 = vadd.s32 3, %v7790_v29 }
 0x17c   :  { %v7814_v34 = vadd.s32 %v7594_v44, %v7606_v26  ;;  %v1667_v43 = vadd.s32 %v1666_v54, %v1662_v47  ;;  %v1725_v46 = vand.u32 31, %v1723_v13  ;;  %v1479_v11 = vand.u32 2147483647, %v1478_v16 }
 0x17d   :  { %v1481_v30 = vcvt.s32.f32 %v1474_v27  ;;  %v1718_v0 = vand.u32 8388607, %v9666_v5  ;;  %v7822_v4 = vsel %vm1394_vm13, %v9664_v45, %v7765_v35  ;;  %v7824_v61 = vshrl.u32 %v1723_v13, 5 }
 0x17e   :  { %v1668_v58 = vadd.s32 536870912, %v1667_v43  ;;  %v1726_v38 = vsub.s32 32, %v1725_v46  ;;  %vm5564_vm15 = vcmp.lt.s32.totalorder %v5563_v60, 0  ;;  %v1728_v44 = vshll.u32 %v9786_v37, %v1725_v46 }
 0x17f   :  { %v1731_v26 = vshll.u32 %v9834_v1, %v1725_v46  ;;  %v1737_v10 = vshll.u32 %v9832_v41, %v1725_v46  ;;  %v1734_v47 = vshll.u32 %v9835_v33, %v1725_v46  ;;  %v1482_v50 = vmul.f32 %v1481_v30, %v1479_v11 }
 0x180   :  { %v7829_v39 = vshrl.u32 %v1668_v58, 30  ;;  %v1729_v23 = vshrl.u32 %v9834_v1, %v1726_v38  ;;  %v1732_v59 = vshrl.u32 %v9835_v33, %v1726_v38  ;;  %v1735_v27 = vshrl.u32 %v9832_v41, %v1726_v38 }
 0x181   :  { %v1738_v16 = vshrl.u32 %v9795_v2, %v1726_v38  ;;  %v1740_v13 = vshll.u32 %v9795_v2, %v1725_v46  ;;  %v7837_v54 = vsel %vm5564_vm15, 0, %v5563_v60  ;;  %v1719_v49 = vor.u32 8388608, %v1718_v0 }
 0x182   :  { %v1670_v45 = vshll.u32 %v7829_v39, 30  ;;  %vm1743_vm12 = vcmp.lt.s32.totalorder %v7824_v61, 1  ;;  %v1730_v58 = vor.u32 %v1729_v23, %v1728_v44  ;;  %v1733_v5 = vor.u32 %v1732_v59, %v1731_v26 }
 0x183   :  { %v1739_v24 = vor.u32 %v1738_v16, %v1737_v10  ;;  %v1741_v29 = vshrl.u32 %v9796_v22, %v1726_v38  ;;  %v1727_v11 = vshrl.u32 %v9786_v37, %v1726_v38  ;;  %v1736_v30 = vor.u32 %v1735_v27, %v1734_v47 }
 0x184   :  { %v7842_v55 = vsub.s32 %v1667_v43, %v1670_v45  ;;  %vm1746_vm4 = vcmp.lt.s32.totalorder %v7824_v61, 4  ;;  %vm1390_vm10 = vcmp.lt.s32.totalorder %v7768_v12, 2  ;;  %v9942_v60 = vxor.u32 2147483648, %v7765_v35 }
 0x185   :  { %v1483_v0 = vxor.u32 2147483648, %v1482_v50  ;;  %v1742_v44 = vor.u32 %v1741_v29, %v1740_v13  ;;  %vm1745_vm2 = vcmp.lt.s32.totalorder %v7824_v61, 3  ;;  %v1579_v45 = vsub.s32 4294967266, %v7837_v54 }
 0x186   :  { %v1393_v46 = vsel %vm1391_vm8, %v7748_v48, %v9942_v60  ;;  %v1673_v43 = vsub.s32 0, %v7842_v55  ;;  %vm1744_vm9 = vcmp.lt.s32.totalorder %v7824_v61, 2  ;;  %v1748_v38 = vsel %vm1746_vm4, %v1736_v30, 2102212464 }
 0x187   :  { %v1751_v26 = vsel %vm1743_vm12, %v1730_v58, %v1733_v5  ;;  %v1752_v10 = vsel %vm1746_vm4, %v1739_v24, 920167782  ;;  %v1759_v23 = vshll.u32 %v1719_v49, 8  ;;  %v1818_v29 = vand.u32 2139095040, %v7083_v51 }
 0x188   :  { %vm1505_vm5 = vcmp.lt.s32.totalorder %v6798_v6, 0  ;;  %v1575_v59 = vsub.s32 32, %v7837_v54  ;;  %v5566_v47 = vmin.u32 %v1673_v43, %v7842_v55  ;;  %v1747_v27 = vsel %vm1743_vm12, %v1727_v11, %v1730_v58 }
 0x189   :  { %v1753_v16 = vsel %vm1745_vm2, %v1736_v30, %v1752_v10  ;;  %vm9737_vm14 = vweird.f32 %v6585_v18  ;;  %vm9736_vm8 = vweird.f32 %v6589_v20  ;;  %v1749_v49 = vsel %vm1745_vm2, %v1733_v5, %v1748_v38 }
 0x18a   :  { %v1754_v13 = vsel %vm1744_vm9, %v1751_v26, %v1753_v16  ;;  %v1755_v60 = vsel %vm1743_vm12, %v1733_v5, %v1736_v30  ;;  %v1756_v43 = vsel %vm1746_vm4, %v1742_v44, 1326507024  ;;  %vm9679_vm1 = vweird.f32 %v9898_v8 }
 0x18b   :  { %v1484_v58 = vsel %vm1401_vm11, %v1483_v0, %v1482_v50  ;;  %v1580_v11 = vadd.s32 127, %v1579_v45  ;;  %v1589_v10 = vsub.s32 4, %v7687_v56  ;;  %v1675_v48 = vclz %v5566_v47 }
 0x18c   :  { %v1757_v38 = vsel %vm1745_vm2, %v1739_v24, %v1756_v43  ;;  %v7886_v35 = vmul.u32.u64.low %v1759_v23, %v1754_v13  ;;  %v7887_v26 = vmul.u32.u64.high %v1759_v23, %v1754_v13, %v7886_v35  ;;  %v1819_v5 = vshrl.u32 %v1818_v29, 23 }
 0x18d   :  { %v1576_v30 = vshll.u32 %v7721_v53, %v7837_v54  ;;  %v5567_v44 = vadd.s32 4294967294, %v1675_v48  ;;  %v1750_v16 = vsel %vm1744_vm9, %v1747_v27, %v1749_v49  ;;  %v1758_v50 = vsel %vm1744_vm9, %v1755_v60, %v1757_v38 }
 0x18e   :  { %v9943_v0 = vand.u32 2147483647, %v6798_v6  ;;  %v1577_v24 = vshrl.u32 %v7814_v34, %v1575_v59  ;;  %v7903_v47 = vmul.u32.u64.low %v1759_v23, %v1758_v50  ;;  %v7904_v29 = vmul.u32.u64.high %v1759_v23, %v1758_v50, %v7903_v47 }
 0x18f   :  { %v5573_v13 = vadd.s32 4294967169, %v1819_v5  ;;  %v1581_v53 = vshll.u32 %v1580_v11, 23  ;;  %v1663_v48 = vadd.s32 %v7758_v40, %v7771_v17  ;;  %vm5568_vm13 = vcmp.lt.s32.totalorder %v5567_v44, 0 }
 0x190   :  { %vm7898_vm11 = vcmp.le.f32.partialorder %v9943_v0, 0.7853982  ;;  %v9674_v61 = vand.u32 2147483647, %v7083_v51  ;;  %v1678_v54 = vsel %vm5568_vm13, 0, %v5567_v44  ;;  %v1766_v27 = vmul.u32 %v1759_v23, %v1750_v16 }
 0x191   :  { %v1769_v49 = vadd.s32 1, %v7887_v26  ;;  %v1825_v60 = vadd.s32 1, %v5573_v13  ;;  %v1397_v34 = vsel %vm1390_vm10, %v1393_v46, %v7822_v4  ;;  %v1679_v59 = vsub.s32 32, %v1678_v54 }
 0x192   :  { %v1680_v43 = vshll.u32 %v7842_v55, %v1678_v54  ;;  %v1683_v38 = vsub.s32 4294967266, %v1678_v54  ;;  %v1487_v40 = vsel %vm7735_vm3, %v6754_v36, %v1484_v58  ;;  %v1590_v17 = vsel %vm1505_vm5, %v1589_v10, %v7687_v56 }
 0x193   :  { %vm1768_vm15 = vc.u32 %v7904_v29, %v7886_v35  ;;  %vm1826_vm12 = vcmp.gt.s32.totalorder %v1825_v60, 0  ;;  %v1578_v23 = vor.u32 %v1577_v24, %v1576_v30  ;;  %v1681_v11 = vshrl.u32 %v1663_v48, %v1679_v59 }
 0x194   :  { %v1684_v12 = vadd.s32 127, %v1683_v38  ;;  %v1770_v4 = vsel %vm1768_vm15, %v1769_v49, %v7887_v26  ;;  %v1582_v46 = vor.u32 4788187, %v1581_v53  ;;  %v1822_v5 = vand.u32 8388607, %v9674_v61 }
 0x195   :  { %v1771_v55 = vadd.s32 %v1770_v4, %v1766_v27  ;;  %v1827_v7 = vsel %vm1826_vm12, %v1825_v60, 0  ;;  %v7928_v58 = vsel %vm9737_vm14, nan, %v7797_v32  ;;  %v7933_v56 = vsel %vm9736_vm8, nan, %v7805_v9 }
 0x196   :  { %v1682_v10 = vor.u32 %v1681_v11, %v1680_v43  ;;  %v1685_v30 = vshll.u32 %v1684_v12, 23  ;;  %v7937_v26 = vsel %vm9679_vm1, nan, %v1397_v34  ;;  %v7940_v44 = vand.u32 3, %v7810_v31 }
 0x197   :  { %v1772_v16 = vadd.s32 536870912, %v1771_v55  ;;  %v1829_v50 = vand.u32 31, %v1827_v7  ;;  %5862 = vcosq.f32 %v1487_v40  ;;  %v1585_v0 = vcvt.s32.f32 %v1578_v23 }
 0x198   :  { %v7944_v32 = vsel %vm7898_vm11, 0, %v1590_v17  ;;  %v1686_v24 = vor.u32 4788187, %v1685_v30  ;;  %v1583_v9 = vand.u32 2147483647, %v1582_v46  ;;  %v1823_v13 = vor.u32 8388608, %v1822_v5 }
 0x199   :  { %9946 = vst [vmem:[#allocation66_spill] sm:$0xff] %v7944_v32  ;;  %v7946_v47 = vshrl.u32 %v1772_v16, 30  ;;  %v1830_v53 = vsub.s32 32, %v1829_v50  ;;  %v1689_v48 = vcvt.s32.f32 %v1682_v10  ;;  %v1828_v54 = vshrl.u32 %v1827_v7, 5  ;;  %v9947_v10 = vld [vmem:[#allocation20_spill] sm:$0xff] }
 0x19a   :  { %v1832_v27 = vshll.u32 %v9786_v37, %v1829_v50  ;;  %v1835_v31 = vshll.u32 %v9834_v1, %v1829_v50  ;;  %v1838_v34 = vshll.u32 %v9835_v33, %v1829_v50  ;;  %v1841_v59 = vshll.u32 %v9832_v41, %v1829_v50 }
 0x19b   :  { %v1774_v49 = vshll.u32 %v7946_v47, 30  ;;  %v1833_v60 = vshrl.u32 %v9834_v1, %v1830_v53  ;;  %v1687_v43 = vand.u32 2147483647, %v1686_v24  ;;  %v1836_v38 = vshrl.u32 %v9835_v33, %v1830_v53 }
 0x19c   :  { %v1839_v17 = vshrl.u32 %v9832_v41, %v1830_v53  ;;  %v1842_v23 = vshrl.u32 %v9795_v2, %v1830_v53  ;;  %5864 = vsinq.f32 %v1487_v40  ;;  %v1844_v12 = vshll.u32 %v9795_v2, %v1829_v50 }
 0x19d   :  { %v7957_v11 = vsub.s32 %v1771_v55, %v1774_v49  ;;  %v1845_v4 = vshrl.u32 %v9796_v22, %v1830_v53  ;;  %v1586_v46 = vmul.f32 %v1585_v0, %v1583_v9  ;;  %v1834_v5 = vor.u32 %v1833_v60, %v1832_v27 }
 0x19e   :  { %v1837_v7 = vor.u32 %v1836_v38, %v1835_v31  ;;  %v1922_v30 = vand.u32 2139095040, %v9947_v10  ;;  %vm1609_vm3 = vcmp.lt.s32.totalorder %v9922_v63, 0  ;;  %v1840_v24 = vor.u32 %v1839_v17, %v1838_v34 }
 0x19f   :  { %v1777_v16 = vsub.s32 0, %v7957_v11  ;;  %v1843_v61 = vor.u32 %v1842_v23, %v1841_v59  ;;  %vm1847_vm4 = vcmp.lt.s32.totalorder %v1828_v54, 1  ;;  %v1690_v8 = vmul.f32 %v1689_v48, %v1687_v43 }
 0x1a0   :  { %v1831_v40 = vshrl.u32 %v9786_v37, %v1830_v53  ;;  %vm1850_vm10 = vcmp.lt.s32.totalorder %v1828_v54, 4  ;;  %v1863_v55 = vshll.u32 %v1823_v13, 8  ;;  %v1846_v49 = vor.u32 %v1845_v4, %v1844_v12 }
 0x1a1   :  { %v5570_v50 = vmin.u32 %v1777_v16, %v7957_v11  ;;  %vm1849_vm2 = vcmp.lt.s32.totalorder %v1828_v54, 3  ;;  %v1852_v0 = vsel %vm1850_vm10, %v1840_v24, 2102212464  ;;  %v7967_v9 = vpop.eup %5862  ;;  %v9949_v27 = vand.u32 2147483647, %v9922_v63 }
 0x1a2   :  { %9948 = vst [vmem:[#allocation67_spill] sm:$0xff] %v7967_v9  ;;  %vm1848_vm13 = vcmp.lt.s32.totalorder %v1828_v54, 2  ;;  %v1855_v48 = vsel %vm1847_vm4, %v1834_v5, %v1837_v7  ;;  %v1856_v53 = vsel %vm1850_vm10, %v1843_v61, 920167782  ;;  %v1923_v13 = vshrl.u32 %v1922_v30, 23 }
 0x1a3   :  { %vm7971_vm9 = vcmp.le.f32.partialorder %v9949_v27, 0.7853982  ;;  %vm1498_vm15 = vcmp.eq.s32.totalorder %v7940_v44, 2  ;;  %v1587_v60 = vxor.u32 2147483648, %v1586_v46  ;;  %v1596_v34 = vadd.s32 3, %v7944_v32 }
 0x1a4   :  { %v1693_v59 = vsub.s32 4, %v7829_v39  ;;  %v1779_v43 = vclz %v5570_v50  ;;  %vm1495_vm12 = vcmp.eq.s32.totalorder %v7940_v44, 0  ;;  %v1851_v38 = vsel %vm1847_vm4, %v1831_v40, %v1834_v5 }
 0x1a5   :  { %v1853_v17 = vsel %vm1849_vm2, %v1837_v7, %v1852_v0  ;;  %v1857_v23 = vsel %vm1849_vm2, %v1840_v24, %v1856_v53  ;;  %v1859_v12 = vsel %vm1847_vm4, %v1837_v7, %v1840_v24  ;;  %v1691_v4 = vxor.u32 2147483648, %v1690_v8 }
 0x1a6   :  { %v5571_v30 = vadd.s32 4294967294, %v1779_v43  ;;  %v1858_v16 = vsel %vm1848_vm13, %v1855_v48, %v1857_v23  ;;  %v1860_v27 = vsel %vm1850_vm10, %v1846_v49, 1326507024  ;;  %v5577_v18 = vadd.s32 4294967169, %v1923_v13  ;;  %v7992_v5 = vpop.eup %5864 }
 0x1a7   :  { %v1861_v32 = vsel %vm1849_vm2, %v1843_v61, %v1860_v27  ;;  %v7988_v20 = vmul.u32.u64.low %v1863_v55, %v1858_v16  ;;  %v7989_v50 = vmul.u32.u64.high %v1863_v55, %v1858_v16, %v7988_v20  ;;  %9952 = vst [vmem:[#allocation68_spill] sm:$0xff] %v7992_v5  ;;  %v1588_v40 = vsel %vm1505_vm5, %v1587_v60, %v1586_v46 }
 0x1a8   :  { %vm5572_vm1 = vcmp.lt.s32.totalorder %v5571_v30, 0  ;;  %v1854_v7 = vsel %vm1848_vm13, %v1851_v38, %v1853_v17  ;;  %v1862_v24 = vsel %vm1848_vm13, %v1859_v12, %v1861_v32  ;;  %v1929_v61 = vadd.s32 1, %v5577_v18 }
 0x1a9   :  { %v1782_v0 = vsel %vm5572_vm1, 0, %v5571_v30  ;;  %v7998_v48 = vmul.u32.u64.low %v1863_v55, %v1862_v24  ;;  %v7999_v49 = vmul.u32.u64.high %v1863_v55, %v1862_v24, %v7998_v48  ;;  %v9680_v53 = vxor.u32 2147483648, %v7967_v9 }
 0x1aa   :  { %v8002_v43 = vand.u32 3, %v1596_v34  ;;  %v1694_v13 = vsel %vm1609_vm3, %v1693_v59, %v7829_v39  ;;  %v1787_v23 = vsub.s32 4294967266, %v1782_v0  ;;  %v1692_v46 = vsel %vm1609_vm3, %v1691_v4, %v1690_v8 }
 0x1ab   :  { %v1870_v60 = vmul.u32 %v1863_v55, %v1854_v7  ;;  %v1873_v32 = vadd.s32 1, %v7989_v50  ;;  %vm1930_vm5 = vcmp.gt.s32.totalorder %v1929_v61, 0  ;;  %v9681_v54 = vxor.u32 2147483648, %v7992_v5 }
 0x1ac   :  { %v1591_v18 = vsel %vm7898_vm11, %v6798_v6, %v1588_v40  ;;  %v9682_v34 = vand.u32 2147483647, %v9947_v10  ;;  %v1931_v38 = vsel %vm1930_vm5, %v1929_v61, 0  ;;  %v8017_v39 = vsel %vm7971_vm9, 0, %v1694_v13 }
 0x1ad   :  { %9953 = vst [vmem:[#allocation69_spill] sm:$0xff] %v8017_v39  ;;  %v1788_v59 = vadd.s32 127, %v1787_v23  ;;  %vm1872_vm1 = vc.u32 %v7999_v49, %v7988_v20  ;;  %v1933_v8 = vand.u32 31, %v1931_v38  ;;  %v1695_v55 = vsel %vm7971_vm9, %v9922_v63, %v1692_v46 }
 0x1ae   :  { %v1767_v45 = vadd.s32 %v7886_v35, %v7904_v29  ;;  %v1783_v17 = vsub.s32 32, %v1782_v0  ;;  %v1874_v12 = vsel %vm1872_vm1, %v1873_v32, %v7989_v50  ;;  %v8032_v4 = vsel %vm1498_vm15, %v9680_v53, %v7992_v5 }
 0x1af   :  { %5866 = vcosq.f32 %v1591_v18  ;;  %v1875_v30 = vadd.s32 %v1874_v12, %v1870_v60  ;;  %v1934_v16 = vsub.s32 32, %v1933_v8  ;;  %v8039_v31 = vsel %vm1495_vm12, %v7967_v9, %v9681_v54 }
 0x1b0   :  { %5868 = vsinq.f32 %v1591_v18  ;;  %v1700_v35 = vadd.s32 3, %v8017_v39  ;;  %v1926_v29 = vand.u32 8388607, %v9682_v34  ;;  %v1789_v27 = vshll.u32 %v1788_v59, 23 }
 0x1b1   :  { %5870 = vcosq.f32 %v1695_v55  ;;  %v1797_v50 = vsub.s32 4, %v7946_v47  ;;  %v1876_v40 = vadd.s32 536870912, %v1875_v30  ;;  %v1784_v7 = vshll.u32 %v7957_v11, %v1782_v0 }
 0x1b2   :  { %v1785_v24 = vshrl.u32 %v1767_v45, %v1783_v17  ;;  %v1932_v48 = vshrl.u32 %v1931_v38, 5  ;;  %v1936_v61 = vshll.u32 %v9786_v37, %v1933_v8  ;;  %v1937_v23 = vshrl.u32 %v9834_v1, %v1934_v16 }
 0x1b3   :  { %v8047_v13 = vshrl.u32 %v1876_v40, 30  ;;  %v1939_v46 = vshll.u32 %v9834_v1, %v1933_v8  ;;  %v1940_v60 = vshrl.u32 %v9835_v33, %v1934_v16  ;;  %vm1713_vm11 = vcmp.lt.s32.totalorder %v7075_v25, 0 }
 0x1b4   :  { %v1942_v32 = vshll.u32 %v9835_v33, %v1933_v8  ;;  %v1943_v18 = vshrl.u32 %v9832_v41, %v1934_v16  ;;  %v1945_v11 = vshll.u32 %v9832_v41, %v1933_v8  ;;  %v1946_v0 = vshrl.u32 %v9795_v2, %v1934_v16 }
 0x1b5   :  { %v1790_v38 = vor.u32 4788187, %v1789_v27  ;;  %v1878_v59 = vshll.u32 %v8047_v13, 30  ;;  %v1927_v45 = vor.u32 8388608, %v1926_v29  ;;  %v1948_v17 = vshll.u32 %v9795_v2, %v1933_v8 }
 0x1b6   :  { %vm1494_vm3 = vcmp.lt.s32.totalorder %v7940_v44, 2  ;;  %5872 = vsinq.f32 %v1695_v55  ;;  %v1786_v12 = vor.u32 %v1785_v24, %v1784_v7  ;;  %v1947_v40 = vor.u32 %v1946_v0, %v1945_v11 }
 0x1b7   :  { %v1949_v53 = vshrl.u32 %v9796_v22, %v1934_v16  ;;  %v8061_v54 = vsub.s32 %v1875_v30, %v1878_v59  ;;  %v1935_v34 = vshrl.u32 %v9786_v37, %v1934_v16  ;;  %v1938_v39 = vor.u32 %v1937_v23, %v1936_v61 }
 0x1b8   :  { %v1941_v9 = vor.u32 %v1940_v60, %v1939_v46  ;;  %vm1602_vm4 = vcmp.eq.s32.totalorder %v8002_v43, 2  ;;  %v9954_v27 = vand.u32 2147483647, %v7075_v25  ;;  %v1944_v8 = vor.u32 %v1943_v18, %v1942_v32 }
 0x1b9   :  { %v1950_v55 = vor.u32 %v1949_v53, %v1948_v17  ;;  %vm1951_vm2 = vcmp.lt.s32.totalorder %v1932_v48, 1  ;;  %vm1954_vm9 = vcmp.lt.s32.totalorder %v1932_v48, 4  ;;  %v8071_v7 = vpop.eup %5866  ;;  %vm1599_vm13 = vcmp.eq.s32.totalorder %v8002_v43, 0  ;;  %v9960_v17 = vld [vmem:[#allocation21_spill] sm:$0xff] }
 0x1ba   :  { %vm8067_vm10 = vcmp.le.f32.partialorder %v9954_v27, 0.7853982  ;;  %9957 = vst [vmem:[#allocation70_spill] sm:$0xff] %v8071_v7  ;;  %v1791_v30 = vand.u32 2147483647, %v1790_v38  ;;  %v1881_v16 = vsub.s32 0, %v8061_v54  ;;  %v8075_v61 = vpop.eup %5868  ;;  %v1793_v23 = vcvt.s32.f32 %v1786_v12 }
 0x1bb   :  { %vm1953_vm15 = vcmp.lt.s32.totalorder %v1932_v48, 3  ;;  %v1967_v24 = vshll.u32 %v1927_v45, 8  ;;  %9958 = vst [vmem:[#allocation71_spill] sm:$0xff] %v8075_v61  ;;  %vm1952_vm12 = vcmp.lt.s32.totalorder %v1932_v48, 2  ;;  %v1956_v46 = vsel %vm1954_vm9, %v1944_v8, 2102212464  ;;  %v8079_v53 = vpop.eup %5870 }
 0x1bc   :  { %v1960_v60 = vsel %vm1954_vm9, %v1947_v40, 920167782  ;;  %9959 = vst [vmem:[#allocation72_spill] sm:$0xff] %v8079_v53  ;;  %v5574_v32 = vmin.u32 %v1881_v16, %v8061_v54  ;;  %v1955_v18 = vsel %vm1951_vm2, %v1935_v34, %v1938_v39  ;;  %v1957_v11 = vsel %vm1953_vm15, %v1941_v9, %v1956_v46 }
 0x1bd   :  { %v1959_v0 = vsel %vm1951_vm2, %v1938_v39, %v1941_v9  ;;  %v1961_v38 = vsel %vm1953_vm15, %v1944_v8, %v1960_v60  ;;  %v1963_v59 = vsel %vm1951_vm2, %v1941_v9, %v1944_v8  ;;  %v1964_v45 = vsel %vm1954_vm9, %v1950_v55, 1326507024 }
 0x1be   :  { %v2026_v12 = vand.u32 2139095040, %v9960_v17  ;;  %vm1598_vm5 = vcmp.lt.s32.totalorder %v8002_v43, 2  ;;  %v8091_v5 = vand.u32 3, %v1700_v35  ;;  %v1798_v34 = vsel %vm1713_vm11, %v1797_v50, %v7946_v47 }
 0x1bf   :  { %v1883_v16 = vclz %v5574_v32  ;;  %v1794_v39 = vmul.f32 %v1793_v23, %v1791_v30  ;;  %v1958_v46 = vsel %vm1952_vm12, %v1955_v18, %v1957_v11  ;;  %v1962_v9 = vsel %vm1952_vm12, %v1959_v0, %v1961_v38 }
 0x1c0   :  { %v1965_v8 = vsel %vm1953_vm15, %v1947_v40, %v1964_v45  ;;  %v8100_v3 = vmul.u32.u64.low %v1967_v24, %v1962_v9  ;;  %v8101_v62 = vmul.u32.u64.high %v1967_v24, %v1962_v9, %v8100_v3  ;;  %v8104_v35 = vpop.eup %5872  ;;  %v9694_v27 = vxor.u32 2147483648, %v8075_v61 }
 0x1c1   :  { %v5575_v55 = vadd.s32 4294967294, %v1883_v16  ;;  %v1966_v60 = vsel %vm1952_vm12, %v1963_v59, %v1965_v8  ;;  %9961 = vst [vmem:[#allocation73_spill] sm:$0xff] %v8104_v35  ;;  %vm1817_vm1 = vcmp.lt.s32.totalorder %v7083_v51, 0  ;;  %v2027_v30 = vshrl.u32 %v2026_v12, 23 }
 0x1c2   :  { %v8108_v47 = vmul.u32.u64.low %v1967_v24, %v1966_v60  ;;  %v8109_v50 = vmul.u32.u64.high %v1967_v24, %v1966_v60, %v8108_v47  ;;  %v8115_v48 = vsel %vm1494_vm3, %v8039_v31, %v8032_v4  ;;  %vm1703_vm2 = vcmp.eq.s32.totalorder %v8091_v5, 0 }
 0x1c3   :  { %v8120_v40 = vsel %vm8067_vm10, 0, %v1798_v34  ;;  %vm5576_vm9 = vcmp.lt.s32.totalorder %v5575_v55, 0  ;;  %v1795_v23 = vxor.u32 2147483648, %v1794_v39  ;;  %v1974_v18 = vmul.u32 %v1967_v24, %v1958_v46 }
 0x1c4   :  { %9962 = vst [vmem:[#allocation74_spill] sm:$0xff] %v8120_v40  ;;  %v1886_v32 = vsel %vm5576_vm9, 0, %v5575_v55  ;;  %v5581_v11 = vadd.s32 4294967169, %v2027_v30  ;;  %v9963_v0 = vxor.u32 2147483648, %v8071_v7  ;;  %vm1706_vm3 = vcmp.eq.s32.totalorder %v8091_v5, 2 }
 0x1c5   :  { %v1891_v44 = vsub.s32 4294967266, %v1886_v32  ;;  %v1977_v4 = vadd.s32 1, %v8101_v62  ;;  %v1601_v31 = vsel %vm1599_vm13, %v8071_v7, %v9694_v27  ;;  %v1804_v24 = vadd.s32 3, %v8120_v40 }
 0x1c6   :  { %v1604_v38 = vsel %vm1602_vm4, %v9963_v0, %v8075_v61  ;;  %vm1976_vm15 = vc.u32 %v8109_v50, %v8100_v3  ;;  %v2033_v59 = vadd.s32 1, %v5581_v11  ;;  %v9693_v45 = vxor.u32 2147483648, %v8104_v35 }
 0x1c7   :  { %v9692_v12 = vxor.u32 2147483648, %v8079_v53  ;;  %v1901_v34 = vsub.s32 4, %v8047_v13  ;;  %v1978_v16 = vsel %vm1976_vm15, %v1977_v4, %v8101_v62  ;;  %v1796_v46 = vsel %vm1713_vm11, %v1795_v23, %v1794_v39 }
 0x1c8   :  { %v1979_v9 = vadd.s32 %v1978_v16, %v1974_v18  ;;  %v9695_v8 = vand.u32 2147483647, %v9960_v17  ;;  %vm2034_vm4 = vcmp.gt.s32.totalorder %v2033_v59, 0  ;;  %v1871_v55 = vadd.s32 %v7988_v20, %v7999_v49 }
 0x1c9   :  { %v1887_v60 = vsub.s32 32, %v1886_v32  ;;  %v1892_v47 = vadd.s32 127, %v1891_v44  ;;  %v2035_v30 = vsel %vm2034_vm4, %v2033_v59, 0  ;;  %v8148_v11 = vsel %vm1598_vm5, %v1601_v31, %v1604_v38 }
 0x1ca   :  { %v8150_v0 = vand.u32 3, %v1804_v24  ;;  %v1980_v62 = vadd.s32 536870912, %v1979_v9  ;;  %v2037_v4 = vand.u32 31, %v2035_v30  ;;  %v8157_v39 = vsel %vm1703_vm2, %v8079_v53, %v9693_v45 }
 0x1cb   :  { %v8164_v20 = vsel %vm1706_vm3, %v9692_v12, %v8104_v35  ;;  %v1799_v49 = vsel %vm8067_vm10, %v7075_v25, %v1796_v46  ;;  %v9964_v43 = vand.u32 2147483647, %v7083_v51  ;;  %v1902_v18 = vsel %vm1817_vm1, %v1901_v34, %v8047_v13 }
 0x1cc   :  { %v1888_v38 = vshll.u32 %v8061_v54, %v1886_v32  ;;  %v8179_v44 = vshrl.u32 %v1980_v62, 30  ;;  %v2030_v31 = vand.u32 8388607, %v9695_v8  ;;  %v2038_v24 = vsub.s32 32, %v2037_v4  ;;  %v9967_v8 = vld [vmem:[#allocation22_spill] sm:$0xff] }
 0x1cd   :  { %vm8171_vm11 = vcmp.le.f32.partialorder %v9964_v43, 0.7853982  ;;  %v1889_v29 = vshrl.u32 %v1871_v55, %v1887_v60  ;;  %v1893_v59 = vshll.u32 %v1892_v47, 23  ;;  %v2036_v16 = vshrl.u32 %v2035_v30, 5 }
 0x1ce   :  { %v2040_v46 = vshll.u32 %v9786_v37, %v2037_v4  ;;  %v1982_v43 = vshll.u32 %v8179_v44, 30  ;;  %v2041_v12 = vshrl.u32 %v9834_v1, %v2038_v24  ;;  %v2043_v45 = vshll.u32 %v9834_v1, %v2037_v4 }
 0x1cf   :  { %v2046_v13 = vshll.u32 %v9835_v33, %v2037_v4  ;;  %v2044_v54 = vshrl.u32 %v9835_v33, %v2038_v24  ;;  %v2047_v32 = vshrl.u32 %v9832_v41, %v2038_v24  ;;  %v2049_v34 = vshll.u32 %v9832_v41, %v2037_v4 }
 0x1d0   :  { %v2050_v55 = vshrl.u32 %v9795_v2, %v2038_v24  ;;  %5874 = vcosq.f32 %v1799_v49  ;;  %v8192_v60 = vsub.s32 %v1979_v9, %v1982_v43  ;;  %v2031_v47 = vor.u32 8388608, %v2030_v31 }
 0x1d1   :  { %v2052_v30 = vshll.u32 %v9795_v2, %v2037_v4  ;;  %vm1702_vm10 = vcmp.lt.s32.totalorder %v8091_v5, 2  ;;  %5876 = vsinq.f32 %v1799_v49  ;;  %v1890_v62 = vor.u32 %v1889_v29, %v1888_v38 }
 0x1d2   :  { %v2039_v27 = vshrl.u32 %v9786_v37, %v2038_v24  ;;  %v2130_v53 = vand.u32 2139095040, %v9967_v8  ;;  %v1985_v35 = vsub.s32 0, %v8192_v60  ;;  %v2042_v40 = vor.u32 %v2041_v12, %v2040_v46 }
 0x1d3   :  { %v2045_v7 = vor.u32 %v2044_v54, %v2043_v45  ;;  %v2053_v61 = vshrl.u32 %v9796_v22, %v2038_v24  ;;  %v1894_v42 = vor.u32 4788187, %v1893_v59  ;;  %v2048_v9 = vor.u32 %v2047_v32, %v2046_v13 }
 0x1d4   :  { %v2051_v43 = vor.u32 %v2050_v55, %v2049_v34  ;;  %vm2055_vm13 = vcmp.lt.s32.totalorder %v2036_v16, 1  ;;  %v8202_v4 = vsel %vm8171_vm11, 0, %v1902_v18  ;;  %v5578_v49 = vmin.u32 %v1985_v35, %v8192_v60 }
 0x1d5   :  { %9968 = vst [vmem:[#allocation75_spill] sm:$0xff] %v8202_v4  ;;  %v2054_v38 = vor.u32 %v2053_v61, %v2052_v30  ;;  %v2071_v31 = vshll.u32 %v2031_v47, 8  ;;  %v1897_v29 = vcvt.s32.f32 %v1890_v62  ;;  %vm2057_vm12 = vcmp.lt.s32.totalorder %v2036_v16, 3 }
 0x1d6   :  { %vm2058_vm5 = vcmp.lt.s32.totalorder %v2036_v16, 4  ;;  %v2131_v21 = vshrl.u32 %v2130_v53, 23  ;;  %v1987_v12 = vclz %v5578_v49  ;;  %vm2056_vm2 = vcmp.lt.s32.totalorder %v2036_v16, 2 }
 0x1d7   :  { %v2059_v45 = vsel %vm2055_vm13, %v2039_v27, %v2042_v40  ;;  %v2063_v24 = vsel %vm2055_vm13, %v2042_v40, %v2045_v7  ;;  %vm9735_vm9 = vweird.f32 %v6754_v36  ;;  %vm9734_vm3 = vweird.f32 %v6798_v6 }
 0x1d8   :  { %v1895_v18 = vand.u32 2147483647, %v1894_v42  ;;  %v2060_v59 = vsel %vm2058_vm5, %v2048_v9, 2102212464  ;;  %v2064_v61 = vsel %vm2058_vm5, %v2051_v43, 920167782  ;;  %v2067_v35 = vsel %vm2055_vm13, %v2045_v7, %v2048_v9 }
 0x1d9   :  { %vm9711_vm15 = vweird.f32 %v9922_v63  ;;  %v5579_v53 = vadd.s32 4294967294, %v1987_v12  ;;  %v2061_v46 = vsel %vm2057_vm12, %v2045_v7, %v2060_v59  ;;  %v2065_v27 = vsel %vm2057_vm12, %v2048_v9, %v2064_v61 }
 0x1da   :  { %v2068_v40 = vsel %vm2058_vm5, %v2054_v38, 1326507024  ;;  %v2062_v13 = vsel %vm2056_vm2, %v2059_v45, %v2061_v46  ;;  %v2066_v54 = vsel %vm2056_vm2, %v2063_v24, %v2065_v27  ;;  %v5585_v32 = vadd.s32 4294967169, %v2131_v21  ;;  %v8219_v34 = vpop.eup %5874 }
 0x1db   :  { %v2069_v42 = vsel %vm2057_vm12, %v2051_v43, %v2068_v40  ;;  %9969 = vst [vmem:[#allocation76_spill] sm:$0xff] %v8219_v34  ;;  %vm5580_vm4 = vcmp.lt.s32.totalorder %v5579_v53, 0  ;;  %v8222_v47 = vmul.u32.u64.low %v2071_v31, %v2066_v54  ;;  %v8223_v30 = vmul.u32.u64.high %v2071_v31, %v2066_v54, %v8222_v47  ;;  %v8226_v7 = vpop.eup %5876 }
 0x1dc   :  { %v2070_v55 = vsel %vm2056_vm2, %v2067_v35, %v2069_v42  ;;  %9970 = vst [vmem:[#allocation77_spill] sm:$0xff] %v8226_v7  ;;  %v1898_v62 = vmul.f32 %v1897_v29, %v1895_v18  ;;  %v1990_v9 = vsel %vm5580_vm4, 0, %v5579_v53  ;;  %v1709_v21 = vsel %vm1702_vm10, %v8157_v39, %v8164_v20 }
 0x1dd   :  { %v8228_v49 = vmul.u32.u64.low %v2071_v31, %v2070_v55  ;;  %v8229_v38 = vmul.u32.u64.high %v2071_v31, %v2070_v55, %v8228_v49  ;;  %vm1807_vm13 = vcmp.eq.s32.totalorder %v8150_v0, 0  ;;  %vm1810_vm12 = vcmp.eq.s32.totalorder %v8150_v0, 2 }
 0x1de   :  { %v1995_v16 = vsub.s32 4294967266, %v1990_v9  ;;  %v1975_v43 = vadd.s32 %v8100_v3, %v8109_v50  ;;  %v1991_v12 = vsub.s32 32, %v1990_v9  ;;  %v2078_v45 = vmul.u32 %v2071_v31, %v2062_v13 }
 0x1df   :  { %v2137_v29 = vadd.s32 1, %v5585_v32  ;;  %v1908_v24 = vadd.s32 3, %v8202_v4  ;;  %v2081_v59 = vadd.s32 1, %v8223_v30  ;;  %v9715_v61 = vand.u32 2147483647, %v9967_v8 }
 0x1e0   :  { %v1996_v18 = vadd.s32 127, %v1995_v16  ;;  %v9709_v5 = vxor.u32 2147483648, %v8219_v34  ;;  %v1899_v39 = vxor.u32 2147483648, %v1898_v62  ;;  %vm2080_vm10 = vc.u32 %v8229_v38, %v8222_v47 }
 0x1e1   :  { %vm2138_vm5 = vcmp.gt.s32.totalorder %v2137_v29, 0  ;;  %v9710_v20 = vxor.u32 2147483648, %v8226_v7  ;;  %v1992_v3 = vshll.u32 %v8192_v60, %v1990_v9  ;;  %v2005_v50 = vsub.s32 4, %v8179_v44 }
 0x1e2   :  { %v2082_v31 = vsel %vm2080_vm10, %v2081_v59, %v8223_v30  ;;  %v1993_v35 = vshrl.u32 %v1975_v43, %v1991_v12  ;;  %v1997_v53 = vshll.u32 %v1996_v18, 23  ;;  %v2139_v27 = vsel %vm2138_vm5, %v2137_v29, 0 }
 0x1e3   :  { %v2083_v46 = vadd.s32 %v2082_v31, %v2078_v45  ;;  %v8252_v40 = vsel %vm9735_vm9, nan, %v8115_v48  ;;  %v8257_v13 = vsel %vm9734_vm3, nan, %v8148_v11  ;;  %vm1921_vm2 = vcmp.lt.s32.totalorder %v9947_v10, 0 }
 0x1e4   :  { %v2134_v60 = vand.u32 8388607, %v9715_v61  ;;  %v8264_v54 = vsel %vm9711_vm15, nan, %v1709_v21  ;;  %v1900_v42 = vsel %vm1817_vm1, %v1899_v39, %v1898_v62  ;;  %v2141_v48 = vand.u32 31, %v2139_v27 }
 0x1e5   :  { %v2084_v32 = vadd.s32 536870912, %v2083_v46  ;;  %v8273_v11 = vsel %vm1807_vm13, %v8219_v34, %v9710_v20  ;;  %v8280_v55 = vsel %vm1810_vm12, %v9709_v5, %v8226_v7  ;;  %v8282_v30 = vand.u32 3, %v1908_v24  ;;  %v9982_v34 = vld [vmem:[#allocation23_spill] sm:$0xff] }
 0x1e6   :  { %v8287_v62 = vsel %vm1921_vm2, %v2005_v50, %v8179_v44  ;;  %v1994_v9 = vor.u32 %v1993_v35, %v1992_v3  ;;  %v1998_v49 = vor.u32 4788187, %v1997_v53  ;;  %v2142_v16 = vsub.s32 32, %v2141_v48 }
 0x1e7   :  { %v8289_v21 = vshrl.u32 %v2084_v32, 30  ;;  %v1903_v43 = vsel %vm8171_vm11, %v7083_v51, %v1900_v42  ;;  %v2135_v12 = vor.u32 8388608, %v2134_v60  ;;  %v2144_v45 = vshll.u32 %v9786_v37, %v2141_v48 }
 0x1e8   :  { %v2147_v29 = vshll.u32 %v9834_v1, %v2141_v48  ;;  %v2140_v18 = vshrl.u32 %v2139_v27, 5  ;;  %v2145_v44 = vshrl.u32 %v9834_v1, %v2142_v16  ;;  %v2153_v59 = vshll.u32 %v9832_v41, %v2141_v48 }
 0x1e9   :  { %v2086_v24 = vshll.u32 %v8289_v21, 30  ;;  %v2148_v39 = vshrl.u32 %v9835_v33, %v2142_v16  ;;  %v2150_v3 = vshll.u32 %v9835_v33, %v2141_v48  ;;  %v2151_v50 = vshrl.u32 %v9832_v41, %v2142_v16 }
 0x1ea   :  { %v2154_v23 = vshrl.u32 %v9795_v2, %v2142_v16  ;;  %5878 = vcosq.f32 %v1903_v43  ;;  %v1999_v31 = vand.u32 2147483647, %v1998_v49  ;;  %v2001_v35 = vcvt.s32.f32 %v1994_v9 }
 0x1eb   :  { %v8303_v53 = vsub.s32 %v2083_v46, %v2086_v24  ;;  %5880 = vsinq.f32 %v1903_v43  ;;  %v2146_v60 = vor.u32 %v2145_v44, %v2144_v45  ;;  %v2149_v27 = vor.u32 %v2148_v39, %v2147_v29 }
 0x1ec   :  { %v2156_v42 = vshll.u32 %v9795_v2, %v2141_v48  ;;  %vm1806_vm1 = vcmp.lt.s32.totalorder %v8150_v0, 2  ;;  %v9971_v32 = vand.u32 2147483647, %v9947_v10  ;;  %v2143_v49 = vshrl.u32 %v9786_v37, %v2142_v16 }
 0x1ed   :  { %v2089_v20 = vsub.s32 0, %v8303_v53  ;;  %v2155_v9 = vor.u32 %v2154_v23, %v2153_v59  ;;  %vm2159_vm4 = vcmp.lt.s32.totalorder %v2140_v18, 1  ;;  %v2152_v46 = vor.u32 %v2151_v50, %v2150_v3  ;;  %v9974_v50 = vld [vmem:[#allocation25_spill] sm:$0xff] }
 0x1ee   :  { %vm8309_vm11 = vcmp.le.f32.partialorder %v9971_v32, 0.7853982  ;;  %v2157_v43 = vshrl.u32 %v9796_v22, %v2142_v16  ;;  %vm2162_vm13 = vcmp.lt.s32.totalorder %v2140_v18, 4  ;;  %v2175_v45 = vshll.u32 %v2135_v12, 8 }
 0x1ef   :  { %v2002_v48 = vmul.f32 %v2001_v35, %v1999_v31  ;;  %v5582_v29 = vmin.u32 %v2089_v20, %v8303_v53  ;;  %vm2160_vm12 = vcmp.lt.s32.totalorder %v2140_v18, 2  ;;  %vm2161_vm10 = vcmp.lt.s32.totalorder %v2140_v18, 3 }
 0x1f0   :  { %v2158_v24 = vor.u32 %v2157_v43, %v2156_v42  ;;  %v2164_v44 = vsel %vm2162_vm13, %v2152_v46, 2102212464  ;;  %v2167_v39 = vsel %vm2159_vm4, %v2146_v60, %v2149_v27  ;;  %v2168_v32 = vsel %vm2162_vm13, %v2155_v9, 920167782 }
 0x1f1   :  { %v2079_v59 = vadd.s32 %v8222_v47, %v8229_v38  ;;  %v2091_v3 = vclz %v5582_v29  ;;  %v2163_v16 = vsel %vm2159_vm4, %v2143_v49, %v2146_v60  ;;  %v2234_v12 = vand.u32 2139095040, %v9974_v50 }
 0x1f2   :  { %vm2025_vm5 = vcmp.lt.s32.totalorder %v9960_v17, 0  ;;  %v2165_v20 = vsel %vm2161_vm10, %v2149_v27, %v2164_v44  ;;  %v2169_v23 = vsel %vm2161_vm10, %v2152_v46, %v2168_v32  ;;  %v2171_v31 = vsel %vm2159_vm4, %v2149_v27, %v2152_v46 }
 0x1f3   :  { %v2172_v35 = vsel %vm2162_vm13, %v2158_v24, 1326507024  ;;  %vm9728_vm15 = vweird.f32 %v7075_v25  ;;  %v2003_v42 = vxor.u32 2147483648, %v2002_v48  ;;  %v5583_v43 = vadd.s32 4294967294, %v2091_v3 }
 0x1f4   :  { %v2170_v47 = vsel %vm2160_vm12, %v2167_v39, %v2169_v23  ;;  %v2173_v38 = vsel %vm2161_vm10, %v2155_v9, %v2172_v35  ;;  %v2166_v60 = vsel %vm2160_vm12, %v2163_v16, %v2165_v20  ;;  %v8338_v32 = vpop.eup %5878  ;;  %v2235_v24 = vshrl.u32 %v2234_v12, 23 }
 0x1f5   :  { %v2174_v49 = vsel %vm2160_vm12, %v2171_v31, %v2173_v38  ;;  %v8334_v29 = vmul.u32.u64.low %v2175_v45, %v2170_v47  ;;  %v8335_v44 = vmul.u32.u64.high %v2175_v45, %v2170_v47, %v8334_v29  ;;  %9975 = vst [vmem:[#allocation25_spill] sm:$0xff] %v8338_v32  ;;  %vm5584_vm4 = vcmp.lt.s32.totalorder %v5583_v43, 0  ;;  %v8343_v3 = vpop.eup %5880 }
 0x1f6   :  { %v8340_v27 = vmul.u32.u64.low %v2175_v45, %v2174_v49  ;;  %v8341_v46 = vmul.u32.u64.high %v2175_v45, %v2174_v49, %v8340_v27  ;;  %9976 = vst [vmem:[#allocation78_spill] sm:$0xff] %v8343_v3  ;;  %vm1911_vm13 = vcmp.eq.s32.totalorder %v8282_v30, 0  ;;  %vm1914_vm10 = vcmp.eq.s32.totalorder %v8282_v30, 2 }
 0x1f7   :  { %v8350_v18 = vsel %vm8309_vm11, 0, %v8287_v62  ;;  %v2094_v9 = vsel %vm5584_vm4, 0, %v5583_v43  ;;  %v2109_v20 = vsub.s32 4, %v8289_v21  ;;  %v5589_v23 = vadd.s32 4294967169, %v2235_v24 }
 0x1f8   :  { %9977 = vst [vmem:[#allocation79_spill] sm:$0xff] %v8350_v18  ;;  %v2095_v39 = vsub.s32 32, %v2094_v9  ;;  %v2099_v16 = vsub.s32 4294967266, %v2094_v9  ;;  %v1813_v12 = vsel %vm1806_vm1, %v8273_v11, %v8280_v55  ;;  %v2096_v31 = vshll.u32 %v8303_v53, %v2094_v9 }
 0x1f9   :  { %v2182_v35 = vmul.u32 %v2175_v45, %v2166_v60  ;;  %v2185_v47 = vadd.s32 1, %v8335_v44  ;;  %v2004_v62 = vsel %vm1921_vm2, %v2003_v42, %v2002_v48  ;;  %v2012_v43 = vadd.s32 3, %v8350_v18 }
 0x1fa   :  { %v2097_v38 = vshrl.u32 %v2079_v59, %v2095_v39  ;;  %v2100_v49 = vadd.s32 127, %v2099_v16  ;;  %v9712_v27 = vxor.u32 2147483648, %v8338_v32  ;;  %vm2184_vm12 = vc.u32 %v8341_v46, %v8334_v29 }
 0x1fb   :  { %v9714_v0 = vand.u32 2147483647, %v9974_v50  ;;  %v2241_v11 = vadd.s32 1, %v5589_v23  ;;  %v9713_v55 = vxor.u32 2147483648, %v8343_v3  ;;  %v2110_v45 = vsel %vm2025_vm5, %v2109_v20, %v8289_v21 }
 0x1fc   :  { %v2101_v53 = vshll.u32 %v2100_v49, 23  ;;  %v2186_v48 = vsel %vm2184_vm12, %v2185_v47, %v8335_v44  ;;  %v2007_v59 = vsel %vm8309_vm11, %v9947_v10, %v2004_v62  ;;  %v2098_v42 = vor.u32 %v2097_v38, %v2096_v31 }
 0x1fd   :  { %v2187_v60 = vadd.s32 %v2186_v48, %v2182_v35  ;;  %vm2242_vm2 = vcmp.gt.s32.totalorder %v2241_v11, 0  ;;  %vm1910_vm1 = vcmp.lt.s32.totalorder %v8282_v30, 2  ;;  %v9978_v24 = vand.u32 2147483647, %v9960_v17 }
 0x1fe   :  { %v2102_v39 = vor.u32 4788187, %v2101_v53  ;;  %v2243_v16 = vsel %vm2242_vm2, %v2241_v11, 0  ;;  %v8383_v21 = vsel %vm9728_vm15, nan, %v1813_v12  ;;  %v8385_v44 = vand.u32 3, %v2012_v43 }
 0x1ff   :  { %vm8377_vm4 = vcmp.le.f32.partialorder %v9978_v24, 0.7853982  ;;  %v2188_v5 = vadd.s32 536870912, %v2187_v60  ;;  %v2245_v20 = vand.u32 31, %v2243_v16  ;;  %v1913_v23 = vsel %vm1911_vm13, %v8338_v32, %v9713_v55 }
 0x200   :  { %v1916_v31 = vsel %vm1914_vm10, %v9712_v27, %v8343_v3  ;;  %5882 = vcosq.f32 %v2007_v59  ;;  %v8399_v12 = vsel %vm8377_vm4, 0, %v2110_v45  ;;  %v2105_v35 = vcvt.s32.f32 %v2098_v42 }
 0x201   :  { %9981 = vst [vmem:[#allocation80_spill] sm:$0xff] %v8399_v12  ;;  %v8401_v47 = vshrl.u32 %v2188_v5, 30  ;;  %v2238_v62 = vand.u32 8388607, %v9714_v0  ;;  %v2246_v43 = vsub.s32 32, %v2245_v20  ;;  %v8405_v49 = vshrl.u32 %v2243_v16, 5 }
 0x202   :  { %v2103_v38 = vand.u32 2147483647, %v2102_v39  ;;  %v2248_v11 = vshll.u32 %v9786_v37, %v2245_v20  ;;  %v2251_v53 = vshll.u32 %v9834_v1, %v2245_v20  ;;  %v2254_v45 = vshll.u32 %v9835_v33, %v2245_v20 }
 0x203   :  { %v2190_v48 = vshll.u32 %v8401_v47, 30  ;;  %v2249_v24 = vshrl.u32 %v9834_v1, %v2246_v43  ;;  %v2257_v42 = vshll.u32 %v9832_v41, %v2245_v20  ;;  %v2252_v5 = vshrl.u32 %v9835_v33, %v2246_v43 }
 0x204   :  { %v2255_v27 = vshrl.u32 %v9832_v41, %v2246_v43  ;;  %v2258_v39 = vshrl.u32 %v9795_v2, %v2246_v43  ;;  %v2260_v16 = vshll.u32 %v9795_v2, %v2245_v20  ;;  %5884 = vsinq.f32 %v2007_v59 }
 0x205   :  { %v8417_v55 = vsub.s32 %v2187_v60, %v2190_v48  ;;  %v2239_v0 = vor.u32 8388608, %v2238_v62  ;;  %v2261_v61 = vshrl.u32 %v9796_v22, %v2246_v43  ;;  %v8422_v32 = vsel %vm1910_vm1, %v1913_v23, %v1916_v31 }
 0x206   :  { %v2106_v3 = vmul.f32 %v2105_v35, %v2103_v38  ;;  %v2116_v25 = vadd.s32 3, %v8399_v12  ;;  %v2338_v7 = vand.u32 2139095040, %v9982_v34  ;;  %v2250_v18 = vor.u32 %v2249_v24, %v2248_v11 }
 0x207   :  { %v2193_v63 = vsub.s32 0, %v8417_v55  ;;  %v2253_v4 = vor.u32 %v2252_v5, %v2251_v53  ;;  %v2256_v20 = vor.u32 %v2255_v27, %v2254_v45  ;;  %v2247_v59 = vshrl.u32 %v9786_v37, %v2246_v43 }
 0x208   :  { %v2259_v60 = vor.u32 %v2258_v39, %v2257_v42  ;;  %v2262_v62 = vor.u32 %v2261_v61, %v2260_v16  ;;  %vm2263_vm11 = vcmp.lt.s32.totalorder %v8405_v49, 1  ;;  %v2183_v30 = vadd.s32 %v8334_v29, %v8341_v46 }
 0x209   :  { %v5586_v23 = vmin.u32 %v2193_v63, %v8417_v55  ;;  %v8432_v31 = vshll.u32 %v2239_v0, 8  ;;  %v9731_v35 = vand.u32 2147483647, %v9982_v34  ;;  %v2107_v11 = vxor.u32 2147483648, %v2106_v3 }
 0x20a   :  { %v8435_v38 = vpop.eup %5882  ;;  %vm2265_vm13 = vcmp.lt.s32.totalorder %v8405_v49, 3  ;;  %vm2266_vm10 = vcmp.lt.s32.totalorder %v8405_v49, 4  ;;  %v2339_v27 = vshrl.u32 %v2338_v7, 23  ;;  %vm2018_vm12 = vcmp.eq.s32.totalorder %v8385_v44, 2 }
 0x20b   :  { %9983 = vst [vmem:[#allocation23_spill] sm:$0xff] %v8435_v38  ;;  %vm2129_vm2 = vcmp.lt.s32.totalorder %v9967_v8, 0  ;;  %v2195_v61 = vclz %v5586_v23  ;;  %vm2264_vm1 = vcmp.lt.s32.totalorder %v8405_v49, 2  ;;  %v2271_v63 = vsel %vm2263_vm11, %v2250_v18, %v2253_v4 }
 0x20c   :  { %v2275_v29 = vsel %vm2263_vm11, %v2253_v4, %v2256_v20  ;;  %vm2015_vm15 = vcmp.eq.s32.totalorder %v8385_v44, 0  ;;  %v2267_v46 = vsel %vm2263_vm11, %v2247_v59, %v2250_v18  ;;  %v2268_v0 = vsel %vm2266_vm10, %v2256_v20, 2102212464 }
 0x20d   :  { %v2272_v7 = vsel %vm2266_vm10, %v2259_v60, 920167782  ;;  %v2276_v43 = vsel %vm2266_vm10, %v2262_v62, 1326507024  ;;  %v5587_v53 = vadd.s32 4294967294, %v2195_v61  ;;  %v2269_v48 = vsel %vm2265_vm13, %v2253_v4, %v2268_v0 }
 0x20e   :  { %v2273_v24 = vsel %vm2265_vm13, %v2256_v20, %v2272_v7  ;;  %v2277_v45 = vsel %vm2265_vm13, %v2259_v60, %v2276_v43  ;;  %v2213_v42 = vsub.s32 4, %v8401_v47  ;;  %v5593_v39 = vadd.s32 4294967169, %v2339_v27  ;;  %v8460_v16 = vpop.eup %5884 }
 0x20f   :  { %v2274_v5 = vsel %vm2264_vm1, %v2271_v63, %v2273_v24  ;;  %v2278_v18 = vsel %vm2264_vm1, %v2275_v29, %v2277_v45  ;;  %9984 = vst [vmem:[#allocation81_spill] sm:$0xff] %v8460_v16  ;;  %v2108_v4 = vsel %vm2025_vm5, %v2107_v11, %v2106_v3  ;;  %v9985_v59 = vand.u32 2147483647, %v9967_v8 }
 0x210   :  { %vm5588_vm13 = vcmp.lt.s32.totalorder %v5587_v53, 0  ;;  %v8471_v60 = vmul.u32.u64.low %v8432_v31, %v2278_v18  ;;  %v8472_v62 = vmul.u32.u64.high %v8432_v31, %v2278_v18, %v8471_v60  ;;  %v2270_v27 = vsel %vm2264_vm1, %v2267_v46, %v2269_v48 }
 0x211   :  { %vm8466_vm11 = vcmp.le.f32.partialorder %v9985_v59, 0.7853982  ;;  %v2198_v23 = vsel %vm5588_vm13, 0, %v5587_v53  ;;  %v8477_v61 = vmul.u32.u64.low %v8432_v31, %v2274_v5  ;;  %v8478_v63 = vmul.u32.u64.high %v8432_v31, %v2274_v5, %v8477_v61 }
 0x212   :  { %vm2014_vm5 = vcmp.lt.s32.totalorder %v8385_v44, 2  ;;  %v2199_v3 = vsub.s32 32, %v2198_v23  ;;  %v2200_v11 = vshll.u32 %v8417_v55, %v2198_v23  ;;  %v2203_v29 = vsub.s32 4294967266, %v2198_v23 }
 0x213   :  { %v2345_v0 = vadd.s32 1, %v5593_v39  ;;  %v9730_v7 = vxor.u32 2147483648, %v8460_v16  ;;  %v9729_v43 = vxor.u32 2147483648, %v8435_v38  ;;  %v2111_v49 = vsel %vm8377_vm4, %v9960_v17, %v2108_v4 }
 0x214   :  { %v8488_v46 = vand.u32 3, %v2116_v25  ;;  %v2201_v53 = vshrl.u32 %v2183_v30, %v2199_v3  ;;  %v2204_v48 = vadd.s32 127, %v2203_v29  ;;  %v2286_v24 = vmul.u32 %v8432_v31, %v2270_v27 }
 0x215   :  { %v2342_v45 = vand.u32 8388607, %v9731_v35  ;;  %v2214_v55 = vsel %vm2129_vm2, %v2213_v42, %v8401_v47  ;;  %vm2288_vm10 = vc.u32 %v8472_v62, %v8477_v61  ;;  %v2289_v5 = vadd.s32 1, %v8478_v63 }
 0x216   :  { %vm2346_vm1 = vcmp.gt.s32.totalorder %v2345_v0, 0  ;;  %5886 = vcosq.f32 %v2111_v49  ;;  %v2202_v25 = vor.u32 %v2201_v53, %v2200_v11  ;;  %v2205_v9 = vshll.u32 %v2204_v48, 23 }
 0x217   :  { %v2347_v30 = vsel %vm2346_vm1, %v2345_v0, 0  ;;  %v2020_v31 = vsel %vm2018_vm12, %v9729_v43, %v8460_v16  ;;  %5888 = vsinq.f32 %v2111_v49  ;;  %v2290_v18 = vsel %vm2288_vm10, %v2289_v5, %v8478_v63 }
 0x218   :  { %v2349_v47 = vand.u32 31, %v2347_v30  ;;  %v2017_v42 = vsel %vm2015_vm15, %v8435_v38, %v9730_v7  ;;  %v2206_v39 = vor.u32 4788187, %v2205_v9  ;;  %v2209_v4 = vcvt.s32.f32 %v2202_v25 }
 0x219   :  { %v2291_v59 = vadd.s32 %v2290_v18, %v2286_v24  ;;  %v8512_v60 = vsel %vm8466_vm11, 0, %v2214_v55  ;;  %v2343_v23 = vor.u32 8388608, %v2342_v45  ;;  %v2348_v45 = vshrl.u32 %v2347_v30, 5 }
 0x21a   :  { %9988 = vst [vmem:[#allocation82_spill] sm:$0xff] %v8512_v60  ;;  %v2350_v27 = vsub.s32 32, %v2349_v47  ;;  %v2352_v3 = vshll.u32 %v9786_v37, %v2349_v47  ;;  %v2207_v11 = vand.u32 2147483647, %v2206_v39  ;;  %v2355_v29 = vshll.u32 %v9834_v1, %v2349_v47 }
 0x21b   :  { %v2292_v63 = vadd.s32 536870912, %v2291_v59  ;;  %v2358_v0 = vshll.u32 %v9835_v33, %v2349_v47  ;;  %v2361_v24 = vshll.u32 %v9832_v41, %v2349_v47  ;;  %v8524_v9 = vsel %vm2014_vm5, %v2017_v42, %v2020_v31 }
 0x21c   :  { %v2353_v49 = vshrl.u32 %v9834_v1, %v2350_v27  ;;  %v2356_v53 = vshrl.u32 %v9835_v33, %v2350_v27  ;;  %v2359_v48 = vshrl.u32 %v9832_v41, %v2350_v27  ;;  %v2210_v55 = vmul.f32 %v2209_v4, %v2207_v11 }
 0x21d   :  { %v2293_v5 = vshrl.u32 %v2292_v63, 30  ;;  %v2362_v25 = vshrl.u32 %v9795_v2, %v2350_v27  ;;  %vm2122_vm15 = vcmp.eq.s32.totalorder %v8488_v46, 2  ;;  %v8528_v18 = vadd.s32 3, %v8512_v60 }
 0x21e   :  { %vm2233_vm4 = vcmp.lt.s32.totalorder %v9974_v50, 0  ;;  %v2364_v39 = vshll.u32 %v9795_v2, %v2349_v47  ;;  %v2365_v43 = vshrl.u32 %v9796_v22, %v2350_v27  ;;  %vm2119_vm12 = vcmp.eq.s32.totalorder %v8488_v46, 0 }
 0x21f   :  { %v2211_v30 = vxor.u32 2147483648, %v2210_v55  ;;  %v2294_v4 = vshll.u32 %v2293_v5, 30  ;;  %v2351_v11 = vshrl.u32 %v9786_v37, %v2350_v27  ;;  %v8535_v44 = vshll.u32 %v2343_v23, 8 }
 0x220   :  { %v2354_v31 = vor.u32 %v2353_v49, %v2352_v3  ;;  %v2357_v42 = vor.u32 %v2356_v53, %v2355_v29  ;;  %v2360_v63 = vor.u32 %v2359_v48, %v2358_v0  ;;  %v2363_v7 = vor.u32 %v2362_v25, %v2361_v24  ;;  %v8537_v35 = vpop.eup %5886  ;;  %v9994_v29 = vld [vmem:[#allocation27_spill] sm:$0xff] }
 0x221   :  { %9989 = vst [vmem:[#allocation83_spill] sm:$0xff] %v8537_v35  ;;  %v2212_v60 = vsel %vm2129_vm2, %v2211_v30, %v2210_v55  ;;  %v8541_v47 = vsub.s32 %v2291_v59, %v2294_v4  ;;  %vm2367_vm13 = vcmp.lt.s32.totalorder %v2348_v45, 1  ;;  %vm2370_vm5 = vcmp.lt.s32.totalorder %v2348_v45, 4  ;;  %v8543_v12 = vpop.eup %5888 }
 0x222   :  { %9990 = vst [vmem:[#allocation84_spill] sm:$0xff] %v8543_v12  ;;  %vm2118_vm10 = vcmp.lt.s32.totalorder %v8488_v46, 2  ;;  %v9991_v23 = vand.u32 2147483647, %v9974_v50  ;;  %v2366_v3 = vor.u32 %v2365_v43, %v2364_v39  ;;  %vm2369_vm3 = vcmp.lt.s32.totalorder %v2348_v45, 3 }
 0x223   :  { %v2442_v49 = vand.u32 2139095040, %v9994_v29  ;;  %v2297_v59 = vsub.s32 0, %v8541_v47  ;;  %v2317_v53 = vsub.s32 4, %v2293_v5  ;;  %vm2368_vm2 = vcmp.lt.s32.totalorder %v2348_v45, 2 }
 0x224   :  { %vm8548_vm1 = vcmp.le.f32.partialorder %v9991_v23, 0.7853982  ;;  %v2372_v48 = vsel %vm2370_vm5, %v2360_v63, 2102212464  ;;  %v2215_v55 = vsel %vm8466_vm11, %v9967_v8, %v2212_v60  ;;  %v2375_v25 = vsel %vm2367_vm13, %v2354_v31, %v2357_v42 }
 0x225   :  { %v2376_v43 = vsel %vm2370_vm5, %v2363_v7, 920167782  ;;  %vm9776_vm9 = vweird.f32 %v7083_v51  ;;  %vm9775_vm8 = vweird.f32 %v9947_v10  ;;  %v5590_v30 = vmin.u32 %v2297_v59, %v8541_v47 }
 0x226   :  { %v2371_v4 = vsel %vm2367_vm13, %v2351_v11, %v2354_v31  ;;  %v2377_v23 = vsel %vm2369_vm3, %v2360_v63, %v2376_v43  ;;  %vm9774_vm14 = vweird.f32 %v9960_v17  ;;  %v2373_v20 = vsel %vm2369_vm3, %v2357_v42, %v2372_v48 }
 0x227   :  { %v2378_v60 = vsel %vm2368_vm2, %v2375_v25, %v2377_v23  ;;  %v2379_v0 = vsel %vm2367_vm13, %v2357_v42, %v2360_v63  ;;  %v2380_v24 = vsel %vm2370_vm5, %v2366_v3, 1326507024  ;;  %5890 = vcosq.f32 %v2215_v55 }
 0x228   :  { %v2287_v39 = vadd.s32 %v8477_v61, %v8472_v62  ;;  %v2299_v38 = vclz %v5590_v30  ;;  %v2318_v11 = vsel %vm2233_vm4, %v2317_v53, %v2293_v5  ;;  %v2381_v31 = vsel %vm2369_vm3, %v2363_v7, %v2380_v24 }
 0x229   :  { %v8579_v59 = vmul.u32.u64.low %v8535_v44, %v2378_v60  ;;  %v8580_v43 = vmul.u32.u64.high %v8535_v44, %v2378_v60, %v8579_v59  ;;  %v2443_v48 = vshrl.u32 %v2442_v49, 23  ;;  %v9995_v42 = vxor.u32 2147483648, %v8537_v35 }
 0x22a   :  { %v5591_v3 = vadd.s32 4294967294, %v2299_v38  ;;  %v2374_v62 = vsel %vm2368_vm2, %v2371_v4, %v2373_v20  ;;  %v2382_v61 = vsel %vm2368_vm2, %v2379_v0, %v2381_v31  ;;  %v9996_v5 = vxor.u32 2147483648, %v8543_v12 }
 0x22b   :  { %v2124_v63 = vsel %vm2122_vm15, %v9995_v42, %v8543_v12  ;;  %v8596_v53 = vmul.u32.u64.low %v8535_v44, %v2382_v61  ;;  %v8597_v49 = vmul.u32.u64.high %v8535_v44, %v2382_v61, %v8596_v53  ;;  %v5597_v24 = vadd.s32 4294967169, %v2443_v48 }
 0x22c   :  { %v2121_v7 = vsel %vm2119_vm12, %v8537_v35, %v9996_v5  ;;  %5892 = vsinq.f32 %v2215_v55  ;;  %vm5592_vm3 = vcmp.lt.s32.totalorder %v5591_v3, 0  ;;  %v8601_v38 = vsel %vm8548_vm1, 0, %v2318_v11 }
 0x22d   :  { %9997 = vst [vmem:[#allocation27_spill] sm:$0xff] %v8601_v38  ;;  %v9998_v45 = vand.u32 2147483647, %v9994_v29  ;;  %v2302_v25 = vsel %vm5592_vm3, 0, %v5591_v3  ;;  %v2390_v30 = vmul.u32 %v8535_v44, %v2374_v62  ;;  %v2393_v4 = vadd.s32 1, %v8580_v43 }
 0x22e   :  { %v2449_v23 = vadd.s32 1, %v5597_v24  ;;  %v2125_v20 = vsel %vm2118_vm10, %v2121_v7, %v2124_v63  ;;  %v2303_v60 = vsub.s32 32, %v2302_v25  ;;  %v2304_v55 = vshll.u32 %v8541_v47, %v2302_v25 }
 0x22f   :  { %v2446_v0 = vand.u32 8388607, %v9998_v45  ;;  %v2307_v31 = vsub.s32 4294967266, %v2302_v25  ;;  %v2324_v48 = vadd.s32 3, %v8601_v38  ;;  %vm2392_vm11 = vc.u32 %v8597_v49, %v8579_v59 }
 0x230   :  { %vm2450_vm15 = vcmp.gt.s32.totalorder %v2449_v23, 0  ;;  %v9740_v11 = vand.u32 2147483647, %v9876_v19  ;;  %v2305_v42 = vshrl.u32 %v2287_v39, %v2303_v60  ;;  %v2394_v3 = vsel %vm2392_vm11, %v2393_v4, %v8580_v43 }
 0x231   :  { %v2308_v44 = vadd.s32 127, %v2307_v31  ;;  %v2447_v62 = vor.u32 8388608, %v2446_v0  ;;  %v8618_v46 = vsel %vm9776_vm9, nan, %v8422_v32  ;;  %v8623_v47 = vsel %vm9775_vm8, nan, %v8524_v9  ;;  %v8625_v5 = vpop.eup %5890 }
 0x232   :  { %v2395_v63 = vadd.s32 %v2394_v3, %v2390_v30  ;;  %v2451_v61 = vsel %vm2450_vm15, %v2449_v23, 0  ;;  %9999 = vst [vmem:[#allocation85_spill] sm:$0xff] %v8625_v5  ;;  %v8629_v39 = vsel %vm9774_vm14, nan, %v2125_v20  ;;  %v8632_v43 = vand.u32 3, %v8528_v18 }
 0x233   :  { %v2306_v7 = vor.u32 %v2305_v42, %v2304_v55  ;;  %v2309_v53 = vshll.u32 %v2308_v44, 23  ;;  %v8634_v32 = vand.u32 3, %v2324_v48  ;;  %v2453_v45 = vand.u32 31, %v2451_v61 }
 0x234   :  { %v2396_v24 = vadd.s32 536870912, %v2395_v63  ;;  %v2546_v9 = vand.u32 2139095040, %v9876_v19  ;;  %v8637_v30 = vshll.u32 %v2447_v62, 8  ;;  %v8641_v4 = vand.u32 8388607, %v9740_v11 }
 0x235   :  { %v2310_v0 = vor.u32 4788187, %v2309_v53  ;;  %v2313_v25 = vcvt.s32.f32 %v2306_v7  ;;  %v8646_v20 = vshrl.u32 %v2451_v61, 5  ;;  %v2454_v60 = vsub.s32 32, %v2453_v45 }
 0x236   :  { %v8644_v18 = vshrl.u32 %v2396_v24, 30  ;;  %v8648_v55 = vpop.eup %5892  ;;  %vm2226_vm12 = vcmp.eq.s32.totalorder %v8632_v43, 2  ;;  %v2456_v48 = vshll.u32 %v9786_v37, %v2453_v45  ;;  %v2459_v42 = vshll.u32 %v9834_v1, %v2453_v45 }
 0x237   :  { %10000 = vst [vmem:[#allocation86_spill] sm:$0xff] %v8648_v55  ;;  %v2311_v31 = vand.u32 2147483647, %v2310_v0  ;;  %v2462_v44 = vshll.u32 %v9835_v33, %v2453_v45  ;;  %vm2223_vm13 = vcmp.eq.s32.totalorder %v8632_v43, 0  ;;  %v2457_v62 = vshrl.u32 %v9834_v1, %v2454_v60 }
 0x238   :  { %v2398_v3 = vshll.u32 %v8644_v18, 30  ;;  %v2465_v61 = vshll.u32 %v9832_v41, %v2453_v45  ;;  %v2468_v7 = vshll.u32 %v9795_v2, %v2453_v45  ;;  %v2460_v24 = vshrl.u32 %v9835_v33, %v2454_v60 }
 0x239   :  { %v2314_v53 = vmul.f32 %v2313_v25, %v2311_v31  ;;  %v2463_v0 = vshrl.u32 %v9832_v41, %v2454_v60  ;;  %v2466_v11 = vshrl.u32 %v9795_v2, %v2454_v60  ;;  %v2391_v17 = vadd.s32 %v8579_v59, %v8597_v49 }
 0x23a   :  { %v8665_v35 = vsub.s32 %v2395_v63, %v2398_v3  ;;  %v2469_v12 = vshrl.u32 %v9796_v22, %v2454_v60  ;;  %v2458_v38 = vor.u32 %v2457_v62, %v2456_v48  ;;  %v2461_v51 = vor.u32 %v2460_v24, %v2459_v42 }
 0x23b   :  { %v2315_v10 = vxor.u32 2147483648, %v2314_v53  ;;  %v2547_v45 = vshrl.u32 %v2546_v9, 23  ;;  %vm2222_vm5 = vcmp.lt.s32.totalorder %v8632_v43, 2  ;;  %vm2337_vm10 = vcmp.lt.s32.totalorder %v9982_v34, 0 }
 0x23c   :  { %v2401_v25 = vsub.s32 0, %v8665_v35  ;;  %v2455_v31 = vshrl.u32 %v9786_v37, %v2454_v60  ;;  %v2467_v23 = vor.u32 %v2466_v11, %v2465_v61  ;;  %vm2471_vm2 = vcmp.lt.s32.totalorder %v8646_v20, 1 }
 0x23d   :  { %v2316_v59 = vsel %vm2233_vm4, %v2315_v10, %v2314_v53  ;;  %v2464_v49 = vor.u32 %v2463_v0, %v2462_v44  ;;  %v2470_v63 = vor.u32 %v2469_v12, %v2468_v7  ;;  %vm2474_vm3 = vcmp.lt.s32.totalorder %v8646_v20, 4 }
 0x23e   :  { %v2319_v9 = vsel %vm8548_vm1, %v9974_v50, %v2316_v59  ;;  %v5594_v48 = vmin.u32 %v2401_v25, %v8665_v35  ;;  %vm2472_vm11 = vcmp.lt.s32.totalorder %v8646_v20, 2  ;;  %vm2473_vm15 = vcmp.lt.s32.totalorder %v8646_v20, 3 }
 0x23f   :  { %5894 = vcosq.f32 %v2319_v9  ;;  %v2476_v11 = vsel %vm2474_vm3, %v2464_v49, 2102212464  ;;  %v2479_v10 = vsel %vm2471_vm2, %v2458_v38, %v2461_v51  ;;  %v2480_v12 = vsel %vm2474_vm3, %v2467_v23, 920167782 }
 0x240   :  { %vm9763_vm4 = vweird.f32 %v9967_v8  ;;  %5896 = vsinq.f32 %v2319_v9  ;;  %v10001_v27 = vand.u32 2147483647, %v9982_v34  ;;  %v2403_v42 = vclz %v5594_v48 }
 0x241   :  { %v2421_v44 = vsub.s32 4, %v8644_v18  ;;  %v5601_v3 = vadd.s32 4294967169, %v2547_v45  ;;  %v2475_v62 = vsel %vm2471_vm2, %v2455_v31, %v2458_v38  ;;  %v2477_v61 = vsel %vm2473_vm15, %v2461_v51, %v2476_v11 }
 0x242   :  { %vm8691_vm1 = vcmp.le.f32.partialorder %v10001_v27, 0.7853982  ;;  %v2481_v7 = vsel %vm2473_vm15, %v2464_v49, %v2480_v12  ;;  %v2483_v53 = vsel %vm2471_vm2, %v2461_v51, %v2464_v49  ;;  %v10004_v24 = vxor.u32 2147483648, %v8625_v5 }
 0x243   :  { %v5595_v25 = vadd.s32 4294967294, %v2403_v42  ;;  %v2482_v45 = vsel %vm2472_vm11, %v2479_v10, %v2481_v7  ;;  %v2484_v38 = vsel %vm2474_vm3, %v2470_v63, 1326507024  ;;  %v10005_v31 = vxor.u32 2147483648, %v8648_v55 }
 0x244   :  { %v2228_v0 = vsel %vm2226_vm12, %v10004_v24, %v8648_v55  ;;  %v2485_v51 = vsel %vm2473_vm15, %v2467_v23, %v2484_v38  ;;  %v8721_v49 = vmul.u32.u64.low %v8637_v30, %v2482_v45  ;;  %v8722_v9 = vmul.u32.u64.high %v8637_v30, %v2482_v45, %v8721_v49 }
 0x245   :  { %v2225_v59 = vsel %vm2223_vm13, %v8625_v5, %v10005_v31  ;;  %vm5596_vm12 = vcmp.lt.s32.totalorder %v5595_v25, 0  ;;  %v2478_v48 = vsel %vm2472_vm11, %v2475_v62, %v2477_v61  ;;  %v2486_v63 = vsel %vm2472_vm11, %v2483_v53, %v2485_v51 }
 0x246   :  { %v2553_v11 = vadd.s32 1, %v5601_v3  ;;  %v2406_v10 = vsel %vm5596_vm12, 0, %v5595_v25  ;;  %v2422_v12 = vsel %vm2337_vm10, %v2421_v44, %v8644_v18  ;;  %v2229_v62 = vsel %vm2222_vm5, %v2225_v59, %v2228_v0 }
 0x247   :  { %v8733_v23 = vmul.u32.u64.low %v8637_v30, %v2486_v63  ;;  %v8734_v27 = vmul.u32.u64.high %v8637_v30, %v2486_v63, %v8733_v23  ;;  %v2407_v42 = vsub.s32 32, %v2406_v10  ;;  %v2408_v7 = vshll.u32 %v8665_v35, %v2406_v10 }
 0x248   :  { %v2411_v24 = vsub.s32 4294967266, %v2406_v10  ;;  %vm2554_vm13 = vcmp.gt.s32.totalorder %v2553_v11, 0  ;;  %v2494_v20 = vmul.u32 %v8637_v30, %v2478_v48  ;;  %v2497_v3 = vadd.s32 1, %v8722_v9 }
 0x249   :  { %v2555_v61 = vsel %vm2554_vm13, %v2553_v11, 0  ;;  %v2409_v53 = vshrl.u32 %v2391_v17, %v2407_v42  ;;  %v2551_v18 = vor.u32 8388608, %v8641_v4  ;;  %v8742_v45 = vpop.eup %5894  ;;  %vm2327_vm2 = vcmp.eq.s32.totalorder %v8634_v32, 0 }
 0x24a   :  { %v2412_v25 = vadd.s32 127, %v2411_v24  ;;  %v2557_v44 = vand.u32 31, %v2555_v61  ;;  %10006 = vst [vmem:[#allocation87_spill] sm:$0xff] %v8742_v45  ;;  %vm2330_vm3 = vcmp.eq.s32.totalorder %v8634_v32, 2  ;;  %v8748_v35 = vsel %vm8691_vm1, 0, %v2422_v12  ;;  %v8752_v43 = vpop.eup %5896 }
 0x24b   :  { %10007 = vst [vmem:[#allocation88_spill] sm:$0xff] %v8748_v35  ;;  %vm2496_vm5 = vc.u32 %v8734_v27, %v8721_v49  ;;  %10008 = vst [vmem:[#allocation89_spill] sm:$0xff] %v8752_v43  ;;  %v9749_v17 = vxor.u32 2147483648, %v8742_v45  ;;  %v2410_v30 = vor.u32 %v2409_v53, %v2408_v7  ;;  %vm2441_vm11 = vcmp.lt.s32.totalorder %v9994_v29, 0 }
 0x24c   :  { %v2413_v4 = vshll.u32 %v2412_v25, 23  ;;  %v2498_v0 = vsel %vm2496_vm5, %v2497_v3, %v8722_v9  ;;  %v8759_v38 = vsel %vm9763_vm4, nan, %v2229_v62  ;;  %v9758_v31 = vxor.u32 2147483648, %v8752_v43 }
 0x24d   :  { %v2499_v59 = vadd.s32 %v2498_v0, %v2494_v20  ;;  %v2558_v51 = vsub.s32 32, %v2557_v44  ;;  %v2417_v63 = vcvt.s32.f32 %v2410_v30  ;;  %v2428_v11 = vadd.s32 3, %v8748_v35 }
 0x24e   :  { %v2414_v48 = vor.u32 4788187, %v2413_v4  ;;  %v10009_v10 = vand.u32 2147483647, %v9994_v29  ;;  %v8769_v23 = vshll.u32 %v2551_v18, 8  ;;  %v2556_v42 = vshrl.u32 %v2555_v61, 5 }
 0x24f   :  { %v2500_v9 = vadd.s32 536870912, %v2499_v59  ;;  %v2560_v7 = vshll.u32 %v9786_v37, %v2557_v44  ;;  %v2561_v24 = vshrl.u32 %v9834_v1, %v2558_v51  ;;  %vm2326_vm12 = vcmp.lt.s32.totalorder %v8634_v32, 2 }
 0x250   :  { %vm8765_vm15 = vcmp.le.f32.partialorder %v10009_v10, 0.7853982  ;;  %v2332_v62 = vsel %vm2330_vm3, %v9749_v17, %v8752_v43  ;;  %v2415_v20 = vand.u32 2147483647, %v2414_v48  ;;  %v2563_v3 = vshll.u32 %v9834_v1, %v2557_v44 }
 0x251   :  { %v2564_v53 = vshrl.u32 %v9835_v33, %v2558_v51  ;;  %v2329_v61 = vsel %vm2327_vm2, %v8742_v45, %v9758_v31  ;;  %v2501_v25 = vshrl.u32 %v2500_v9, 30  ;;  %v2566_v18 = vshll.u32 %v9835_v33, %v2557_v44 }
 0x252   :  { %v2567_v30 = vshrl.u32 %v9832_v41, %v2558_v51  ;;  %v2418_v4 = vmul.f32 %v2417_v63, %v2415_v20  ;;  %v2559_v0 = vshrl.u32 %v9786_v37, %v2558_v51  ;;  %v2569_v48 = vshll.u32 %v9832_v41, %v2557_v44 }
 0x253   :  { %v2570_v10 = vshrl.u32 %v9795_v2, %v2558_v51  ;;  %v2502_v17 = vshll.u32 %v2501_v25, 30  ;;  %v2525_v8 = vsub.s32 4, %v2501_v25  ;;  %v2562_v35 = vor.u32 %v2561_v24, %v2560_v7 }
 0x254   :  { %v2572_v43 = vshll.u32 %v9795_v2, %v2557_v44  ;;  %v2419_v5 = vxor.u32 2147483648, %v2418_v4  ;;  %v2565_v55 = vor.u32 %v2564_v53, %v2563_v3  ;;  %v2573_v9 = vshrl.u32 %v9796_v22, %v2558_v51 }
 0x255   :  { %v2571_v31 = vor.u32 %v2570_v10, %v2569_v48  ;;  %vm9771_vm13 = vweird.f32 %v9974_v50  ;;  %v8794_v45 = vsub.s32 %v2499_v59, %v2502_v17  ;;  %v2526_v63 = vsel %vm2441_vm11, %v2525_v8, %v2501_v25 }
 0x256   :  { %v2568_v20 = vor.u32 %v2567_v30, %v2566_v18  ;;  %vm2575_vm2 = vcmp.lt.s32.totalorder %v2556_v42, 1  ;;  %v2420_v16 = vsel %vm2337_vm10, %v2419_v5, %v2418_v4  ;;  %v2574_v7 = vor.u32 %v2573_v9, %v2572_v43 }
 0x257   :  { %vm2576_vm3 = vcmp.lt.s32.totalorder %v2556_v42, 2  ;;  %vm2578_vm5 = vcmp.lt.s32.totalorder %v2556_v42, 4  ;;  %v2423_v44 = vsel %vm8691_vm1, %v9982_v34, %v2420_v16  ;;  %v2505_v51 = vsub.s32 0, %v8794_v45 }
 0x258   :  { %v8806_v17 = vsel %vm8765_vm15, 0, %v2526_v63  ;;  %vm2577_vm4 = vcmp.lt.s32.totalorder %v2556_v42, 3  ;;  %5898 = vcosq.f32 %v2423_v44  ;;  %v2579_v8 = vsel %vm2575_vm2, %v2559_v0, %v2562_v35 }
 0x259   :  { %v2580_v59 = vsel %vm2578_vm5, %v2568_v20, 2102212464  ;;  %v2584_v24 = vsel %vm2578_vm5, %v2571_v31, 920167782  ;;  %5900 = vsinq.f32 %v2423_v44  ;;  %v5598_v5 = vmin.u32 %v2505_v51, %v8794_v45 }
 0x25a   :  { %v2581_v43 = vsel %vm2577_vm4, %v2565_v55, %v2580_v59  ;;  %v2583_v60 = vsel %vm2575_vm2, %v2562_v35, %v2565_v55  ;;  %v2585_v16 = vsel %vm2577_vm4, %v2568_v20, %v2584_v24  ;;  %v2587_v3 = vsel %vm2575_vm2, %v2565_v55, %v2568_v20  ;;  %v8844_v59 = vpop.permute.xlu0 %222 }
 0x25b   :  { %v2588_v53 = vsel %vm2578_vm5, %v2574_v7, 1326507024  ;;  %v9766_v25 = vand.u32 2147483647, %v9879_v52  ;;  %v2333_v18 = vsel %vm2326_vm12, %v2329_v61, %v2332_v62  ;;  %v8817_v30 = vand.u32 3, %v2428_v11 }
 0x25c   :  { %v2507_v4 = vclz %v5598_v5  ;;  %v2532_v0 = vadd.s32 3, %v8806_v17  ;;  %v2582_v48 = vsel %vm2576_vm3, %v2579_v8, %v2581_v43  ;;  %v2586_v10 = vsel %vm2576_vm3, %v2583_v60, %v2585_v16 }
 0x25d   :  { %v2589_v35 = vsel %vm2577_vm4, %v2571_v31, %v2588_v53  ;;  %v2650_v9 = vand.u32 2139095040, %v9879_v52  ;;  %v8826_v20 = vmul.u32.u64.low %v8769_v23, %v2586_v10  ;;  %v8827_v32 = vmul.u32.u64.high %v8769_v23, %v2586_v10, %v8826_v20 }
 0x25e   :  { %v5599_v55 = vadd.s32 4294967294, %v2507_v4  ;;  %v2590_v63 = vsel %vm2576_vm3, %v2587_v3, %v2589_v35  ;;  %v2654_v7 = vand.u32 8388607, %v9766_v25  ;;  %vm2431_vm10 = vcmp.eq.s32.totalorder %v8817_v30, 0 }
 0x25f   :  { %v8830_v11 = vmul.u32.u64.low %v8769_v23, %v2590_v63  ;;  %v8831_v62 = vmul.u32.u64.high %v8769_v23, %v2590_v63, %v8830_v11  ;;  %v2651_v61 = vshrl.u32 %v2650_v9, 23  ;;  %vm2434_vm4 = vcmp.eq.s32.totalorder %v8817_v30, 2 }
 0x260   :  { %v2495_v31 = vadd.s32 %v8721_v49, %v8734_v27  ;;  %vm5600_vm1 = vcmp.lt.s32.totalorder %v5599_v55, 0  ;;  %v8841_v42 = vsel %vm9771_vm13, nan, %v2333_v18  ;;  %v2598_v51 = vmul.u32 %v8769_v23, %v2582_v48  ;;  %v10015_v11 = vld [vmem:[#allocation12_spill] sm:$0xff] }
 0x261   :  { %v2510_v44 = vsel %vm5600_vm1, 0, %v5599_v55  ;;  %v5605_v8 = vadd.s32 4294967169, %v2651_v61  ;;  %vm2430_vm12 = vcmp.lt.s32.totalorder %v8817_v30, 2  ;;  %v2601_v60 = vadd.s32 1, %v8827_v32 }
 0x262   :  { %v2511_v24 = vsub.s32 32, %v2510_v44  ;;  %v2512_v5 = vshll.u32 %v8794_v45, %v2510_v44  ;;  %v2515_v43 = vsub.s32 4294967266, %v2510_v44  ;;  %v8849_v49 = vpop.eup %5898  ;;  %v8851_v27 = vand.u32 3, %v2532_v0  ;;  %v10014_v0 = vld [vmem:[#allocation28_spill] sm:$0xff]  ;;  %v10016_v44 = vld [vmem:[#allocation41_spill] sm:$0xff] }
 0x263   :  { %10012 = vst [vmem:[#allocation90_spill] sm:$0xff] %v8849_v49  ;;  %vm2600_vm2 = vc.u32 %v8831_v62, %v8826_v20  ;;  %v2655_v16 = vor.u32 8388608, %v2654_v7  ;;  %v2657_v3 = vadd.s32 1, %v5605_v8  ;;  %v8854_v23 = vpop.eup %5900  ;;  %v9764_v53 = vxor.u32 2147483648, %v8849_v49 }
 0x264   :  { %10013 = vst [vmem:[#allocation91_spill] sm:$0xff] %v8854_v23  ;;  %v2513_v18 = vshrl.u32 %v2495_v31, %v2511_v24  ;;  %v2516_v4 = vadd.s32 127, %v2515_v43  ;;  %v2602_v48 = vsel %vm2600_vm2, %v2601_v60, %v8827_v32  ;;  %v9765_v45 = vxor.u32 2147483648, %v8854_v23 }
 0x265   :  { %vm2545_vm3 = vcmp.lt.s32.totalorder %v9876_v19, 0  ;;  %v2603_v10 = vadd.s32 %v2602_v48, %v2598_v51  ;;  %vm2658_vm5 = vcmp.gt.s32.totalorder %v2657_v3, 0  ;;  %v8862_v35 = vmul.f32 %v10014_v0, %v8844_v59 }
 0x266   :  { %v2514_v9 = vor.u32 %v2513_v18, %v2512_v5  ;;  %v2517_v55 = vshll.u32 %v2516_v4, 23  ;;  %v2659_v63 = vsel %vm2658_vm5, %v2657_v3, 0  ;;  %v8866_v61 = vmul.f32 %v10015_v11, %v8844_v59 }
 0x267   :  { %v8869_v7 = vadd.s32 %v8826_v20, %v8831_v62  ;;  %v2604_v32 = vadd.s32 536870912, %v2603_v10  ;;  %v2661_v31 = vand.u32 31, %v2659_v63  ;;  %v8873_v51 = vmul.f32 %v10016_v44, %v8844_v59 }
 0x268   :  { %v2436_v8 = vsel %vm2434_vm4, %v9764_v53, %v8854_v23  ;;  %v2518_v24 = vor.u32 4788187, %v2517_v55  ;;  %v2521_v5 = vcvt.s32.f32 %v2514_v9  ;;  %v10017_v43 = vand.u32 2147483647, %v9876_v19 }
 0x269   :  { %v8886_v20 = vshll.u32 %v2655_v16, 8  ;;  %v2433_v62 = vsel %vm2431_vm10, %v8849_v49, %v9765_v45  ;;  %v2605_v3 = vshrl.u32 %v2604_v32, 30  ;;  %v2660_v18 = vshrl.u32 %v2659_v63, 5 }
 0x26a   :  { %vm8882_vm1 = vcmp.le.f32.partialorder %v10017_v43, 0.7853982  ;;  %v2662_v4 = vsub.s32 32, %v2661_v31  ;;  %v2519_v48 = vand.u32 2147483647, %v2518_v24  ;;  %v2664_v0 = vshll.u32 %v9786_v37, %v2661_v31 }
 0x26b   :  { %v2667_v9 = vshll.u32 %v9834_v1, %v2661_v31  ;;  %v2670_v55 = vshll.u32 %v9835_v33, %v2661_v31  ;;  %vm9773_vm4 = vweird.f32 %v9982_v34  ;;  %v2606_v16 = vshll.u32 %v2605_v3, 30 }
 0x26c   :  { %v2629_v11 = vsub.s32 4, %v2605_v3  ;;  %v2665_v44 = vshrl.u32 %v9834_v1, %v2662_v4  ;;  %v2673_v43 = vshll.u32 %v9832_v41, %v2661_v31  ;;  %v2522_v53 = vmul.f32 %v2521_v5, %v2519_v48 }
 0x26d   :  { %v2668_v32 = vshrl.u32 %v9835_v33, %v2662_v4  ;;  %v2671_v63 = vshrl.u32 %v9832_v41, %v2662_v4  ;;  %v2674_v24 = vshrl.u32 %v9795_v2, %v2662_v4  ;;  %v2437_v45 = vsel %vm2430_vm12, %v2433_v62, %v2436_v8  ;;  %v10020_v41 = vld [vmem:[#allocation49_spill] sm:$0xff] }
 0x26e   :  { %v8904_v25 = vsub.s32 %v2603_v10, %v2606_v16  ;;  %v2676_v49 = vshll.u32 %v9795_v2, %v2661_v31  ;;  %v8909_v23 = vmul.f32 %v7295_v14, %v8844_v59  ;;  %v2523_v1 = vxor.u32 2147483648, %v2522_v53 }
 0x26f   :  { %v2630_v5 = vsel %vm2545_vm3, %v2629_v11, %v2605_v3  ;;  %v2663_v33 = vshrl.u32 %v9786_v37, %v2662_v4  ;;  %v8916_v48 = vmul.f32 %v10020_v41, %v8844_v59  ;;  %v2666_v10 = vor.u32 %v2665_v44, %v2664_v0 }
 0x270   :  { %v2609_v30 = vsub.s32 0, %v8904_v25  ;;  %v2669_v8 = vor.u32 %v2668_v32, %v2667_v9  ;;  %v2677_v2 = vshrl.u32 %v9796_v22, %v2662_v4  ;;  %v2524_v14 = vsel %vm2441_vm11, %v2523_v1, %v2522_v53 }
 0x271   :  { %v2672_v31 = vor.u32 %v2671_v63, %v2670_v55  ;;  %v2675_v62 = vor.u32 %v2674_v24, %v2673_v43  ;;  %vm2679_vm10 = vcmp.lt.s32.totalorder %v2660_v18, 1  ;;  %v2527_v37 = vsel %vm8765_vm15, %v9994_v29, %v2524_v14 }
 0x272   :  { %v5602_v3 = vmin.u32 %v2609_v30, %v8904_v25  ;;  %v8928_v16 = vsel %vm8882_vm1, 0, %v2630_v5  ;;  %v2678_v0 = vor.u32 %v2677_v2, %v2676_v49  ;;  %5902 = vcosq.f32 %v2527_v37 }
 0x273   :  { %vm2680_vm12 = vcmp.lt.s32.totalorder %v2660_v18, 2  ;;  %vm2681_vm2 = vcmp.lt.s32.totalorder %v2660_v18, 3  ;;  %vm2682_vm5 = vcmp.lt.s32.totalorder %v2660_v18, 4  ;;  %5904 = vsinq.f32 %v2527_v37 }
 0x274   :  { %v2611_v22 = vclz %v5602_v3  ;;  %v2683_v53 = vsel %vm2679_vm10, %v2663_v33, %v2666_v10  ;;  %v2687_v4 = vsel %vm2679_vm10, %v2666_v10, %v2669_v8  ;;  %vm2538_vm11 = vcmp.eq.s32.totalorder %v8851_v27, 2  ;;  %v8944_v33 = vpop.permute.xlu0 %227 }
 0x275   :  { %v2636_v12 = vadd.s32 3, %v8928_v16  ;;  %v2684_v9 = vsel %vm2682_vm5, %v2672_v31, 2102212464  ;;  %v2688_v55 = vsel %vm2682_vm5, %v2675_v62, 920167782  ;;  %v2691_v11 = vsel %vm2679_vm10, %v2669_v8, %v2672_v31 }
 0x276   :  { %vm2535_vm15 = vcmp.eq.s32.totalorder %v8851_v27, 0  ;;  %v5603_v49 = vadd.s32 4294967294, %v2611_v22  ;;  %v2685_v44 = vsel %vm2681_vm2, %v2669_v8, %v2684_v9  ;;  %v2689_v43 = vsel %vm2681_vm2, %v2672_v31, %v2688_v55 }
 0x277   :  { %v2692_v32 = vsel %vm2682_vm5, %v2678_v0, 1326507024  ;;  %v2438_v63 = vsel %vm9773_vm4, nan, %v2437_v45  ;;  %vm2534_vm13 = vcmp.lt.s32.totalorder %v8851_v27, 2  ;;  %v2686_v24 = vsel %vm2680_vm12, %v2683_v53, %v2685_v44  ;;  %v10097_v44 = vld [vmem:[#allocation62_spill] sm:$0xff] }
 0x278   :  { %v2690_v1 = vsel %vm2680_vm12, %v2687_v4, %v2689_v43  ;;  %v2693_v5 = vsel %vm2681_vm2, %v2675_v62, %v2692_v32  ;;  %vm5604_vm10 = vcmp.lt.s32.totalorder %v5603_v49, 0  ;;  %vm9772_vm5 = vweird.f32 %v9994_v29 }
 0x279   :  { %v2694_v41 = vsel %vm2680_vm12, %v2691_v11, %v2693_v5  ;;  %v8948_v30 = vmul.u32.u64.low %v8886_v20, %v2690_v1  ;;  %v8949_v10 = vmul.u32.u64.high %v8886_v20, %v2690_v1, %v8948_v30  ;;  %v2614_v45 = vsel %vm5604_vm10, 0, %v5603_v49 }
 0x27a   :  { %v8953_v8 = vand.u32 3, %v2636_v12  ;;  %v8956_v2 = vmul.u32.u64.low %v8886_v20, %v2694_v41  ;;  %v8957_v14 = vmul.u32.u64.high %v8886_v20, %v2694_v41, %v8956_v2  ;;  %v2615_v31 = vsub.s32 32, %v2614_v45 }
 0x27b   :  { %v2616_v62 = vshll.u32 %v8904_v25, %v2614_v45  ;;  %v2619_v37 = vsub.s32 4294967266, %v2614_v45  ;;  %v8962_v18 = vmul.f32 %v7674_v57, %v8844_v59  ;;  %v2702_v3 = vmul.u32 %v8886_v20, %v2686_v24 }
 0x27c   :  { %v8967_v0 = vmul.f32 %v7678_v15, %v8844_v59  ;;  %v8971_v22 = vmul.f32 %v7682_v28, %v8844_v59  ;;  %v8975_v53 = vmul.f32 %v7928_v58, %v8944_v33  ;;  %v2617_v25 = vshrl.u32 %v8869_v7, %v2615_v31  ;;  %v8983_v12 = vpop.eup %5902 }
 0x27d   :  { %v2620_v4 = vadd.s32 127, %v2619_v37  ;;  %v2705_v57 = vadd.s32 1, %v8949_v10  ;;  %v8981_v20 = vmul.f32 %v7933_v56, %v8944_v33  ;;  %vm2704_vm12 = vc.u32 %v8957_v14, %v8948_v30  ;;  %v8999_v7 = vpop.eup %5904  ;;  %v9001_v56 = vpop.permute.xlu1 %232 }
 0x27e   :  { %v8989_v15 = vmul.f32 %v7937_v26, %v8944_v33  ;;  %v8993_v28 = vmul.f32 %v8252_v40, %v8944_v33  ;;  %v8997_v58 = vmul.f32 %v8257_v13, %v8944_v33  ;;  %v2539_v9 = vxor.u32 2147483648, %v8983_v12 }
 0x27f   :  { %v2618_v55 = vor.u32 %v2617_v25, %v2616_v62  ;;  %v2621_v11 = vshll.u32 %v2620_v4, 23  ;;  %vm2649_vm2 = vcmp.lt.s32.totalorder %v9879_v52, 0  ;;  %v2706_v26 = vsel %vm2704_vm12, %v2705_v57, %v8949_v10 }
 0x280   :  { %v2536_v49 = vxor.u32 2147483648, %v8999_v7  ;;  %v10021_v40 = vand.u32 2147483647, %v9879_v52  ;;  %v2707_v13 = vadd.s32 %v2706_v26, %v2702_v3  ;;  %v9015_v43 = vmul.f32 %v8264_v54, %v8944_v33 }
 0x281   :  { %v9019_v32 = vmul.f32 %v8383_v21, %v8944_v33  ;;  %v2540_v24 = vsel %vm2538_vm11, %v2539_v9, %v8999_v7  ;;  %v2622_v1 = vor.u32 4788187, %v2621_v11  ;;  %v2625_v5 = vcvt.s32.f32 %v2618_v55 }
 0x282   :  { %vm9009_vm10 = vcmp.le.f32.partialorder %v10021_v40, 0.7853982  ;;  %v9028_v41 = vmul.f32 %v8618_v46, %v8944_v33  ;;  %v2537_v54 = vsel %vm2535_vm15, %v8983_v12, %v2536_v49  ;;  %v2708_v21 = vadd.s32 536870912, %v2707_v13 }
 0x283   :  { %v9037_v10 = vmul.f32 %v8623_v47, %v9001_v56  ;;  %v9041_v45 = vmul.f32 %v8629_v39, %v9001_v56  ;;  %v2541_v2 = vsel %vm2534_vm13, %v2537_v54, %v2540_v24  ;;  %v2623_v46 = vand.u32 2147483647, %v2622_v1 }
 0x284   :  { %v9047_v31 = vmul.f32 %v8759_v38, %v9001_v56  ;;  %v9051_v62 = vmul.f32 %v8841_v42, %v9001_v56  ;;  %v2709_v37 = vshrl.u32 %v2708_v21, 30  ;;  %v9054_v47 = vmul.f32 %v2438_v63, %v9001_v56 }
 0x285   :  { %v2799_v3 = vrot.slane %v8862_v35, 5  ;;  %v2800_v39 = vrot.slane %v8866_v61, 5  ;;  %v2542_v27 = vsel %vm9772_vm5, nan, %v2541_v2  ;;  %v2626_v25 = vmul.f32 %v2625_v5, %v2623_v46 }
 0x286   :  { %v2801_v4 = vrot.slane %v8873_v51, 5  ;;  %v2802_v38 = vrot.slane %v8909_v23, 5  ;;  %v2710_v57 = vshll.u32 %v2709_v37, 30  ;;  %v2733_v55 = vsub.s32 4, %v2709_v37 }
 0x287   :  { %v2803_v42 = vrot.slane %v8916_v48, 5  ;;  %v2804_v11 = vrot.slane %v8962_v18, 5  ;;  %2863 = vst [vmem:[#allocation5] sm:$0xf8] %v2799_v3  ;;  %2864 = vst [vmem:[#allocation5 + $0x8] sm:$0xf8] %v2800_v39  ;;  %v2772_v60 = vmul.f32 %v2542_v27, %v9001_v56  ;;  %vm2635_vm4 = vweird.f32 %v9876_v19 }
 0x288   :  { %v2627_v63 = vxor.u32 2147483648, %v2626_v25  ;;  %v2805_v35 = vrot.slane %v8967_v0, 5  ;;  %v2806_v61 = vrot.slane %v8971_v22, 5  ;;  %v2807_v26 = vrot.slane %v8975_v53, 5  ;;  %2865 = vst [vmem:[#allocation5 + $0x10] sm:$0xf8] %v2801_v4 }
 0x289   :  { %2866 = vst [vmem:[#allocation5 + $0x18] sm:$0xf8] %v2802_v38  ;;  %v9067_v51 = vsub.s32 %v2707_v13, %v2710_v57  ;;  %v2734_v23 = vsel %vm2649_vm2, %v2733_v55, %v2709_v37  ;;  %v2809_v48 = vrot.slane %v8981_v20, 5  ;;  %v2811_v18 = vrot.slane %v8989_v15, 5  ;;  %2867 = vst [vmem:[#allocation5 + $0x20] sm:$0xf8] %v2803_v42 }
 0x28a   :  { %2868 = vst [vmem:[#allocation5 + $0x28] sm:$0xf8] %v2804_v11  ;;  %v2628_v0 = vsel %vm2545_vm3, %v2627_v63, %v2626_v25  ;;  %v9077_v22 = vsel %vm9009_vm10, 0, %v2734_v23  ;;  %vm10024_vm13 = vcmask 1042432   ;;  %v2813_v40 = vrot.slane %v8993_v28, 5 }
 0x28b   :  { %v2808_v53 = vsel %vm10024_vm13, %v2799_v3, %v2807_v26  ;;  %2869 = vst [vmem:[#allocation5 + $0x30] sm:$0xf8] %v2805_v35  ;;  %2870 = vst [vmem:[#allocation5 + $0x38] sm:$0xf8] %v2806_v61  ;;  %v2631_v20 = vsel %vm8882_vm1, %v9876_v19, %v2628_v0  ;;  %v2713_v15 = vsub.s32 0, %v9067_v51  ;;  %v2740_v13 = vadd.s32 3, %v9077_v22 }
 0x28c   :  { %vm10025_vm11 = vmmov %vm10024_vm13  ;;  %2871 = vst [vmem:[#allocation5 + $0x40] sm:$0xff] %v2808_v53  ;;  %5906 = vcosq.f32 %v2631_v20  ;;  %v2815_v28 = vrot.slane %v8997_v58, 5  ;;  %v2817_v21 = vrot.slane %v9015_v43, 5  ;;  %v2819_v46 = vrot.slane %v9019_v32, 5 }
 0x28d   :  { %v2810_v24 = vsel %vm10025_vm11, %v2800_v39, %v2809_v48  ;;  %vm10026_vm3 = vmmov %vm10025_vm11  ;;  %5908 = vsinq.f32 %v2631_v20  ;;  %v5606_v54 = vmin.u32 %v2713_v15, %v9067_v51  ;;  %v2821_v37 = vrot.slane %v9028_v41, 5  ;;  %v10040_v15 = vld [vmem:[#allocation16_spill] sm:$0xff] }
 0x28e   :  { %v2812_v1 = vsel %vm10026_vm3, %v2801_v4, %v2811_v18  ;;  %vm10027_vm15 = vmmov %vm10026_vm3  ;;  %2872 = vst [vmem:[#allocation5 + $0x48] sm:$0xff] %v2810_v24  ;;  %v2823_v3 = vrot.slane %v9037_v10, 5  ;;  %vm2639_vm12 = vcmp.eq.s32.totalorder %v8953_v8, 0  ;;  %vm2642_vm13 = vcmp.eq.s32.totalorder %v8953_v8, 2  ;;  %v10138_v41 = vld [vmem:[#allocation24_spill] sm:$0xff] }
 0x28f   :  { %v2814_v5 = vsel %vm10027_vm15, %v2802_v38, %v2813_v40  ;;  %2873 = vst [vmem:[#allocation5 + $0x50] sm:$0xff] %v2812_v1  ;;  %vm10028_vm1 = vmmov %vm10026_vm3  ;;  %v2703_v58 = vadd.s32 %v8948_v30, %v8957_v14  ;;  %v2715_v39 = vclz %v5606_v54  ;;  %v9101_v27 = vand.u32 3, %v2740_v13 }
 0x290   :  { %2874 = vst [vmem:[#allocation5 + $0x58] sm:$0xff] %v2814_v5  ;;  %v2816_v2 = vsel %vm10028_vm1, %v2803_v42, %v2815_v28  ;;  %vm2638_vm11 = vcmp.lt.s32.totalorder %v8953_v8, 2  ;;  %vm10029_vm3 = vmmov %vm10028_vm1  ;;  %v2822_v10 = vsel %vm10028_vm1, %v2806_v61, %v2821_v37  ;;  %v2825_v14 = vrot.slane %v9041_v45, 5  ;;  %v10054_v8 = vld [vmem:[#allocation37_spill] sm:$0xff] }
 0x291   :  { %2875 = vst [vmem:[#allocation5 + $0x60] sm:$0xff] %v2816_v2  ;;  %v2818_v43 = vsel %vm10029_vm3, %v2804_v11, %v2817_v21  ;;  %vm10030_vm15 = vmmov %vm10028_vm1  ;;  %v5607_v30 = vadd.s32 4294967294, %v2715_v39  ;;  %v2827_v38 = vrot.slane %v9047_v31, 5  ;;  %v2829_v57 = vrot.slane %v9051_v62, 5  ;;  %v10032_v11 = vld [vmem:[#allocation15_spill] sm:$0xff]  ;;  %v10042_v2 = vld [vmem:[#allocation36_spill] sm:$0xff] }
 0x292   :  { %v2820_v25 = vsel %vm10030_vm15, %v2805_v35, %v2819_v46  ;;  %vm10031_vm5 = vmmov %vm10028_vm1  ;;  %2876 = vst [vmem:[#allocation5 + $0x68] sm:$0xff] %v2818_v43  ;;  %v2831_v55 = vrot.slane %v9054_v47, 5  ;;  %v2833_v42 = vrot.slane %v2772_v60, 5  ;;  %v2980_v63 = vand.u32 3, %v10032_v11  ;;  %v10033_v35 = vld [vmem:[#allocation14_spill] sm:$0xff]  ;;  %v10044_v39 = vld [vmem:[#allocation35_spill] sm:$0xff] }
 0x293   :  { %v2824_v4 = vsel %vm10031_vm5, %v2807_v26, %v2823_v3  ;;  %2877 = vst [vmem:[#allocation5 + $0x70] sm:$0xff] %v2820_v25  ;;  %2878 = vst [vmem:[#allocation5 + $0x78] sm:$0xff] %v2822_v10  ;;  %v3083_v61 = vand.u32 3, %v10033_v35  ;;  %vm5608_vm5 = vcmp.lt.s32.totalorder %v5607_v30, 0  ;;  %v2830_v31 = vsel %vm10028_vm1, %v2813_v40, %v2829_v57  ;;  %v10049_v11 = vld [vmem:[#allocation39_spill] sm:$0xff] }
 0x294   :  { %2879 = vst [vmem:[#allocation5 + $0x80] sm:$0x1f] %v2824_v4  ;;  %vm10034_vm3 = vmmov %vm10028_vm1  ;;  %v2718_v23 = vsel %vm5608_vm5, 0, %v5607_v30  ;;  %vm2981_vm9 = vcmp.lt.s32.totalorder %v2980_v63, 2  ;;  %v10043_v3 = vxor.u32 2147483648, %v10042_v2  ;;  %v10045_v4 = vld [vmem:[#allocation8_spill] sm:$0xff] }
 0x295   :  { %v2826_v26 = vsel %vm10034_vm3, %v2809_v48, %v2825_v14  ;;  %vm10035_vm15 = vmmov %vm10028_vm1  ;;  %2882 = vst [vmem:[#allocation5 + $0x98] sm:$0x1f] %v2830_v31  ;;  %v2719_v47 = vsub.s32 32, %v2718_v23  ;;  %v2720_v53 = vshll.u32 %v9067_v51, %v2718_v23  ;;  %v2723_v20 = vsub.s32 4294967266, %v2718_v23 }
 0x296   :  { %v2828_v45 = vsel %vm10035_vm15, %v2811_v18, %v2827_v38  ;;  %vm10036_vm14 = vmmov %vm10028_vm1  ;;  %2880 = vst [vmem:[#allocation5 + $0x88] sm:$0x1f] %v2826_v26  ;;  %vm2982_vm3 = vcmp.eq.s32.totalorder %v2980_v63, 0  ;;  %v9125_v48 = vpop.eup %5906  ;;  %v10038_v18 = vld [vmem:[#allocation17_spill] sm:$0xff]  ;;  %vm3084_vm5 = vcmp.lt.s32.totalorder %v3083_v61, 2  ;;  %v10041_v51 = vxor.u32 2147483648, %v10040_v15 }
 0x297   :  { %v2832_v62 = vsel %vm10036_vm14, %v2815_v28, %v2831_v55  ;;  %vm10037_vm8 = vmmov %vm10028_vm1  ;;  %2881 = vst [vmem:[#allocation5 + $0x90] sm:$0x1f] %v2828_v45  ;;  %v10039_v40 = vxor.u32 2147483648, %v10038_v18  ;;  %vm2985_vm14 = vcmp.eq.s32.totalorder %v2980_v63, 2  ;;  %v9130_v24 = vpop.eup %5908  ;;  %v2643_v1 = vxor.u32 2147483648, %v9125_v48  ;;  %v10048_v55 = vld [vmem:[#allocation19_spill] sm:$0xff] }
 0x298   :  { %v2834_v0 = vsel %vm10037_vm8, %v2817_v21, %v2833_v42  ;;  %2883 = vst [vmem:[#allocation5 + $0xa0] sm:$0x1f] %v2832_v62  ;;  %vm3085_vm8 = vcmp.eq.s32.totalorder %v3083_v61, 0  ;;  %v2721_v5 = vshrl.u32 %v2703_v58, %v2719_v47  ;;  %v2724_v28 = vadd.s32 127, %v2723_v20  ;;  %v10050_v62 = vld [vmem:[#allocation9_spill] sm:$0xff]  ;;  %v10052_v20 = vld [vmem:[#allocation38_spill] sm:$0xff] }
 0x299   :  { %2884 = vst [vmem:[#allocation5 + $0xa8] sm:$0x1f] %v2834_v0  ;;  %v2984_v13 = vsel %vm2982_vm3, %v10040_v15, %v10039_v40  ;;  %v2987_v54 = vsel %vm2985_vm14, %v10041_v51, %v10038_v18  ;;  %v2640_v60 = vxor.u32 2147483648, %v9130_v24  ;;  %v3087_v43 = vsel %vm3085_vm8, %v10044_v39, %v10043_v3  ;;  %v10056_v51 = vld [vmem:[#allocation43_spill] sm:$0xff]  ;;  %v10059_v3 = vld [vmem:[#allocation10_spill] sm:$0xff] }
 0x29a   :  { %v2988_v21 = vsel %vm2981_vm9, %v2984_v13, %v2987_v54  ;;  %vm3088_vm15 = vcmp.eq.s32.totalorder %v3083_v61, 2  ;;  %v2644_v58 = vsel %vm2642_vm13, %v2643_v1, %v9130_v24  ;;  %v2722_v25 = vor.u32 %v2721_v5, %v2720_v53 }
 0x29b   :  { %v2725_v10 = vshll.u32 %v2724_v28, 23  ;;  %vm10046_vm1 = vweird.f32 %v10045_v4  ;;  %v2641_v14 = vsel %vm2639_vm12, %v9125_v48, %v2640_v60  ;;  %v10047_v38 = vxor.u32 2147483648, %v10044_v39  ;;  %v10063_v4 = vld [vmem:[#allocation46_spill] sm:$0xff] }
 0x29c   :  { %v9148_v30 = vsel %vm10046_vm1, nan, %v2988_v21  ;;  %v3186_v42 = vand.u32 3, %v10048_v55  ;;  %v3289_v63 = vand.u32 3, %v10049_v11  ;;  %v2645_v35 = vsel %vm2638_vm11, %v2641_v14, %v2644_v58  ;;  %v10058_v21 = vld [vmem:[#allocation42_spill] sm:$0xff] }
 0x29d   :  { %v3090_v57 = vsel %vm3088_vm15, %v10047_v38, %v10042_v2  ;;  %v2726_v26 = vor.u32 4788187, %v2725_v10  ;;  %v2729_v45 = vcvt.s32.f32 %v2722_v25  ;;  %v2646_v23 = vsel %vm2635_vm4, nan, %v2645_v35  ;;  %v10062_v25 = vld [vmem:[#allocation40_spill] sm:$0xff] }
 0x29e   :  { %v3091_v31 = vsel %vm3084_vm5, %v3087_v43, %v3090_v57  ;;  %vm10051_vm9 = vweird.f32 %v10050_v62  ;;  %vm3187_vm12 = vcmp.lt.s32.totalorder %v3186_v42, 2  ;;  %vm3188_vm13 = vcmp.eq.s32.totalorder %v3186_v42, 0 }
 0x29f   :  { %v9167_v0 = vsel %vm10051_vm9, nan, %v3091_v31  ;;  %v2727_v47 = vand.u32 2147483647, %v2726_v26  ;;  %v2773_v53 = vmul.f32 %v2646_v23, %v9001_v56  ;;  %v10053_v18 = vxor.u32 2147483648, %v10052_v20  ;;  %v10070_v23 = vld [vmem:[#allocation44_spill] sm:$0xff] }
 0x2a0   :  { %vm3191_vm11 = vcmp.eq.s32.totalorder %v3186_v42, 2  ;;  %v10055_v61 = vxor.u32 2147483648, %v10054_v8  ;;  %vm3290_vm3 = vcmp.lt.s32.totalorder %v3289_v63, 2  ;;  %vm3291_vm14 = vcmp.eq.s32.totalorder %v3289_v63, 0  ;;  %v10065_v42 = vld [vmem:[#allocation47_spill] sm:$0xff] }
 0x2a1   :  { %v3190_v40 = vsel %vm3188_vm13, %v10054_v8, %v10053_v18  ;;  %vm3294_vm5 = vcmp.eq.s32.totalorder %v3289_v63, 2  ;;  %v2730_v13 = vmul.f32 %v2729_v45, %v2727_v47  ;;  %v2835_v5 = vrot.slane %v2773_v53, 5  ;;  %v10066_v63 = vld [vmem:[#allocation13_spill] sm:$0xff]  ;;  %v10074_v8 = vld [vmem:[#allocation50_spill] sm:$0xff] }
 0x2a2   :  { %v3193_v15 = vsel %vm3191_vm11, %v10055_v61, %v10052_v20  ;;  %v10057_v54 = vxor.u32 2147483648, %v10056_v51  ;;  %vm10060_vm8 = vweird.f32 %v10059_v3  ;;  %v10061_v43 = vxor.u32 2147483648, %v10058_v21  ;;  %v10068_v45 = vld [vmem:[#allocation45_spill] sm:$0xff]  ;;  %v10072_v20 = vld [vmem:[#allocation26_spill] sm:$0xff]  ;;  %v10076_v61 = vld [vmem:[#allocation48_spill] sm:$0xff] }
 0x2a3   :  { %v3194_v28 = vsel %vm3187_vm12, %v3190_v40, %v3193_v15  ;;  %v3392_v10 = vand.u32 3, %v10062_v25  ;;  %v3495_v14 = vand.u32 3, %v10063_v4  ;;  %v2731_v38 = vxor.u32 2147483648, %v2730_v13  ;;  %v10084_v4 = vld [vmem:[#allocation54_spill] sm:$0xff] }
 0x2a4   :  { %v3293_v2 = vsel %vm3291_vm14, %v10058_v21, %v10057_v54  ;;  %v9181_v39 = vsel %vm10060_vm8, nan, %v3194_v28  ;;  %v3296_v58 = vsel %vm3294_vm5, %v10061_v43, %v10056_v51  ;;  %vm10064_vm15 = vcmask 1042432   ;;  %v10079_v54 = vld [vmem:[#allocation53_spill] sm:$0xff]  ;;  %v10082_v43 = vld [vmem:[#allocation51_spill] sm:$0xff] }
 0x2a5   :  { %v2836_v57 = vsel %vm10064_vm15, %v2819_v46, %v2835_v5  ;;  %v3297_v55 = vsel %vm3290_vm3, %v3293_v2, %v3296_v58  ;;  %v3598_v11 = vand.u32 3, %v10065_v42  ;;  %vm10067_vm1 = vweird.f32 %v10066_v63  ;;  %v10081_v2 = vld [vmem:[#allocation52_spill] sm:$0xff] }
 0x2a6   :  { %2885 = vst [vmem:[#allocation5 + $0xb0] sm:$0x1f] %v2836_v57  ;;  %v9194_v35 = vsel %vm10067_vm1, nan, %v3297_v55  ;;  %vm3393_vm9 = vcmp.lt.s32.totalorder %v3392_v10, 2  ;;  %vm3394_vm12 = vcmp.eq.s32.totalorder %v3392_v10, 0  ;;  %vm3397_vm13 = vcmp.eq.s32.totalorder %v3392_v10, 2 }
 0x2a7   :  { %v2732_v26 = vsel %vm2649_vm2, %v2731_v38, %v2730_v13  ;;  %v10069_v31 = vxor.u32 2147483648, %v10068_v45  ;;  %v10071_v46 = vxor.u32 2147483648, %v10070_v23  ;;  %vm3496_vm11 = vcmp.lt.s32.totalorder %v3495_v14, 2  ;;  %v10085_v38 = vld [vmem:[#allocation57_spill] sm:$0xff]  ;;  %v10086_v55 = vld [vmem:[#allocation60_spill] sm:$0xff] }
 0x2a8   :  { %v2735_v47 = vsel %vm9009_vm10, %v9879_v52, %v2732_v26  ;;  %vm3497_vm3 = vcmp.eq.s32.totalorder %v3495_v14, 0  ;;  %vm3500_vm14 = vcmp.eq.s32.totalorder %v3495_v14, 2  ;;  %vm10073_vm5 = vweird.f32 %v10072_v20 }
 0x2a9   :  { %v3396_v32 = vsel %vm3394_vm12, %v10070_v23, %v10069_v31  ;;  %v3399_v62 = vsel %vm3397_vm13, %v10071_v46, %v10068_v45  ;;  %5910 = vcosq.f32 %v2735_v47  ;;  %v10075_v40 = vxor.u32 2147483648, %v10074_v8  ;;  %v10088_v45 = vld [vmem:[#allocation56_spill] sm:$0xff]  ;;  %v10090_v23 = vld [vmem:[#allocation55_spill] sm:$0xff] }
 0x2aa   :  { %v3400_v53 = vsel %vm3393_vm9, %v3396_v32, %v3399_v62  ;;  %v10077_v13 = vxor.u32 2147483648, %v10076_v61  ;;  %5912 = vsinq.f32 %v2735_v47  ;;  %vm3599_vm2 = vcmp.lt.s32.totalorder %v3598_v11, 2 }
 0x2ab   :  { %v9209_v18 = vsel %vm10073_vm5, nan, %v3400_v53  ;;  %v3499_v15 = vsel %vm3497_vm3, %v10076_v61, %v10075_v40  ;;  %vm3600_vm10 = vcmp.eq.s32.totalorder %v3598_v11, 0  ;;  %vm2746_vm8 = vcmp.eq.s32.totalorder %v9101_v27, 2  ;;  %v10095_v61 = vld [vmem:[#allocation58_spill] sm:$0xff] }
 0x2ac   :  { %v3502_v5 = vsel %vm3500_vm14, %v10077_v13, %v10074_v8  ;;  %v10080_v21 = vxor.u32 2147483648, %v10079_v54  ;;  %vm3603_vm15 = vcmp.eq.s32.totalorder %v3598_v11, 2  ;;  %v3701_v58 = vand.u32 3, %v10082_v43  ;;  %v10093_v8 = vld [vmem:[#allocation59_spill] sm:$0xff] }
 0x2ad   :  { %v3503_v28 = vsel %vm3496_vm11, %v3499_v15, %v3502_v5  ;;  %vm2743_vm1 = vcmp.eq.s32.totalorder %v9101_v27, 0  ;;  %v10083_v25 = vxor.u32 2147483648, %v10081_v2  ;;  %v3804_v14 = vand.u32 3, %v10084_v4 }
 0x2ae   :  { %v9220_v51 = vsel %vm867_vm7, nan, %v3503_v28  ;;  %v3602_v3 = vsel %vm3600_vm10, %v10081_v2, %v10080_v21  ;;  %v3907_v57 = vand.u32 3, %v10085_v38  ;;  %v4010_v42 = vand.u32 3, %v10086_v55  ;;  %v10099_v21 = vld [vmem:[#allocation61_spill] sm:$0xff]  ;;  %v10105_v55 = vld [vmem:[#allocation63_spill] sm:$0xff] }
 0x2af   :  { %v3605_v10 = vsel %vm3603_vm15, %v10083_v25, %v10079_v54  ;;  %vm2742_vm7 = vcmp.lt.s32.totalorder %v9101_v27, 2  ;;  %vm3702_vm9 = vcmp.lt.s32.totalorder %v3701_v58, 2  ;;  %vm3703_vm12 = vcmp.eq.s32.totalorder %v3701_v58, 0 }
 0x2b0   :  { %v3606_v63 = vsel %vm3599_vm2, %v3602_v3, %v3605_v10  ;;  %vm3706_vm13 = vcmp.eq.s32.totalorder %v3701_v58, 2  ;;  %vm2739_vm11 = vweird.f32 %v9879_v52  ;;  %v10089_v31 = vxor.u32 2147483648, %v10088_v45  ;;  %v10100_v3 = vld [vmem:[#allocation32_spill] sm:$0xff] }
 0x2b1   :  { %v9237_v26 = vsel %vm971_vm6, nan, %v3606_v63  ;;  %v10091_v46 = vxor.u32 2147483648, %v10090_v23  ;;  %vm3805_vm3 = vcmp.lt.s32.totalorder %v3804_v14, 2  ;;  %vm3806_vm14 = vcmp.eq.s32.totalorder %v3804_v14, 0 }
 0x2b2   :  { %v3705_v32 = vsel %vm3703_vm12, %v10090_v23, %v10089_v31  ;;  %vm3809_vm5 = vcmp.eq.s32.totalorder %v3804_v14, 2  ;;  %vm3908_vm2 = vcmp.lt.s32.totalorder %v3907_v57, 2  ;;  %v10094_v40 = vxor.u32 2147483648, %v10093_v8  ;;  %v10103_v14 = vld [vmem:[#allocation64_spill] sm:$0xff] }
 0x2b3   :  { %v3708_v62 = vsel %vm3706_vm13, %v10091_v46, %v10088_v45  ;;  %v10096_v13 = vxor.u32 2147483648, %v10095_v61  ;;  %vm3909_vm6 = vcmp.eq.s32.totalorder %v3907_v57, 0  ;;  %v10098_v54 = vxor.u32 2147483648, %v10097_v44  ;;  %v9265_v10 = vpop.eup %5910  ;;  %v10107_v45 = vld [vmem:[#allocation65_spill] sm:$0xff] }
 0x2b4   :  { %v3709_v47 = vsel %vm3702_vm9, %v3705_v32, %v3708_v62  ;;  %v3808_v15 = vsel %vm3806_vm14, %v10095_v61, %v10094_v40  ;;  %vm3912_vm10 = vcmp.eq.s32.totalorder %v3907_v57, 2  ;;  %vm4011_vm15 = vcmp.lt.s32.totalorder %v4010_v42, 2  ;;  %v9274_v23 = vpop.eup %5912  ;;  %v10108_v46 = vld [vmem:[#allocation33_spill] sm:$0xff]  ;;  %v10111_v40 = vld [vmem:[#allocation34_spill] sm:$0xff] }
 0x2b5   :  { %v9247_v20 = vsel %vm1075_vm0, nan, %v3709_v47  ;;  %v3811_v5 = vsel %vm3809_vm5, %v10096_v13, %v10093_v8  ;;  %v3911_v2 = vsel %vm3909_vm6, %v10099_v21, %v10098_v54  ;;  %vm10101_vm9 = vweird.f32 %v10100_v3  ;;  %v10110_v47 = vld [vmem:[#allocation66_spill] sm:$0xff]  ;;  %v10113_v13 = vld [vmem:[#allocation68_spill] sm:$0xff] }
 0x2b6   :  { %v3812_v28 = vsel %vm3805_vm3, %v3808_v15, %v3811_v5  ;;  %v10102_v58 = vxor.u32 2147483648, %v10099_v21  ;;  %vm4012_vm0 = vcmp.eq.s32.totalorder %v4010_v42, 0  ;;  %vm4015_vm12 = vcmp.eq.s32.totalorder %v4010_v42, 2 }
 0x2b7   :  { %v9260_v43 = vsel %vm10101_vm9, nan, %v3812_v28  ;;  %v10104_v38 = vxor.u32 2147483648, %v10103_v14  ;;  %v10106_v57 = vxor.u32 2147483648, %v10105_v55  ;;  %v4113_v31 = vand.u32 3, %v10107_v45  ;;  %v10115_v28 = vld [vmem:[#allocation67_spill] sm:$0xff] }
 0x2b8   :  { %v3914_v25 = vsel %vm3912_vm10, %v10102_v58, %v10097_v44  ;;  %v2747_v32 = vxor.u32 2147483648, %v9265_v10  ;;  %vm10109_vm13 = vweird.f32 %v10108_v46  ;;  %v4216_v53 = vand.u32 3, %v10110_v47  ;;  %v10124_v47 = vld [vmem:[#allocation74_spill] sm:$0xff] }
 0x2b9   :  { %v3915_v4 = vsel %vm3908_vm2, %v3911_v2, %v3914_v25  ;;  %v4014_v63 = vsel %vm4012_vm0, %v10105_v55, %v10104_v38  ;;  %v4017_v11 = vsel %vm4015_vm12, %v10106_v57, %v10103_v14  ;;  %v2744_v8 = vxor.u32 2147483648, %v9274_v23  ;;  %v10117_v25 = vld [vmem:[#allocation71_spill] sm:$0xff]  ;;  %v10119_v14 = vld [vmem:[#allocation70_spill] sm:$0xff] }
 0x2ba   :  { %v9279_v42 = vsel %vm10109_vm13, nan, %v3915_v4  ;;  %v4018_v62 = vsel %vm4011_vm15, %v4014_v63, %v4017_v11  ;;  %vm10112_vm3 = vweird.f32 %v10111_v40  ;;  %vm4114_vm14 = vcmp.lt.s32.totalorder %v4113_v31, 2  ;;  %v10125_v40 = vld [vmem:[#allocation75_spill] sm:$0xff] }
 0x2bb   :  { %v9285_v61 = vsel %vm10112_vm3, nan, %v4018_v62  ;;  %vm4115_vm5 = vcmp.eq.s32.totalorder %v4113_v31, 0  ;;  %v2748_v15 = vsel %vm2746_vm8, %v2747_v32, %v9274_v23  ;;  %v10114_v5 = vxor.u32 2147483648, %v10113_v13 }
 0x2bc   :  { %vm4118_vm2 = vcmp.eq.s32.totalorder %v4113_v31, 2  ;;  %vm4217_vm6 = vcmp.lt.s32.totalorder %v4216_v53, 2  ;;  %v2745_v54 = vsel %vm2743_vm1, %v9265_v10, %v2744_v8  ;;  %v10116_v21 = vxor.u32 2147483648, %v10115_v28  ;;  %v10122_v31 = vld [vmem:[#allocation69_spill] sm:$0xff] }
 0x2bd   :  { %v4117_v44 = vsel %vm4115_vm5, %v10115_v28, %v10114_v5  ;;  %vm4218_vm10 = vcmp.eq.s32.totalorder %v4216_v53, 0  ;;  %vm4221_vm15 = vcmp.eq.s32.totalorder %v4216_v53, 2  ;;  %v2749_v3 = vsel %vm2742_vm7, %v2745_v54, %v2748_v15  ;;  %v10127_v28 = vld [vmem:[#allocation73_spill] sm:$0xff]  ;;  %v10129_v54 = vld [vmem:[#allocation72_spill] sm:$0xff] }
 0x2be   :  { %v4120_v2 = vsel %vm4118_vm2, %v10116_v21, %v10113_v13  ;;  %v10118_v4 = vxor.u32 2147483648, %v10117_v25  ;;  %v10120_v55 = vxor.u32 2147483648, %v10119_v14  ;;  %v2750_v57 = vsel %vm2739_vm11, nan, %v2749_v3  ;;  %v10126_v13 = vld [vmem:[#allocation79_spill] sm:$0xff] }
 0x2bf   :  { %v4121_v58 = vsel %vm4114_vm14, %v4117_v44, %v4120_v2  ;;  %vm10121_vm8 = vweird.f32 %v6754_v36  ;;  %v4319_v27 = vand.u32 3, %v10122_v31  ;;  %v2774_v46 = vmul.f32 %v2750_v57, %v9001_v56 }
 0x2c0   :  { %v4220_v38 = vsel %vm4218_vm10, %v10119_v14, %v10118_v4  ;;  %v4223_v63 = vsel %vm4221_vm15, %v10120_v55, %v10117_v25  ;;  %v9315_v11 = vsel %vm10121_vm8, nan, %v4121_v58  ;;  %vm10123_vm1 = vweird.f32 %v6798_v6  ;;  %v10132_v25 = vld [vmem:[#allocation18_spill] sm:$0xff]  ;;  %v10134_v14 = vld [vmem:[#allocation77_spill] sm:$0xff]  ;;  %v10136_v55 = vld [vmem:[#allocation76_spill] sm:$0xff] }
 0x2c1   :  { %v4224_v45 = vsel %vm4217_vm6, %v4220_v38, %v4223_v63  ;;  %v4422_v53 = vand.u32 3, %v10124_v47  ;;  %v4525_v15 = vand.u32 3, %v10125_v40  ;;  %vm4320_vm7 = vcmp.lt.s32.totalorder %v4319_v27, 2  ;;  %v10142_v47 = vld [vmem:[#allocation25_spill] sm:$0xff] }
 0x2c2   :  { %v9321_v62 = vsel %vm10123_vm1, nan, %v4224_v45  ;;  %vm4321_vm9 = vcmp.eq.s32.totalorder %v4319_v27, 0  ;;  %vm4324_vm0 = vcmp.eq.s32.totalorder %v4319_v27, 2  ;;  %v4628_v36 = vand.u32 3, %v10126_v13  ;;  %v10140_v27 = vld [vmem:[#allocation78_spill] sm:$0xff] }
 0x2c3   :  { %v2837_v5 = vrot.slane %v2774_v46, 5  ;;  %v10128_v44 = vxor.u32 2147483648, %v10127_v28  ;;  %v10130_v2 = vxor.u32 2147483648, %v10129_v54  ;;  %vm4423_vm12 = vcmp.lt.s32.totalorder %v4422_v53, 2 }
 0x2c4   :  { %vm4424_vm13 = vcmp.eq.s32.totalorder %v4422_v53, 0  ;;  %vm4427_vm3 = vcmp.eq.s32.totalorder %v4422_v53, 2  ;;  %vm4526_vm14 = vcmp.lt.s32.totalorder %v4525_v15, 2  ;;  %vm10131_vm5 = vcmask 1042432  }
 0x2c5   :  { %v4323_v21 = vsel %vm4321_vm9, %v10129_v54, %v10128_v44  ;;  %v4326_v6 = vsel %vm4324_vm0, %v10130_v2, %v10127_v28  ;;  %v2838_v58 = vsel %vm10131_vm5, %v2821_v37, %v2837_v5  ;;  %vm10133_vm2 = vweird.f32 %v10132_v25  ;;  %v10144_v28 = vld [vmem:[#allocation81_spill] sm:$0xff]  ;;  %v10146_v54 = vld [vmem:[#allocation23_spill] sm:$0xff] }
 0x2c6   :  { %v4327_v3 = vsel %vm4320_vm7, %v4323_v21, %v4326_v6  ;;  %v10135_v38 = vxor.u32 2147483648, %v10134_v14  ;;  %v10137_v57 = vxor.u32 2147483648, %v10136_v55  ;;  %2886 = vst [vmem:[#allocation5 + $0xb8] sm:$0x1f] %v2838_v58  ;;  %vm4527_vm6 = vcmp.eq.s32.totalorder %v4525_v15, 0  ;;  %v10148_v6 = vld [vmem:[#allocation11_spill] sm:$0xff] }
 0x2c7   :  { %v9337_v4 = vsel %vm10133_vm2, nan, %v4327_v3  ;;  %vm4530_vm10 = vcmp.eq.s32.totalorder %v4525_v15, 2  ;;  %vm4629_vm15 = vcmp.lt.s32.totalorder %v4628_v36, 2  ;;  %vm10139_vm8 = vweird.f32 %v10138_v41  ;;  %v10147_v15 = vld [vmem:[#allocation80_spill] sm:$0xff] }
 0x2c8   :  { %v4426_v63 = vsel %vm4424_vm13, %v10136_v55, %v10135_v38  ;;  %v4429_v45 = vsel %vm4427_vm3, %v10137_v57, %v10134_v14  ;;  %v10141_v46 = vxor.u32 2147483648, %v10140_v27  ;;  %v10143_v40 = vxor.u32 2147483648, %v10142_v47  ;;  %v10151_v14 = vld [vmem:[#allocation82_spill] sm:$0xff]  ;;  %v10152_v55 = vld [vmem:[#allocation27_spill] sm:$0xff] }
 0x2c9   :  { %v4430_v31 = vsel %vm4423_vm12, %v4426_v63, %v4429_v45  ;;  %vm4630_vm1 = vcmp.eq.s32.totalorder %v4628_v36, 0  ;;  %v10145_v44 = vxor.u32 2147483648, %v10144_v28  ;;  %vm4633_vm7 = vcmp.eq.s32.totalorder %v4628_v36, 2  ;;  %v10153_v45 = vld [vmem:[#allocation20_spill] sm:$0xff] }
 0x2ca   :  { %v9347_v37 = vsel %vm10139_vm8, nan, %v4430_v31  ;;  %v4529_v53 = vsel %vm4527_vm6, %v10142_v47, %v10141_v46  ;;  %v4532_v13 = vsel %vm4530_vm10, %v10143_v40, %v10140_v27  ;;  %v4731_v2 = vand.u32 3, %v10147_v15  ;;  %v10155_v31 = vld [vmem:[#allocation84_spill] sm:$0xff]  ;;  %v10157_v27 = vld [vmem:[#allocation83_spill] sm:$0xff] }
 0x2cb   :  { %v4533_v5 = vsel %vm4526_vm14, %v4529_v53, %v4532_v13  ;;  %v4632_v21 = vsel %vm4630_vm1, %v10146_v54, %v10145_v44  ;;  %vm10149_vm9 = vweird.f32 %v10148_v6  ;;  %v10150_v58 = vxor.u32 2147483648, %v10146_v54  ;;  %v10159_v13 = vld [vmem:[#allocation21_spill] sm:$0xff] }
 0x2cc   :  { %v9361_v3 = vsel %vm10149_vm9, nan, %v4533_v5  ;;  %v4834_v38 = vand.u32 3, %v10151_v14  ;;  %v4937_v63 = vand.u32 3, %v10152_v55  ;;  %vm4732_vm0 = vcmp.lt.s32.totalorder %v4731_v2, 2  ;;  %v10163_v54 = vld [vmem:[#allocation85_spill] sm:$0xff]  ;;  %v10167_v14 = vld [vmem:[#allocation87_spill] sm:$0xff] }
 0x2cd   :  { %v4635_v25 = vsel %vm4633_vm7, %v10150_v58, %v10144_v28  ;;  %vm4733_vm12 = vcmp.eq.s32.totalorder %v4731_v2, 0  ;;  %vm4736_vm13 = vcmp.eq.s32.totalorder %v4731_v2, 2  ;;  %vm10154_vm3 = vweird.f32 %v10153_v45  ;;  %v10161_v28 = vld [vmem:[#allocation86_spill] sm:$0xff]  ;;  %v10165_v58 = vld [vmem:[#allocation89_spill] sm:$0xff] }
 0x2ce   :  { %v4636_v57 = vsel %vm4629_vm15, %v4632_v21, %v4635_v25  ;;  %v10156_v41 = vxor.u32 2147483648, %v10155_v31  ;;  %v10158_v47 = vxor.u32 2147483648, %v10157_v27  ;;  %vm4835_vm14 = vcmp.lt.s32.totalorder %v4834_v38, 2  ;;  %v10169_v45 = vld [vmem:[#allocation22_spill] sm:$0xff] }
 0x2cf   :  { %v9370_v36 = vsel %vm10154_vm3, nan, %v4636_v57  ;;  %vm4836_vm5 = vcmp.eq.s32.totalorder %v4834_v38, 0  ;;  %vm4839_vm2 = vcmp.eq.s32.totalorder %v4834_v38, 2  ;;  %vm4938_vm6 = vcmp.lt.s32.totalorder %v4937_v63, 2  ;;  %v10168_v38 = vld [vmem:[#allocation88_spill] sm:$0xff] }
 0x2d0   :  { %v4735_v46 = vsel %vm4733_vm12, %v10157_v27, %v10156_v41  ;;  %v4738_v53 = vsel %vm4736_vm13, %v10158_v47, %v10155_v31  ;;  %vm10160_vm10 = vweird.f32 %v10159_v13  ;;  %v10162_v44 = vxor.u32 2147483648, %v10161_v28 }
 0x2d1   :  { %v4739_v40 = vsel %vm4732_vm0, %v4735_v46, %v4738_v53  ;;  %v10164_v15 = vxor.u32 2147483648, %v10163_v54  ;;  %vm4939_vm15 = vcmp.eq.s32.totalorder %v4937_v63, 0  ;;  %v10166_v25 = vxor.u32 2147483648, %v10165_v58 }
 0x2d2   :  { %v4740_v5 = vsel %vm10160_vm10, nan, %v4739_v40  ;;  %v4838_v21 = vsel %vm4836_vm5, %v10163_v54, %v10162_v44  ;;  %vm4942_vm8 = vcmp.eq.s32.totalorder %v4937_v63, 2  ;;  %v5040_v57 = vand.u32 3, %v10168_v38  ;;  %v10173_v40 = vld [vmem:[#allocation91_spill] sm:$0xff] }
 0x2d3   :  { %v4841_v2 = vsel %vm4839_vm2, %v10164_v15, %v10161_v28  ;;  %v4941_v55 = vsel %vm4939_vm15, %v10167_v14, %v10166_v25  ;;  %vm10170_vm1 = vweird.f32 %v10169_v45  ;;  %v10171_v41 = vxor.u32 2147483648, %v10167_v14  ;;  %v10175_v28 = vld [vmem:[#allocation90_spill] sm:$0xff] }
 0x2d4   :  { %v4842_v6 = vsel %vm4835_vm14, %v4838_v21, %v4841_v2  ;;  %v5143_v46 = vand.u32 3, %v8806_v17  ;;  %v5246_v47 = vand.u32 3, %v8928_v16  ;;  %vm5041_vm7 = vcmp.lt.s32.totalorder %v5040_v57, 2 }
 0x2d5   :  { %v4843_v31 = vsel %vm10170_vm1, nan, %v4842_v6  ;;  %v4944_v27 = vsel %vm4942_vm8, %v10171_v41, %v10165_v58  ;;  %vm5042_vm9 = vcmp.eq.s32.totalorder %v5040_v57, 0  ;;  %vm5045_vm0 = vcmp.eq.s32.totalorder %v5040_v57, 2 }
 0x2d6   :  { %v4945_v53 = vsel %vm4938_vm6, %v4941_v55, %v4944_v27  ;;  %vm10172_vm12 = vweird.f32 %v9974_v50  ;;  %v10174_v13 = vxor.u32 2147483648, %v10173_v40  ;;  %v10176_v54 = vxor.u32 2147483648, %v10175_v28 }
 0x2d7   :  { %v4946_v63 = vsel %vm10172_vm12, nan, %v4945_v53  ;;  %vm5144_vm13 = vcmp.lt.s32.totalorder %v5143_v46, 2  ;;  %vm5145_vm3 = vcmp.eq.s32.totalorder %v5143_v46, 0  ;;  %vm5148_vm14 = vcmp.eq.s32.totalorder %v5143_v46, 2 }
 0x2d8   :  { %v5044_v44 = vsel %vm5042_vm9, %v10175_v28, %v10174_v13  ;;  %v5047_v21 = vsel %vm5045_vm0, %v10176_v54, %v10173_v40  ;;  %vm5247_vm5 = vcmp.lt.s32.totalorder %v5246_v47, 2  ;;  %vm10177_vm2 = vweird.f32 %v9982_v34 }
 0x2d9   :  { %v5048_v15 = vsel %vm5041_vm7, %v5044_v44, %v5047_v21  ;;  %v5147_v50 = vsel %vm5145_vm3, %v8983_v12, %v2536_v49  ;;  %v5150_v16 = vsel %vm5148_vm14, %v2539_v9, %v8999_v7  ;;  %vm5248_vm6 = vcmp.eq.s32.totalorder %v5246_v47, 0 }
 0x2da   :  { %v5049_v17 = vsel %vm10177_vm2, nan, %v5048_v15  ;;  %v5151_v2 = vsel %vm5144_vm13, %v5147_v50, %v5150_v16  ;;  %v5250_v6 = vsel %vm5248_vm6, %v9125_v48, %v2640_v60  ;;  %vm5251_vm10 = vcmp.eq.s32.totalorder %v5246_v47, 2 }
 0x2db   :  { %v5349_v58 = vand.u32 3, %v9077_v22  ;;  %vm10178_vm15 = vweird.f32 %v9994_v29  ;;  %v5253_v49 = vsel %vm5251_vm10, %v2643_v1, %v9130_v24  ;;  %v5359_v12 = vmul.f32 %v9148_v30, %v8844_v59 }
 0x2dc   :  { %v5152_v34 = vsel %vm10178_vm15, nan, %v5151_v2  ;;  %v5360_v7 = vmul.f32 %v9167_v0, %v8844_v59  ;;  %v5254_v9 = vsel %vm5247_vm5, %v5250_v6, %v5253_v49  ;;  %v5361_v24 = vmul.f32 %v9181_v39, %v8844_v59 }
 0x2dd   :  { %vm5350_vm8 = vcmp.lt.s32.totalorder %v5349_v58, 2  ;;  %vm5351_vm1 = vcmp.eq.s32.totalorder %v5349_v58, 0  ;;  %vm5354_vm7 = vcmp.eq.s32.totalorder %v5349_v58, 2  ;;  %v5255_v22 = vsel %vm2635_vm4, nan, %v5254_v9 }
 0x2de   :  { %v5353_v29 = vsel %vm5351_vm1, %v9265_v10, %v2744_v8  ;;  %v5356_v48 = vsel %vm5354_vm7, %v2747_v32, %v9274_v23  ;;  %v5362_v60 = vmul.f32 %v9194_v35, %v8844_v59  ;;  %v5363_v30 = vmul.f32 %v9209_v18, %v8844_v59 }
 0x2df   :  { %v5357_v1 = vsel %vm5350_vm8, %v5353_v29, %v5356_v48  ;;  %v5364_v19 = vmul.f32 %v9220_v51, %v8844_v59  ;;  %v5365_v10 = vmul.f32 %v9237_v26, %v8844_v59  ;;  %v5366_v23 = vmul.f32 %v9247_v20, %v8844_v59 }
 0x2e0   :  { %v5358_v0 = vsel %vm2739_vm11, nan, %v5357_v1  ;;  %v9450_v39 = vmul.f32 %v9260_v43, %v8944_v33  ;;  %v9454_v35 = vmul.f32 %v9279_v42, %v8944_v33  ;;  %v9458_v18 = vmul.f32 %v9285_v61, %v8944_v33 }
 0x2e1   :  { %v9462_v52 = vmul.f32 %v9315_v11, %v8944_v33  ;;  %v9466_v51 = vmul.f32 %v9321_v62, %v8944_v33  ;;  %v9470_v59 = vmul.f32 %v9337_v4, %v8944_v33  ;;  %v9474_v26 = vmul.f32 %v9347_v37, %v8944_v33 }
 0x2e2   :  { %v9478_v20 = vmul.f32 %v9361_v3, %v8944_v33  ;;  %v5375_v43 = vmul.f32 %v9370_v36, %v9001_v56  ;;  %v5376_v32 = vmul.f32 %v4740_v5, %v9001_v56  ;;  %v5377_v42 = vmul.f32 %v4843_v31, %v9001_v56 }
 0x2e3   :  { %v5378_v8 = vmul.f32 %v4946_v63, %v9001_v56  ;;  %v5379_v61 = vmul.f32 %v5049_v17, %v9001_v56  ;;  %v5380_v11 = vmul.f32 %v5152_v34, %v9001_v56  ;;  %v5381_v62 = vmul.f32 %v5255_v22, %v9001_v56 }
 0x2e4   :  { %v5382_v4 = vmul.f32 %v5358_v0, %v9001_v56  ;;  %vm5407_vm4 = vcmask 1044480   ;;  %v5408_v33 = vrot.slane %v5359_v12, 3  ;;  %v5409_v37 = vrot.slane %v5360_v7, 3 }
 0x2e5   :  { %v5410_v3 = vrot.slane %v5361_v24, 3  ;;  %v5411_v25 = vrot.slane %v5362_v60, 3  ;;  %v5412_v36 = vrot.slane %v5363_v30, 3  ;;  %v5413_v14 = vrot.slane %v5364_v19, 3 }
 0x2e6   :  { %v5414_v5 = vrot.slane %v5365_v10, 3  ;;  %v5415_v55 = vrot.slane %v5366_v23, 3  ;;  %v5416_v38 = vrot.slane %v9450_v39, 3  ;;  %v5418_v57 = vrot.slane %v9454_v35, 3  ;;  %5472 = vst [vmem:[#allocation5 + $0x80] sm:$0xe0] %v5408_v33 }
 0x2e7   :  { %v5420_v45 = vrot.slane %v9458_v18, 3  ;;  %v5422_v31 = vrot.slane %v9462_v52, 3  ;;  %5473 = vst [vmem:[#allocation5 + $0x88] sm:$0xe0] %v5409_v37  ;;  %5474 = vst [vmem:[#allocation5 + $0x90] sm:$0xe0] %v5410_v3 }
 0x2e8   :  { %5475 = vst [vmem:[#allocation5 + $0x98] sm:$0xe0] %v5411_v25  ;;  %v5424_v56 = vrot.slane %v9466_v51, 3  ;;  %v5426_v41 = vrot.slane %v9470_v59, 3  ;;  %v5428_v27 = vrot.slane %v9474_v26, 3  ;;  %v5430_v46 = vrot.slane %v9478_v20, 3 }
 0x2e9   :  { %5476 = vst [vmem:[#allocation5 + $0xa0] sm:$0xe0] %v5412_v36  ;;  %5477 = vst [vmem:[#allocation5 + $0xa8] sm:$0xe0] %v5413_v14  ;;  %v5417_v47 = vsel %vm5407_vm4, %v5408_v33, %v5416_v38  ;;  %v5419_v53 = vsel %vm5407_vm4, %v5409_v37, %v5418_v57  ;;  %v5421_v63 = vsel %vm5407_vm4, %v5410_v3, %v5420_v45  ;;  %v5432_v21 = vrot.slane %v5375_v43, 3 }
 0x2ea   :  { %5478 = vst [vmem:[#allocation5 + $0xb0] sm:$0xe0] %v5414_v5  ;;  %5479 = vst [vmem:[#allocation5 + $0xb8] sm:$0xe0] %v5415_v55  ;;  %v5423_v40 = vsel %vm5407_vm4, %v5411_v25, %v5422_v31  ;;  %v5425_v13 = vsel %vm5407_vm4, %v5412_v36, %v5424_v56  ;;  %v5427_v28 = vsel %vm5407_vm4, %v5413_v14, %v5426_v41  ;;  %v5434_v15 = vrot.slane %v5376_v32, 3 }
 0x2eb   :  { %v5429_v44 = vsel %vm5407_vm4, %v5414_v5, %v5428_v27  ;;  %v5431_v54 = vsel %vm5407_vm4, %v5415_v55, %v5430_v46  ;;  %5480 = vst [vmem:[#allocation5 + $0xc0] sm:$0xff] %v5417_v47  ;;  %5481 = vst [vmem:[#allocation5 + $0xc8] sm:$0xff] %v5419_v53  ;;  %v5436_v17 = vrot.slane %v5377_v42, 3  ;;  %v5438_v50 = vrot.slane %v5378_v8, 3 }
 0x2ec   :  { %5482 = vst [vmem:[#allocation5 + $0xd0] sm:$0xff] %v5421_v63  ;;  %5483 = vst [vmem:[#allocation5 + $0xd8] sm:$0xff] %v5423_v40  ;;  %v5440_v16 = vrot.slane %v5379_v61, 3  ;;  %v5442_v2 = vrot.slane %v5380_v11, 3  ;;  %v5444_v6 = vrot.slane %v5381_v62, 3  ;;  %v5446_v58 = vrot.slane %v5382_v4, 3 }
 0x2ed   :  { %5484 = vst [vmem:[#allocation5 + $0xe0] sm:$0xff] %v5425_v13  ;;  %5485 = vst [vmem:[#allocation5 + $0xe8] sm:$0xff] %v5427_v28  ;;  %v5433_v34 = vsel %vm5407_vm4, %v5416_v38, %v5432_v21  ;;  %v5435_v49 = vsel %vm5407_vm4, %v5418_v57, %v5434_v15  ;;  %v5437_v12 = vsel %vm5407_vm4, %v5420_v45, %v5436_v17 }
 0x2ee   :  { %5486 = vst [vmem:[#allocation5 + $0xf0] sm:$0xff] %v5429_v44  ;;  %5487 = vst [vmem:[#allocation5 + $0xf8] sm:$0xff] %v5431_v54  ;;  %v5439_v7 = vsel %vm5407_vm4, %v5422_v31, %v5438_v50  ;;  %v5441_v9 = vsel %vm5407_vm4, %v5424_v56, %v5440_v16  ;;  %v5443_v22 = vsel %vm5407_vm4, %v5426_v41, %v5442_v2 }
 0x2ef   :  { %v5445_v29 = vsel %vm5407_vm4, %v5428_v27, %v5444_v6  ;;  %v5447_v48 = vsel %vm5407_vm4, %v5430_v46, %v5446_v58  ;;  %5488 = vst [vmem:[#allocation5 + $0x100] sm:$0x7f] %v5433_v34  ;;  %5489 = vst [vmem:[#allocation5 + $0x108] sm:$0x7f] %v5435_v49 }
 0x2f0   :  { %5490 = vst [vmem:[#allocation5 + $0x110] sm:$0x7f] %v5437_v12  ;;  %5491 = vst [vmem:[#allocation5 + $0x118] sm:$0x7f] %v5439_v7 }
 0x2f1   :  { %5492 = vst [vmem:[#allocation5 + $0x120] sm:$0x7f] %v5441_v9  ;;  %5493 = vst [vmem:[#allocation5 + $0x128] sm:$0x7f] %v5443_v22 }
 0x2f2   :  { %5494 = vst [vmem:[#allocation5 + $0x130] sm:$0x7f] %v5445_v29  ;;  %5495 = vst [vmem:[#allocation5 + $0x138] sm:$0x7f] %v5447_v48 }
 0x2f3   :  { %5947 = shalt.err (!%p5944_p12)
}
 0x2f4   :  { %s5948_s30 = scalar_lea.hbm %s9534_s2, 5120 }
 0x2f5   :  { %p5949_p13 = scmp.ne.s32.totalorder %s9534_s2, %s5948_s30  ;;  %p5952_p0 = scmp.lt.u32.totalorder %s5948_s30, %s9534_s2 }
 0x2f7   :  { %p5954_p1 = pnand %p5952_p0, %p5949_p13 }
 0x2f9   :  { %5957 = shalt.err (!%p5954_p1)
}
 0x2fa   :  { %s5971_s7 = smov 1024   ;;  %s5972_s8 = smov 64  }
 0x2fb   :  { %5507 = dma.vmem_to_hbm [thread:$0]  %s9505_s26, 5120, %s9534_s2, [#allocation4], %s5971_s7, %s5971_s7, %s5972_s8  }
 0x2fc   :  { %5960 = dma.done.wait [#allocation4], 5120  }
 0x2fd   :  { %5961 = vsyncadd [#allocation4], 4294962176 }
 0x2fe   :  { %5511 = vsyncpa [#allocation3], 1 }
 0x2ff   :  { %5512 = vsyncpa [#allocation4], 1 }

</bundles_post_ra>
